<compile_context>
chip_gen: v5e
topology: v5e:2x2
jax: 0.10.0
libtpu: 0.0.40
codegen_flags: <defaults>
</compile_context>

<pallas_src>
import functools

import jax
import jax.numpy as jnp
from jax import lax
from jax.experimental import pallas as pl
from jax.experimental.pallas import tpu as pltpu

BN_EPS = 1e-5


# --------------------------------------------------------------------------- #
# in-kernel helpers
# --------------------------------------------------------------------------- #
def _dw3x3_from_phases(phase_refs, w9, stride, Ho, Wo):
    """Depthwise 3x3 conv from stride-phase-decomposed, pre-padded f32 refs.

    phase_refs[(ky % s) * s + (kx % s)][n, i, j, c] == x_pad[n, s*i+ky%s, s*j+kx%s, c]
    w9: (9, C) f32 value (k = 3*ky + kx).  Returns (Nb, Ho, Wo, C) f32.
    """
    acc = None
    for ky in range(3):
        for kx in range(3):
            ref = phase_refs[(ky % stride) * stride + (kx % stride)]
            tap = ref[:, ky // stride: ky // stride + Ho,
                      kx // stride: kx // stride + Wo, :]
            k = 3 * ky + kx
            term = tap * w9[k:k + 1, :]
            acc = term if acc is None else acc + term
    return acc


def _dw3x3_from_padref(pad_ref, w9, Ho, Wo):
    """Depthwise 3x3 (stride 1) from a zero-halo padded (Nb, Ho+2, Wo+2, C) ref."""
    acc = None
    for ky in range(3):
        for kx in range(3):
            tap = pad_ref[:, ky:ky + Ho, kx:kx + Wo, :]
            k = 3 * ky + kx
            term = tap * w9[k:k + 1, :]
            acc = term if acc is None else acc + term
    return acc


def _chansep_kernel(nphase, stride, Cin, Cout, Ho, Wo, Nb, *refs):
    """Nb images per grid step: dw3x3 -> 1x1+BN+ReLU -> dw3x3 -> 1x1+BN (transposed)."""
    f32 = jnp.float32
    phase_in = refs[:nphase]                                  # bf16 HBM->VMEM blocks
    (wa3_ref, wa1_ref, sa_ref, ba_ref,
     wb3_ref, wb1_ref, sb_ref, bb_ref, out_ref) = refs[nphase:nphase + 9]
    phase_f32 = refs[nphase + 9: nphase + 9 + nphase]         # f32 scratch copies
    pad_b = refs[-1]

    # upcast the (pre-padded, phase-decomposed) input once; all subsequent tap
    # slicing happens on f32 VMEM scratch (proven access pattern for odd offsets)
    for i in range(nphase):
        phase_f32[i][...] = phase_in[i][...].astype(f32)

    # ---- a_3x3: depthwise 3x3; stride baked into the phase decomposition ------
    ya = _dw3x3_from_phases(phase_f32, wa3_ref[...], stride, Ho, Wo)  # (Nb,Ho,Wo,Cin)

    # ---- a_1x1 on the MXU with M = Nb*Ho*Wo; eval-BN scale/bias + ReLU in f32 --
    P = Nb * Ho * Wo
    za = jnp.dot(ya.reshape(P, Cin).astype(jnp.bfloat16),
                 wa1_ref[...],                                        # bf16 (Cin,Cout)
                 preferred_element_type=f32)                          # (P, Cout) f32
    za = jnp.maximum(za * sa_ref[...] + ba_ref[...], 0.0)

    # ---- b_3x3: depthwise 3x3, stride 1, via a padded f32 scratch --------------
    pad_b[:, 0:1, :, :] = jnp.zeros((Nb, 1, Wo + 2, Cout), f32)
    pad_b[:, Ho + 1:Ho + 2, :, :] = jnp.zeros((Nb, 1, Wo + 2, Cout), f32)
    pad_b[:, 1:Ho + 1, 0:1, :] = jnp.zeros((Nb, Ho, 1, Cout), f32)
    pad_b[:, 1:Ho + 1, Wo + 1:Wo + 2, :] = jnp.zeros((Nb, Ho, 1, Cout), f32)
    pad_b[:, 1:Ho + 1, 1:Wo + 1, :] = za.reshape(Nb, Ho, Wo, Cout)
    yb = _dw3x3_from_padref(pad_b, wb3_ref[...], Ho, Wo)              # (Nb,Ho,Wo,Cout)

    # ---- b_1x1 (final BN, no ReLU), channels-major output => lane-dense store --
    yb3 = yb.reshape(Nb, Ho * Wo, Cout)
    wb1 = wb1_ref[...]                                                # bf16 (Cout,Cout) OI
    sb = sb_ref[...]                                                  # (Cout, 1) f32
    bb = bb_ref[...]                                                  # (Cout, 1) f32
    for n in range(Nb):
        # NT matmul: (Cout, K=Cout) x (Ho*Wo, K=Cout) -> (Cout, Ho*Wo)
        zbT = lax.dot_general(wb1, yb3[n].astype(jnp.bfloat16),
                              dimension_numbers=(((1,), (1,)), ((), ())),
                              preferred_element_type=f32)
        out_ref[n] = (zbT * sb + bb).astype(out_ref.dtype)


# --------------------------------------------------------------------------- #
# wrapper-side helpers
# --------------------------------------------------------------------------- #
def _fold_bn(gamma, beta, mean, var, eps=BN_EPS):
    scale = (gamma / jnp.sqrt(var + eps)).astype(jnp.float32)
    bias = (beta - mean * scale).astype(jnp.float32)
    return scale, bias


def _tile_bytes(shape, itemsize=4):
    """VMEM bytes for `shape`, dtype-aware ((8,128) f32, (16,128) bf16 tiling)."""
    shape = tuple(int(d) for d in shape)
    if len(shape) < 2:
        shape = (1,) * (2 - len(shape)) + shape
    *lead, s, l = shape
    sub = 8 * max(1, 4 // itemsize)
    s = -(-s // sub) * sub
    l = -(-l // 128) * 128
    n = 1
    for d in lead:
        n *= d
    return n * s * l * itemsize


def _vmem_limit(est_bytes):
    cap = 64 * 2 ** 20            # v7x per-TC size as the safe fallback
    try:
        info = pltpu.get_tpu_info()
        cap = int(getattr(info, "vmem_capacity_bytes", cap)) or cap
    except Exception:
        pass
    return int(min(int(0.8 * cap), max(32 * 2 ** 20, int(1.5 * est_bytes))))


def _pick_batch_block(N, ho_wo, target_rows=2048):
    """Largest divisor of N with Nb*Ho*Wo <= target, preferring >= 2 grid steps."""
    want = max(1, target_rows // max(ho_wo, 1))
    divisors = [d for d in range(1, N + 1) if N % d == 0]
    cands = [d for d in divisors if d <= want]
    nb = max(cands) if cands else 1
    if N // nb < 2:
        smaller = [d for d in divisors if N // d >= 2]
        if smaller:
            nb = max(smaller)
    return nb


def channel_sep_transform(x_nchw, params, stride):
    """Pallas implementation of ChannelSepTransform.forward (eval-mode BN)."""
    N, Cin, H, W = x_nchw.shape
    Cout = params["wa1"].shape[0]
    Ho = (H + 2 - 3) // stride + 1
    Wo = (W + 2 - 3) // stride + 1
    Nb = _pick_batch_block(N, Ho * Wo)
    grid = (N // Nb,)

    # ---- plain-XLA glue (one fused pass over x): NCHW->NHWC transpose, zero pad,
    # ---- stride phase-decomposition, bf16 cast ---------------------------------
    # TODO(synk): an NCHW-native (channels-on-sublanes) depthwise would remove this
    #             transpose entirely.
    Hs = -(-(H + 2) // stride)
    Ws = -(-(W + 2) // stride)
    x_nhwc = jnp.transpose(x_nchw, (0, 2, 3, 1))
    xp = jnp.pad(x_nhwc, ((0, 0), (1, Hs * stride - H - 1),
                          (1, Ws * stride - W - 1), (0, 0)))
    phases = [xp[:, py::stride, px::stride, :].astype(jnp.bfloat16)
              for py in range(stride) for px in range(stride)]
    nphase = len(phases)

    # weights (depthwise taps f32, 1x1 MXU operands bf16) and eval-BN scale/bias
    wa3 = jnp.transpose(params["wa3"][:, 0], (1, 2, 0)).reshape(9, Cin).astype(jnp.float32)
    wb3 = jnp.transpose(params["wb3"][:, 0], (1, 2, 0)).reshape(9, Cout).astype(jnp.float32)
    wa1 = jnp.transpose(params["wa1"][:, :, 0, 0], (1, 0)).astype(jnp.bfloat16)  # (Cin, Cout)
    wb1 = params["wb1"][:, :, 0, 0].astype(jnp.bfloat16)                          # (Cout, Cout) OI
    sa, ba = _fold_bn(*params["bna"])
    sb, bb = _fold_bn(*params["bnb"])
    sa = sa.reshape(1, Cout)
    ba = ba.reshape(1, Cout)
    sb = sb.reshape(Cout, 1)
    bb = bb.reshape(Cout, 1)

    kernel = functools.partial(_chansep_kernel, nphase, stride, Cin, Cout, Ho, Wo, Nb)

    in_specs = (
        [pl.BlockSpec((Nb, Hs, Ws, Cin), lambda g: (g, 0, 0, 0))] * nphase
        + [pl.BlockSpec((9, Cin), lambda g: (0, 0)),
           pl.BlockSpec((Cin, Cout), lambda g: (0, 0)),
           pl.BlockSpec((1, Cout), lambda g: (0, 0)),
           pl.BlockSpec((1, Cout), lambda g: (0, 0)),
           pl.BlockSpec((9, Cout), lambda g: (0, 0)),
           pl.BlockSpec((Cout, Cout), lambda g: (0, 0)),
           pl.BlockSpec((Cout, 1), lambda g: (0, 0)),
           pl.BlockSpec((Cout, 1), lambda g: (0, 0))])

    scratch_shapes = ([pltpu.VMEM((Nb, Hs, Ws, Cin), jnp.float32)] * nphase
                      + [pltpu.VMEM((Nb, Ho + 2, Wo + 2, Cout), jnp.float32)])

    # per-grid-step VMEM footprint (double-buffered I/O blocks + scratch + temps)
    est = (2 * nphase * _tile_bytes((Nb, Hs, Ws, Cin), 2)
           + 2 * _tile_bytes((Nb, Cout, Ho * Wo), 4)
           + nphase * _tile_bytes((Nb, Hs, Ws, Cin), 4)
           + _tile_bytes((Nb, Ho + 2, Wo + 2, Cout), 4)
           + 8 * _tile_bytes((Nb, Ho, Wo, Cout), 4)
           + _tile_bytes((9, Cin)) + _tile_bytes((9, Cout))
           + _tile_bytes((Cin, Cout), 2) + _tile_bytes((Cout, Cout), 2)
           + 2 * _tile_bytes((1, Cout)) + 2 * _tile_bytes((Cout, 1)))
    vmem_limit = _vmem_limit(est)

    flops = 2 * N * Ho * Wo * (9 * Cin + Cin * Cout + 9 * Cout + Cout * Cout)
    bytes_accessed = (2 * N * nphase * Hs * Ws * Cin          # bf16 input phases
                      + 4 * N * Cout * Ho * Wo                # f32 output
                      + 4 * (9 * Cin + 9 * Cout + 4 * Cout)
                      + 2 * (Cin * Cout + Cout * Cout))

    out = pl.pallas_call(
        kernel,
        out_shape=jax.ShapeDtypeStruct((N, Cout, Ho * Wo), jnp.float32),
        grid=grid,
        in_specs=in_specs,
        out_specs=pl.BlockSpec((Nb, Cout, Ho * Wo), lambda g: (g, 0, 0)),
        scratch_shapes=scratch_shapes,
        compiler_params=pltpu.CompilerParams(
            dimension_semantics=("parallel",),
            vmem_limit_bytes=vmem_limit),
        cost_estimate=pl.CostEstimate(flops=int(flops), transcendentals=0,
                                      bytes_accessed=int(bytes_accessed)),
    )(*phases, wa3, wa1, sa, ba, wb3, wb1, sb, bb)

    # (N, Cout, Ho*Wo) -> NCHW is a free reshape (no HBM transpose pass)
    return out.reshape(N, Cout, Ho, Wo)


# ----------------------------- reference (plain JAX) ----------------------------- #
def _reference(x_nchw, params, stride, eps=BN_EPS):
    def bn(y, p):
        g, b, m, v = p
        g, b, m, v = (t[None, :, None, None] for t in (g, b, m, v))
        return (y - m) / jnp.sqrt(v + eps) * g + b

    dn = ("NCHW", "OIHW", "NCHW")
    cin = x_nchw.shape[1]
    cout = params["wa1"].shape[0]
    y = lax.conv_general_dilated(x_nchw, params["wa3"], (stride, stride),
                                 ((1, 1), (1, 1)), dimension_numbers=dn,
                                 feature_group_count=cin)
    y = lax.conv_general_dilated(y, params["wa1"], (1, 1), "VALID",
                                 dimension_numbers=dn)
    y = jax.nn.relu(bn(y, params["bna"]))
    y = lax.conv_general_dilated(y, params["wb3"], (1, 1), ((1, 1), (1, 1)),
                                 dimension_numbers=dn, feature_group_count=cout)
    y = lax.conv_general_dilated(y, params["wb1"], (1, 1), "VALID",
                                 dimension_numbers=dn)
    y = bn(y, params["bnb"])
    return y


def _make_params(key, dim_in, dim_out):
    ks = jax.random.split(key, 6)

    def conv_w(k, o, i, kh, kw):
        fan_in = i * kh * kw
        return jax.random.normal(k, (o, i, kh, kw), jnp.float32) * jnp.sqrt(2.0 / fan_in)

    def bn_p(k, c):
        k0, k1, k2, k3 = jax.random.split(k, 4)
        gamma = jax.random.uniform(k0, (c,), jnp.float32, 0.5, 1.5)
        beta = jax.random.normal(k1, (c,), jnp.float32) * 0.1
        mean = jax.random.normal(k2, (c,), jnp.float32) * 0.1
        var = jax.random.uniform(k3, (c,), jnp.float32, 0.5, 1.5)
        return (gamma, beta, mean, var)

    return {
        "wa3": conv_w(ks[0], dim_in, 1, 3, 3),       # depthwise: (Cin, 1, 3, 3)
        "wa1": conv_w(ks[1], dim_out, dim_in, 1, 1),
        "bna": bn_p(ks[2], dim_out),
        "wb3": conv_w(ks[3], dim_out, 1, 3, 3),      # depthwise: (Cout, 1, 3, 3)
        "wb1": conv_w(ks[4], dim_out, dim_out, 1, 1),
        "bnb": bn_p(ks[5], dim_out),
    }


if __name__ == "__main__":
    key = jax.random.PRNGKey(0)
    k_x, k_p = jax.random.split(key)

    N, dim_in, dim_out, H, W = 2, 4, 16, 16, 16
    x = jax.random.normal(k_x, (N, dim_in, H, W), jnp.float32)
    params = _make_params(k_p, dim_in, dim_out)

    for stride in (1, 2):                       # exercise both the s=1 and s>1 paths
        out = jax.block_until_ready(channel_sep_transform(x, params, stride))
        ref = jax.block_until_ready(_reference(x, params, stride))
        assert out.shape == ref.shape, (stride, out.shape, ref.shape)
        max_err = float(jnp.max(jnp.abs(out - ref)))
        # bf16 activations / MXU operands (f32 accumulation, f32 BN epilogue) vs f32 ref
        assert jnp.allclose(out, ref, atol=5e-2, rtol=5e-2), (stride, max_err)

    print("KERNEL_OK")
</pallas_src>

<mosaic_0001>
module attributes {stable_mosaic.version = 11 : i64} {
  func.func @_chansep_kernel(%arg0: i32, %arg1: memref<1x18x18x4xbf16, #tpu.memory_space<vmem>>, %arg2: memref<9x4xf32, #tpu.memory_space<vmem>>, %arg3: memref<4x16xbf16, #tpu.memory_space<vmem>>, %arg4: memref<1x16xf32, #tpu.memory_space<vmem>>, %arg5: memref<1x16xf32, #tpu.memory_space<vmem>>, %arg6: memref<9x16xf32, #tpu.memory_space<vmem>>, %arg7: memref<16x16xbf16, #tpu.memory_space<vmem>>, %arg8: memref<16x1xf32, #tpu.memory_space<vmem>>, %arg9: memref<16x1xf32, #tpu.memory_space<vmem>>, %arg10: memref<1x16x256xf32, #tpu.memory_space<vmem>>, %arg11: memref<1x18x18x4xf32, #tpu.memory_space<vmem>>, %arg12: memref<1x18x18x16xf32, #tpu.memory_space<vmem>>) attributes {dimension_semantics = [#tpu.dimension_semantics<parallel>], iteration_bounds = array<i64: 2>, scalar_prefetch = 0 : i64, scratch_operands = 2 : i64, tpu.core_type = #tpu.core_type<tc>, window_params = [{transform_indices = @transform_0, window_bounds = array<i64: 1, 18, 18, 4>}, {pipeline_mode = #tpu.pipeline_mode<synchronous>, transform_indices = @transform_1, window_bounds = array<i64: 9, 4>}, {pipeline_mode = #tpu.pipeline_mode<synchronous>, transform_indices = @transform_2, window_bounds = array<i64: 4, 16>}, {pipeline_mode = #tpu.pipeline_mode<synchronous>, transform_indices = @transform_3, window_bounds = array<i64: 1, 16>}, {pipeline_mode = #tpu.pipeline_mode<synchronous>, transform_indices = @transform_4, window_bounds = array<i64: 1, 16>}, {pipeline_mode = #tpu.pipeline_mode<synchronous>, transform_indices = @transform_5, window_bounds = array<i64: 9, 16>}, {pipeline_mode = #tpu.pipeline_mode<synchronous>, transform_indices = @transform_6, window_bounds = array<i64: 16, 16>}, {pipeline_mode = #tpu.pipeline_mode<synchronous>, transform_indices = @transform_7, window_bounds = array<i64: 16, 1>}, {pipeline_mode = #tpu.pipeline_mode<synchronous>, transform_indices = @transform_8, window_bounds = array<i64: 16, 1>}, {transform_indices = @transform_9, window_bounds = array<i64: 1, 16, 256>}]} {
    %c0 = arith.constant 0 : index
    %c0_0 = arith.constant 0 : index
    %c0_1 = arith.constant 0 : index
    %c0_2 = arith.constant 0 : index
    %0 = vector.load %arg1[%c0, %c0_0, %c0_1, %c0_2] : memref<1x18x18x4xbf16, #tpu.memory_space<vmem>>, vector<1x18x18x4xbf16>
    %1 = arith.extf %0 : vector<1x18x18x4xbf16> to vector<1x18x18x4xf32>
    %c0_3 = arith.constant 0 : index
    %c0_4 = arith.constant 0 : index
    %c0_5 = arith.constant 0 : index
    %c0_6 = arith.constant 0 : index
    %2 = vector.load %arg11[%c0_3, %c0_4, %c0_5, %c0_6] : memref<1x18x18x4xf32, #tpu.memory_space<vmem>>, vector<1x18x18x4xf32>
    tpu.vector_store %arg11[%c0_3, %c0_4, %c0_5, %c0_6], %1 {strides = array<i32>} : memref<1x18x18x4xf32, #tpu.memory_space<vmem>>, vector<1x18x18x4xf32>,
    %c0_7 = arith.constant 0 : index
    %c0_8 = arith.constant 0 : index
    %3 = vector.load %arg2[%c0_7, %c0_8] : memref<9x4xf32, #tpu.memory_space<vmem>>, vector<9x4xf32>
    %c0_9 = arith.constant 0 : index
    %c0_10 = arith.constant 0 : index
    %c0_11 = arith.constant 0 : index
    %c0_12 = arith.constant 0 : index
    %4 = vector.load %arg11[%c0_9, %c0_10, %c0_11, %c0_12] : memref<1x18x18x4xf32, #tpu.memory_space<vmem>>, vector<1x16x16x4xf32>
    %5 = vector.extract_strided_slice %3 {offsets = [0, 0], sizes = [1, 4], strides = [1, 1]} : vector<9x4xf32> to vector<1x4xf32>
    %6 = vector.shape_cast %5 : vector<1x4xf32> to vector<1x1x1x4xf32>
    %7 = vector.broadcast %6 : vector<1x1x1x4xf32> to vector<1x16x16x4xf32>
    %8 = arith.mulf %4, %7 : vector<1x16x16x4xf32>
    %c0_13 = arith.constant 0 : index
    %c0_14 = arith.constant 0 : index
    %c1 = arith.constant 1 : index
    %c0_15 = arith.constant 0 : index
    %9 = vector.load %arg11[%c0_13, %c0_14, %c1, %c0_15] : memref<1x18x18x4xf32, #tpu.memory_space<vmem>>, vector<1x16x16x4xf32>
    %10 = vector.extract_strided_slice %3 {offsets = [1, 0], sizes = [1, 4], strides = [1, 1]} : vector<9x4xf32> to vector<1x4xf32>
    %11 = vector.shape_cast %10 : vector<1x4xf32> to vector<1x1x1x4xf32>
    %12 = vector.broadcast %11 : vector<1x1x1x4xf32> to vector<1x16x16x4xf32>
    %13 = arith.mulf %9, %12 : vector<1x16x16x4xf32>
    %14 = arith.addf %8, %13 : vector<1x16x16x4xf32>
    %c0_16 = arith.constant 0 : index
    %c0_17 = arith.constant 0 : index
    %c2 = arith.constant 2 : index
    %c0_18 = arith.constant 0 : index
    %15 = vector.load %arg11[%c0_16, %c0_17, %c2, %c0_18] : memref<1x18x18x4xf32, #tpu.memory_space<vmem>>, vector<1x16x16x4xf32>
    %16 = vector.extract_strided_slice %3 {offsets = [2, 0], sizes = [1, 4], strides = [1, 1]} : vector<9x4xf32> to vector<1x4xf32>
    %17 = vector.shape_cast %16 : vector<1x4xf32> to vector<1x1x1x4xf32>
    %18 = vector.broadcast %17 : vector<1x1x1x4xf32> to vector<1x16x16x4xf32>
    %19 = arith.mulf %15, %18 : vector<1x16x16x4xf32>
    %20 = arith.addf %14, %19 : vector<1x16x16x4xf32>
    %c0_19 = arith.constant 0 : index
    %c1_20 = arith.constant 1 : index
    %c0_21 = arith.constant 0 : index
    %c0_22 = arith.constant 0 : index
    %21 = vector.load %arg11[%c0_19, %c1_20, %c0_21, %c0_22] : memref<1x18x18x4xf32, #tpu.memory_space<vmem>>, vector<1x16x16x4xf32>
    %22 = vector.extract_strided_slice %3 {offsets = [3, 0], sizes = [1, 4], strides = [1, 1]} : vector<9x4xf32> to vector<1x4xf32>
    %23 = vector.shape_cast %22 : vector<1x4xf32> to vector<1x1x1x4xf32>
    %24 = vector.broadcast %23 : vector<1x1x1x4xf32> to vector<1x16x16x4xf32>
    %25 = arith.mulf %21, %24 : vector<1x16x16x4xf32>
    %26 = arith.addf %20, %25 : vector<1x16x16x4xf32>
    %c0_23 = arith.constant 0 : index
    %c1_24 = arith.constant 1 : index
    %c1_25 = arith.constant 1 : index
    %c0_26 = arith.constant 0 : index
    %27 = vector.load %arg11[%c0_23, %c1_24, %c1_25, %c0_26] : memref<1x18x18x4xf32, #tpu.memory_space<vmem>>, vector<1x16x16x4xf32>
    %28 = vector.extract_strided_slice %3 {offsets = [4, 0], sizes = [1, 4], strides = [1, 1]} : vector<9x4xf32> to vector<1x4xf32>
    %29 = vector.shape_cast %28 : vector<1x4xf32> to vector<1x1x1x4xf32>
    %30 = vector.broadcast %29 : vector<1x1x1x4xf32> to vector<1x16x16x4xf32>
    %31 = arith.mulf %27, %30 : vector<1x16x16x4xf32>
    %32 = arith.addf %26, %31 : vector<1x16x16x4xf32>
    %c0_27 = arith.constant 0 : index
    %c1_28 = arith.constant 1 : index
    %c2_29 = arith.constant 2 : index
    %c0_30 = arith.constant 0 : index
    %33 = vector.load %arg11[%c0_27, %c1_28, %c2_29, %c0_30] : memref<1x18x18x4xf32, #tpu.memory_space<vmem>>, vector<1x16x16x4xf32>
    %34 = vector.extract_strided_slice %3 {offsets = [5, 0], sizes = [1, 4], strides = [1, 1]} : vector<9x4xf32> to vector<1x4xf32>
    %35 = vector.shape_cast %34 : vector<1x4xf32> to vector<1x1x1x4xf32>
    %36 = vector.broadcast %35 : vector<1x1x1x4xf32> to vector<1x16x16x4xf32>
    %37 = arith.mulf %33, %36 : vector<1x16x16x4xf32>
    %38 = arith.addf %32, %37 : vector<1x16x16x4xf32>
    %c0_31 = arith.constant 0 : index
    %c2_32 = arith.constant 2 : index
    %c0_33 = arith.constant 0 : index
    %c0_34 = arith.constant 0 : index
    %39 = vector.load %arg11[%c0_31, %c2_32, %c0_33, %c0_34] : memref<1x18x18x4xf32, #tpu.memory_space<vmem>>, vector<1x16x16x4xf32>
    %40 = vector.extract_strided_slice %3 {offsets = [6, 0], sizes = [1, 4], strides = [1, 1]} : vector<9x4xf32> to vector<1x4xf32>
    %41 = vector.shape_cast %40 : vector<1x4xf32> to vector<1x1x1x4xf32>
    %42 = vector.broadcast %41 : vector<1x1x1x4xf32> to vector<1x16x16x4xf32>
    %43 = arith.mulf %39, %42 : vector<1x16x16x4xf32>
    %44 = arith.addf %38, %43 : vector<1x16x16x4xf32>
    %c0_35 = arith.constant 0 : index
    %c2_36 = arith.constant 2 : index
    %c1_37 = arith.constant 1 : index
    %c0_38 = arith.constant 0 : index
    %45 = vector.load %arg11[%c0_35, %c2_36, %c1_37, %c0_38] : memref<1x18x18x4xf32, #tpu.memory_space<vmem>>, vector<1x16x16x4xf32>
    %46 = vector.extract_strided_slice %3 {offsets = [7, 0], sizes = [1, 4], strides = [1, 1]} : vector<9x4xf32> to vector<1x4xf32>
    %47 = vector.shape_cast %46 : vector<1x4xf32> to vector<1x1x1x4xf32>
    %48 = vector.broadcast %47 : vector<1x1x1x4xf32> to vector<1x16x16x4xf32>
    %49 = arith.mulf %45, %48 : vector<1x16x16x4xf32>
    %50 = arith.addf %44, %49 : vector<1x16x16x4xf32>
    %c0_39 = arith.constant 0 : index
    %c2_40 = arith.constant 2 : index
    %c2_41 = arith.constant 2 : index
    %c0_42 = arith.constant 0 : index
    %51 = vector.load %arg11[%c0_39, %c2_40, %c2_41, %c0_42] : memref<1x18x18x4xf32, #tpu.memory_space<vmem>>, vector<1x16x16x4xf32>
    %52 = vector.extract_strided_slice %3 {offsets = [8, 0], sizes = [1, 4], strides = [1, 1]} : vector<9x4xf32> to vector<1x4xf32>
    %53 = vector.shape_cast %52 : vector<1x4xf32> to vector<1x1x1x4xf32>
    %54 = vector.broadcast %53 : vector<1x1x1x4xf32> to vector<1x16x16x4xf32>
    %55 = arith.mulf %51, %54 : vector<1x16x16x4xf32>
    %56 = arith.addf %50, %55 : vector<1x16x16x4xf32>
    %57 = vector.shape_cast %56 : vector<1x16x16x4xf32> to vector<256x4xf32>
    %58 = arith.truncf %57 : vector<256x4xf32> to vector<256x4xbf16>
    %c0_43 = arith.constant 0 : index
    %c0_44 = arith.constant 0 : index
    %59 = vector.load %arg3[%c0_43, %c0_44] : memref<4x16xbf16, #tpu.memory_space<vmem>>, vector<4x16xbf16>
    %cst = arith.constant dense<0.000000e+00> : vector<256x16xf32>
    %60 = tpu.matmul %58, %59, %cst {dimension_numbers = #tpu.dot_dimension_numbers<[1], [0], [0], [1], [0, 0, 1, 1], [], []>} : vector<256x4xbf16>, vector<4x16xbf16>, vector<256x16xf32> -> vector<256x16xf32>
    %c0_45 = arith.constant 0 : index
    %c0_46 = arith.constant 0 : index
    %61 = vector.load %arg4[%c0_45, %c0_46] : memref<1x16xf32, #tpu.memory_space<vmem>>, vector<1x16xf32>
    %62 = vector.broadcast %61 : vector<1x16xf32> to vector<256x16xf32>
    %63 = arith.mulf %60, %62 : vector<256x16xf32>
    %c0_47 = arith.constant 0 : index
    %c0_48 = arith.constant 0 : index
    %64 = vector.load %arg5[%c0_47, %c0_48] : memref<1x16xf32, #tpu.memory_space<vmem>>, vector<1x16xf32>
    %65 = vector.broadcast %64 : vector<1x16xf32> to vector<256x16xf32>
    %66 = arith.addf %63, %65 : vector<256x16xf32>
    %cst_49 = arith.constant 0.000000e+00 : f32
    %67 = vector.broadcast %cst_49 : f32 to vector<256x16xf32>
    %68 = arith.maximumf %66, %67 : vector<256x16xf32>
    %cst_50 = arith.constant 0.000000e+00 : f32
    %69 = vector.broadcast %cst_50 : f32 to vector<1x1x18x16xf32>
    %c0_51 = arith.constant 0 : index
    %c0_52 = arith.constant 0 : index
    %c0_53 = arith.constant 0 : index
    %c0_54 = arith.constant 0 : index
    %70 = vector.load %arg12[%c0_51, %c0_52, %c0_53, %c0_54] : memref<1x18x18x16xf32, #tpu.memory_space<vmem>>, vector<1x1x18x16xf32>
    tpu.vector_store %arg12[%c0_51, %c0_52, %c0_53, %c0_54], %69 {strides = array<i32>} : memref<1x18x18x16xf32, #tpu.memory_space<vmem>>, vector<1x1x18x16xf32>,
    %cst_55 = arith.constant 0.000000e+00 : f32
    %71 = vector.broadcast %cst_55 : f32 to vector<1x1x18x16xf32>
    %c0_56 = arith.constant 0 : index
    %c17 = arith.constant 17 : index
    %c0_57 = arith.constant 0 : index
    %c0_58 = arith.constant 0 : index
    %72 = vector.load %arg12[%c0_56, %c17, %c0_57, %c0_58] : memref<1x18x18x16xf32, #tpu.memory_space<vmem>>, vector<1x1x18x16xf32>
    tpu.vector_store %arg12[%c0_56, %c17, %c0_57, %c0_58], %71 {strides = array<i32>} : memref<1x18x18x16xf32, #tpu.memory_space<vmem>>, vector<1x1x18x16xf32>,
    %cst_59 = arith.constant 0.000000e+00 : f32
    %73 = vector.broadcast %cst_59 : f32 to vector<1x16x1x16xf32>
    %c0_60 = arith.constant 0 : index
    %c1_61 = arith.constant 1 : index
    %c0_62 = arith.constant 0 : index
    %c0_63 = arith.constant 0 : index
    %74 = vector.load %arg12[%c0_60, %c1_61, %c0_62, %c0_63] : memref<1x18x18x16xf32, #tpu.memory_space<vmem>>, vector<1x16x1x16xf32>
    tpu.vector_store %arg12[%c0_60, %c1_61, %c0_62, %c0_63], %73 {strides = array<i32>} : memref<1x18x18x16xf32, #tpu.memory_space<vmem>>, vector<1x16x1x16xf32>,
    %cst_64 = arith.constant 0.000000e+00 : f32
    %75 = vector.broadcast %cst_64 : f32 to vector<1x16x1x16xf32>
    %c0_65 = arith.constant 0 : index
    %c1_66 = arith.constant 1 : index
    %c17_67 = arith.constant 17 : index
    %c0_68 = arith.constant 0 : index
    %76 = vector.load %arg12[%c0_65, %c1_66, %c17_67, %c0_68] : memref<1x18x18x16xf32, #tpu.memory_space<vmem>>, vector<1x16x1x16xf32>
    tpu.vector_store %arg12[%c0_65, %c1_66, %c17_67, %c0_68], %75 {strides = array<i32>} : memref<1x18x18x16xf32, #tpu.memory_space<vmem>>, vector<1x16x1x16xf32>,
    %77 = vector.shape_cast %68 : vector<256x16xf32> to vector<1x16x16x16xf32>
    %c0_69 = arith.constant 0 : index
    %c1_70 = arith.constant 1 : index
    %c1_71 = arith.constant 1 : index
    %c0_72 = arith.constant 0 : index
    %78 = vector.load %arg12[%c0_69, %c1_70, %c1_71, %c0_72] : memref<1x18x18x16xf32, #tpu.memory_space<vmem>>, vector<1x16x16x16xf32>
    tpu.vector_store %arg12[%c0_69, %c1_70, %c1_71, %c0_72], %77 {strides = array<i32>} : memref<1x18x18x16xf32, #tpu.memory_space<vmem>>, vector<1x16x16x16xf32>,
    %c0_73 = arith.constant 0 : index
    %c0_74 = arith.constant 0 : index
    %79 = vector.load %arg6[%c0_73, %c0_74] : memref<9x16xf32, #tpu.memory_space<vmem>>, vector<9x16xf32>
    %c0_75 = arith.constant 0 : index
    %c0_76 = arith.constant 0 : index
    %c0_77 = arith.constant 0 : index
    %c0_78 = arith.constant 0 : index
    %80 = vector.load %arg12[%c0_75, %c0_76, %c0_77, %c0_78] : memref<1x18x18x16xf32, #tpu.memory_space<vmem>>, vector<1x16x16x16xf32>
    %81 = vector.extract_strided_slice %79 {offsets = [0, 0], sizes = [1, 16], strides = [1, 1]} : vector<9x16xf32> to vector<1x16xf32>
    %82 = vector.shape_cast %81 : vector<1x16xf32> to vector<1x1x1x16xf32>
    %83 = vector.broadcast %82 : vector<1x1x1x16xf32> to vector<1x16x16x16xf32>
    %84 = arith.mulf %80, %83 : vector<1x16x16x16xf32>
    %c0_79 = arith.constant 0 : index
    %c0_80 = arith.constant 0 : index
    %c1_81 = arith.constant 1 : index
    %c0_82 = arith.constant 0 : index
    %85 = vector.load %arg12[%c0_79, %c0_80, %c1_81, %c0_82] : memref<1x18x18x16xf32, #tpu.memory_space<vmem>>, vector<1x16x16x16xf32>
    %86 = vector.extract_strided_slice %79 {offsets = [1, 0], sizes = [1, 16], strides = [1, 1]} : vector<9x16xf32> to vector<1x16xf32>
    %87 = vector.shape_cast %86 : vector<1x16xf32> to vector<1x1x1x16xf32>
    %88 = vector.broadcast %87 : vector<1x1x1x16xf32> to vector<1x16x16x16xf32>
    %89 = arith.mulf %85, %88 : vector<1x16x16x16xf32>
    %90 = arith.addf %84, %89 : vector<1x16x16x16xf32>
    %c0_83 = arith.constant 0 : index
    %c0_84 = arith.constant 0 : index
    %c2_85 = arith.constant 2 : index
    %c0_86 = arith.constant 0 : index
    %91 = vector.load %arg12[%c0_83, %c0_84, %c2_85, %c0_86] : memref<1x18x18x16xf32, #tpu.memory_space<vmem>>, vector<1x16x16x16xf32>
    %92 = vector.extract_strided_slice %79 {offsets = [2, 0], sizes = [1, 16], strides = [1, 1]} : vector<9x16xf32> to vector<1x16xf32>
    %93 = vector.shape_cast %92 : vector<1x16xf32> to vector<1x1x1x16xf32>
    %94 = vector.broadcast %93 : vector<1x1x1x16xf32> to vector<1x16x16x16xf32>
    %95 = arith.mulf %91, %94 : vector<1x16x16x16xf32>
    %96 = arith.addf %90, %95 : vector<1x16x16x16xf32>
    %c0_87 = arith.constant 0 : index
    %c1_88 = arith.constant 1 : index
    %c0_89 = arith.constant 0 : index
    %c0_90 = arith.constant 0 : index
    %97 = vector.load %arg12[%c0_87, %c1_88, %c0_89, %c0_90] : memref<1x18x18x16xf32, #tpu.memory_space<vmem>>, vector<1x16x16x16xf32>
    %98 = vector.extract_strided_slice %79 {offsets = [3, 0], sizes = [1, 16], strides = [1, 1]} : vector<9x16xf32> to vector<1x16xf32>
    %99 = vector.shape_cast %98 : vector<1x16xf32> to vector<1x1x1x16xf32>
    %100 = vector.broadcast %99 : vector<1x1x1x16xf32> to vector<1x16x16x16xf32>
    %101 = arith.mulf %97, %100 : vector<1x16x16x16xf32>
    %102 = arith.addf %96, %101 : vector<1x16x16x16xf32>
    %c0_91 = arith.constant 0 : index
    %c1_92 = arith.constant 1 : index
    %c1_93 = arith.constant 1 : index
    %c0_94 = arith.constant 0 : index
    %103 = vector.load %arg12[%c0_91, %c1_92, %c1_93, %c0_94] : memref<1x18x18x16xf32, #tpu.memory_space<vmem>>, vector<1x16x16x16xf32>
    %104 = vector.extract_strided_slice %79 {offsets = [4, 0], sizes = [1, 16], strides = [1, 1]} : vector<9x16xf32> to vector<1x16xf32>
    %105 = vector.shape_cast %104 : vector<1x16xf32> to vector<1x1x1x16xf32>
    %106 = vector.broadcast %105 : vector<1x1x1x16xf32> to vector<1x16x16x16xf32>
    %107 = arith.mulf %103, %106 : vector<1x16x16x16xf32>
    %108 = arith.addf %102, %107 : vector<1x16x16x16xf32>
    %c0_95 = arith.constant 0 : index
    %c1_96 = arith.constant 1 : index
    %c2_97 = arith.constant 2 : index
    %c0_98 = arith.constant 0 : index
    %109 = vector.load %arg12[%c0_95, %c1_96, %c2_97, %c0_98] : memref<1x18x18x16xf32, #tpu.memory_space<vmem>>, vector<1x16x16x16xf32>
    %110 = vector.extract_strided_slice %79 {offsets = [5, 0], sizes = [1, 16], strides = [1, 1]} : vector<9x16xf32> to vector<1x16xf32>
    %111 = vector.shape_cast %110 : vector<1x16xf32> to vector<1x1x1x16xf32>
    %112 = vector.broadcast %111 : vector<1x1x1x16xf32> to vector<1x16x16x16xf32>
    %113 = arith.mulf %109, %112 : vector<1x16x16x16xf32>
    %114 = arith.addf %108, %113 : vector<1x16x16x16xf32>
    %c0_99 = arith.constant 0 : index
    %c2_100 = arith.constant 2 : index
    %c0_101 = arith.constant 0 : index
    %c0_102 = arith.constant 0 : index
    %115 = vector.load %arg12[%c0_99, %c2_100, %c0_101, %c0_102] : memref<1x18x18x16xf32, #tpu.memory_space<vmem>>, vector<1x16x16x16xf32>
    %116 = vector.extract_strided_slice %79 {offsets = [6, 0], sizes = [1, 16], strides = [1, 1]} : vector<9x16xf32> to vector<1x16xf32>
    %117 = vector.shape_cast %116 : vector<1x16xf32> to vector<1x1x1x16xf32>
    %118 = vector.broadcast %117 : vector<1x1x1x16xf32> to vector<1x16x16x16xf32>
    %119 = arith.mulf %115, %118 : vector<1x16x16x16xf32>
    %120 = arith.addf %114, %119 : vector<1x16x16x16xf32>
    %c0_103 = arith.constant 0 : index
    %c2_104 = arith.constant 2 : index
    %c1_105 = arith.constant 1 : index
    %c0_106 = arith.constant 0 : index
    %121 = vector.load %arg12[%c0_103, %c2_104, %c1_105, %c0_106] : memref<1x18x18x16xf32, #tpu.memory_space<vmem>>, vector<1x16x16x16xf32>
    %122 = vector.extract_strided_slice %79 {offsets = [7, 0], sizes = [1, 16], strides = [1, 1]} : vector<9x16xf32> to vector<1x16xf32>
    %123 = vector.shape_cast %122 : vector<1x16xf32> to vector<1x1x1x16xf32>
    %124 = vector.broadcast %123 : vector<1x1x1x16xf32> to vector<1x16x16x16xf32>
    %125 = arith.mulf %121, %124 : vector<1x16x16x16xf32>
    %126 = arith.addf %120, %125 : vector<1x16x16x16xf32>
    %c0_107 = arith.constant 0 : index
    %c2_108 = arith.constant 2 : index
    %c2_109 = arith.constant 2 : index
    %c0_110 = arith.constant 0 : index
    %127 = vector.load %arg12[%c0_107, %c2_108, %c2_109, %c0_110] : memref<1x18x18x16xf32, #tpu.memory_space<vmem>>, vector<1x16x16x16xf32>
    %128 = vector.extract_strided_slice %79 {offsets = [8, 0], sizes = [1, 16], strides = [1, 1]} : vector<9x16xf32> to vector<1x16xf32>
    %129 = vector.shape_cast %128 : vector<1x16xf32> to vector<1x1x1x16xf32>
    %130 = vector.broadcast %129 : vector<1x1x1x16xf32> to vector<1x16x16x16xf32>
    %131 = arith.mulf %127, %130 : vector<1x16x16x16xf32>
    %132 = arith.addf %126, %131 : vector<1x16x16x16xf32>
    %133 = vector.shape_cast %132 : vector<1x16x16x16xf32> to vector<1x256x16xf32>
    %c0_111 = arith.constant 0 : index
    %c0_112 = arith.constant 0 : index
    %134 = vector.load %arg7[%c0_111, %c0_112] : memref<16x16xbf16, #tpu.memory_space<vmem>>, vector<16x16xbf16>
    %c0_113 = arith.constant 0 : index
    %c0_114 = arith.constant 0 : index
    %135 = vector.load %arg8[%c0_113, %c0_114] : memref<16x1xf32, #tpu.memory_space<vmem>>, vector<16x1xf32>
    %c0_115 = arith.constant 0 : index
    %c0_116 = arith.constant 0 : index
    %136 = vector.load %arg9[%c0_115, %c0_116] : memref<16x1xf32, #tpu.memory_space<vmem>>, vector<16x1xf32>
    %137 = vector.shape_cast %133 : vector<1x256x16xf32> to vector<256x16xf32>
    %138 = arith.truncf %137 : vector<256x16xf32> to vector<256x16xbf16>
    %cst_117 = arith.constant dense<0.000000e+00> : vector<16x256xf32>
    %139 = tpu.matmul %134, %138, %cst_117 {dimension_numbers = #tpu.dot_dimension_numbers<[1], [1], [0], [0], [0, 0, 1, 0], [], []>} : vector<16x16xbf16>, vector<256x16xbf16>, vector<16x256xf32> -> vector<16x256xf32>
    %140 = vector.broadcast %135 : vector<16x1xf32> to vector<16x256xf32>
    %141 = arith.mulf %139, %140 : vector<16x256xf32>
    %142 = vector.broadcast %136 : vector<16x1xf32> to vector<16x256xf32>
    %143 = arith.addf %141, %142 : vector<16x256xf32>
    %c0_118 = arith.constant 0 : index
    %c0_119 = arith.constant 0 : index
    %c0_120 = arith.constant 0 : index
    %144 = vector.load %arg10[%c0_118, %c0_119, %c0_120] : memref<1x16x256xf32, #tpu.memory_space<vmem>>, vector<1x16x256xf32>
    %145 = vector.shape_cast %144 : vector<1x16x256xf32> to vector<16x256xf32>
    %146 = vector.shape_cast %143 : vector<16x256xf32> to vector<1x16x256xf32>
    tpu.vector_store %arg10[%c0_118, %c0_119, %c0_120], %146 {strides = array<i32>} : memref<1x16x256xf32, #tpu.memory_space<vmem>>, vector<1x16x256xf32>,
    return
  }
  func.func @transform_0(%arg0: i32) -> (i32, i32, i32, i32) {
    %c0_i32 = arith.constant 0 : i32
    %c0_i32_0 = arith.constant 0 : i32
    %c0_i32_1 = arith.constant 0 : i32
    %c0_i32_2 = arith.constant 0 : i32
    return %arg0, %c0_i32, %c0_i32_0, %c0_i32_1 : i32, i32, i32, i32
  }
  func.func @transform_1(%arg0: i32) -> (i32, i32) {
    %c0_i32 = arith.constant 0 : i32
    %c0_i32_0 = arith.constant 0 : i32
    %c0_i32_1 = arith.constant 0 : i32
    return %c0_i32, %c0_i32_0 : i32, i32
  }
  func.func @transform_2(%arg0: i32) -> (i32, i32) {
    %c0_i32 = arith.constant 0 : i32
    %c0_i32_0 = arith.constant 0 : i32
    %c0_i32_1 = arith.constant 0 : i32
    return %c0_i32, %c0_i32_0 : i32, i32
  }
  func.func @transform_3(%arg0: i32) -> (i32, i32) {
    %c0_i32 = arith.constant 0 : i32
    %c0_i32_0 = arith.constant 0 : i32
    %c0_i32_1 = arith.constant 0 : i32
    return %c0_i32, %c0_i32_0 : i32, i32
  }
  func.func @transform_4(%arg0: i32) -> (i32, i32) {
    %c0_i32 = arith.constant 0 : i32
    %c0_i32_0 = arith.constant 0 : i32
    %c0_i32_1 = arith.constant 0 : i32
    return %c0_i32, %c0_i32_0 : i32, i32
  }
  func.func @transform_5(%arg0: i32) -> (i32, i32) {
    %c0_i32 = arith.constant 0 : i32
    %c0_i32_0 = arith.constant 0 : i32
    %c0_i32_1 = arith.constant 0 : i32
    return %c0_i32, %c0_i32_0 : i32, i32
  }
  func.func @transform_6(%arg0: i32) -> (i32, i32) {
    %c0_i32 = arith.constant 0 : i32
    %c0_i32_0 = arith.constant 0 : i32
    %c0_i32_1 = arith.constant 0 : i32
    return %c0_i32, %c0_i32_0 : i32, i32
  }
  func.func @transform_7(%arg0: i32) -> (i32, i32) {
    %c0_i32 = arith.constant 0 : i32
    %c0_i32_0 = arith.constant 0 : i32
    %c0_i32_1 = arith.constant 0 : i32
    return %c0_i32, %c0_i32_0 : i32, i32
  }
  func.func @transform_8(%arg0: i32) -> (i32, i32) {
    %c0_i32 = arith.constant 0 : i32
    %c0_i32_0 = arith.constant 0 : i32
    %c0_i32_1 = arith.constant 0 : i32
    return %c0_i32, %c0_i32_0 : i32, i32
  }
  func.func @transform_9(%arg0: i32) -> (i32, i32, i32) {
    %c0_i32 = arith.constant 0 : i32
    %c0_i32_0 = arith.constant 0 : i32
    %c0_i32_1 = arith.constant 0 : i32
    return %arg0, %c0_i32, %c0_i32_0 : i32, i32, i32
  }
}

</mosaic_0001>

<bundles_post_ra>
// kernel: tpu_custom_call.1
= control target key start
LH: loop header
LB: loop body
LE: loop exit
PB: predicated region body
PF: predicated region fallthrough
CT: control target
= control target key end

     0   :  { %14 = vsyncpa [#allocation5], 0  ;;  %s5037_s0 = inlined_call_operand.vmem [shape: bf16[2,18,18,4], index: 0, kind: input, shape index: {}]   ;;  %s5038_s1 = inlined_call_operand.vmem [shape: f32[9,4], index: 1, kind: input, shape index: {}]   ;;  %s5039_s2 = inlined_call_operand.vmem [shape: bf16[4,16], index: 2, kind: input, shape index: {}]   ;;  %s5040_s3 = inlined_call_operand.vmem [shape: f32[1,16], index: 3, kind: input, shape index: {}]   ;;  %s5041_s4 = inlined_call_operand.vmem [shape: f32[1,16], index: 4, kind: input, shape index: {}]   ;;  %s5042_s5 = inlined_call_operand.vmem [shape: f32[9,16], index: 5, kind: input, shape index: {}]   ;;  %s5043_s6 = inlined_call_operand.vmem [shape: bf16[16,16], index: 6, kind: input, shape index: {}]   ;;  %s5044_s7 = inlined_call_operand.vmem [shape: f32[16,1], index: 7, kind: input, shape index: {}]   ;;  %s5045_s8 = inlined_call_operand.vmem [shape: f32[16,1], index: 8, kind: input, shape index: {}]   ;;  %s5046_s9 = inlined_call_operand.hbm [shape: f32[2,16,256], index: 9, kind: output, shape index: {}]  }
   0x1   :  { %16 = vsyncpa [#allocation5 + $0x1], 0  ;;  %s2990_s30 = smov 0   ;;  %s2992_s10 = smov 0  }
   0x2   :  { %s2994_s11 = smov 0   ;;  %s2996_s12 = smov 0  }
   0x3 LB: > { %s3011_s13 = sadd.s32 4294967295, %s2934_s12   ;;  %s2738_s14 = sadd.s32 4294967294, %s2934_s12   ;;  %s2934_s12 = sphi %s2996_s12, %s5220_s12   ;;  %s2930_s11 = sphi %s2994_s11, %s5219_s11   ;;  %s2926_s10 = sphi %s2992_s10, %s5218_s10   ;;  %s2922_s30 = sphi %s2990_s30, %s5217_s30  }
   0x4   : > { %s3015_s15 = sadd.s32 1, %s2934_s12   ;;  %s223_s16 = sadd.s32 1, %s2930_s11 }
   0x5   : > { %s220_s17 = ssub.s32 %s2934_s12, %s3015_s15  ;;  %p233_p0 = scmp.ne.s32.totalorder %s2930_s11, %s2926_s10 }
   0x6   : > { %p221_p1 = scmp.eq.s32.totalorder %s220_s17, 0  ;;  %p234_p2 = scmp.eq.s32.totalorder %s3011_s13, 1 }
   0x7   : > { %p239_p3 = scmp.ne.s32.totalorder %s2926_s10, %s2922_s30  ;;  %p240_p4 = scmp.eq.s32.totalorder %s2738_s14, 1 }
   0x8   : > { %s3026_s18 = scalar_select %p221_p1, %s2930_s11, %s223_s16  }
   0x9   : > { %p3028_p5 = por %p234_p2, %p233_p0  ;;  %p3032_p6 = por %p240_p4, %p239_p3 }
   0xa   : > { %p2741_p7 = scmp.ge.s32.totalorder %s2934_s12, 1  ;;  %p290_p8 = scmp.lt.s32.totalorder %s2934_s12, 3 }
   0xc   : > { %p291_p9 = pnand %p2741_p7, %p290_p8 }
   0xe   : > { %294 = sbr.rel (%p291_p9) target bundleno = 596 (0x254), region = 56 }
  0x13   : > { %v1357_v0 = vld [vmem:[%s5039_s2] sm:$0x3]  ;;  %vm1406_vm0 = vcmask 1041408   ;;  %p326_p10 = scmp.lt.s32.totalorder %s3011_s13, 1  ;;  %vm440_vm1 = vcmask 31744   ;;  %vm443_vm2 = vcmask 25600  }
  0x14   : > { %v1408_v1 = vsel %vm1406_vm0, %v1357_v0, 0  ;;  %v496_v11 = vld [vmem:[%s5038_s1] sm:$0xff]  ;;  %v3127_v61 = vld [vmem:[%s5038_s1 + $0x8] ss:$0 sm:$0xff]  ;;  %vm1613_vm3 = vcmask 122880   ;;  %vm1603_vm4 = vcmask 130048  }
  0x15   : > { %1417 = vmatpush.bf16.msra.mxu0 %v1408_v1  ;;  %2817 = vmatpush.bf16.msra.mxu3 %v1408_v1  ;;  %s327_s23 = scalar_select %p326_p10, %s3011_s13, 1  ;;  %v3060_v16 = vperm.slane %v496_v11, 0  ;;  %v3062_v17 = vperm.slane %v496_v11, 1  ;;  %v3064_v18 = vperm.slane %v496_v11, 2  ;;  %v3068_v21 = vperm.slane %v496_v11, 3 }
  0x16   : > { %v3070_v22 = vperm.slane %v496_v11, 4  ;;  %v3072_v23 = vperm.slane %v496_v11, 5  ;;  %v3086_v29 = vperm.slane %v496_v11, 6  ;;  %v3095_v33 = vperm.slane %v496_v11, 7  ;;  %s323_s22 = sand.u32 1, %s2926_s10   ;;  %s2772_s25 = sshll.u32 %s3011_s13, 5 }
  0x17   : > { %s2818_s24 = smul.u32 216, %s327_s23  ;;  %vm1606_vm5 = vcmask 123904   ;;  %s2742_s23 = sshll.u32 %s323_s22, 5 }
  0x18   : > { %s2672_s28 = scalar_lea.hbm %s5046_s9, %s2772_s25  ;;  %s2661_s16 = scalar_lea.sflag [#allocation5], %s323_s22 }
  0x19   : > { %s3046_s27 = scalar_lea.vmem %s5037_s0, %s2818_s24  ;;  %s325_s24 = scalar_lea.vmem [#allocation4], %s2742_s23 }
  0x1a   : > { %v2774_v2 = vld [vmem:[%s3046_s27] sm:$0xff]   ;;  %v334_v3 = vld [vmem:[%s3046_s27 + $0x8] sm:$0x1]  ;;  %v335_v4 = vld [vmem:[%s3046_s27 + $0xc] sm:$0xff]   ;;  %s2673_s29 = sshll.u32 %s325_s24, 4  ;;  %s2675_s14 = sshll.u32 %s2672_s28, 4  ;;  %s2674_s29 = int_to_ptr.vmem [resolvable:$true] %s2673_s29  ;;  %s2676_s14 = int_to_ptr.hbm [resolvable:$true] %s2675_s14 }
  0x1b   : > { %v2775_v5 = vunpack.c.l.bf16 %v2774_v2  ;;  %v2776_v6 = vunpack.c.h.bf16 %v2774_v2  ;;  %v337_v7 = vld [vmem:[%s3046_s27 + $0x14] sm:$0x1]  ;;  %v388_v8 = vunpack.c.l.bf16 %v334_v3  ;;  %v2809_v9 = vld [vmem:[%s3046_s27 + $0x18] sm:$0xff]   ;;  %v389_v10 = vunpack.c.l.bf16 %v335_v4  ;;  %v340_v13 = vld [vmem:[%s3046_s27 + $0x20] sm:$0x1]  ;;  %s2886_s17 = sshra.s32 %s2676_s14, 4  ;;  %s2887_s17 = int_to_ptr.hbm [resolvable:$true] %s2886_s17 }
  0x1c   : > { %v390_v12 = vunpack.c.h.bf16 %v335_v4  ;;  %v391_v14 = vunpack.c.l.bf16 %v337_v7  ;;  %v2779_v15 = vunpack.c.l.bf16 %v2809_v9  ;;  %v353_v19 = vld [vmem:[%s3046_s27 + $0x54] sm:$0xff]   ;;  %v2780_v20 = vunpack.c.h.bf16 %v2809_v9  ;;  %v3075_v24 = vld [vmem:[%s3046_s27 + $0x60] sm:$0xff]   ;;  %v355_v26 = vld [vmem:[%s3046_s27 + $0x5c] sm:$0x1]  ;;  %s2888_s21 = scalar_lea.hbm %s2887_s17, 32  ;;  %s2892_s25 = scalar_lea.hbm %s5046_s9, 64 }
  0x1d   : > { %441 = vst.msk [vmem:[#allocation2] sm:$0xff] %vm440_vm1, %v2775_v5  ;;  %v394_v25 = vunpack.c.l.bf16 %v340_v13  ;;  %v3080_v27 = vld [vmem:[%s3046_s27 + $0x68] sm:$0x1]  ;;  %v3083_v28 = vld [vmem:[%s3046_s27 + $0x6c] sm:$0xff]   ;;  %v3089_v30 = vld [vmem:[%s3046_s27 + $0x74] sm:$0x1]  ;;  %v407_v31 = vunpack.c.l.bf16 %v353_v19  ;;  %v2791_v34 = vunpack.c.l.bf16 %v3075_v24  ;;  %v2792_v35 = vunpack.c.h.bf16 %v3075_v24  ;;  %p2889_p11 = scmp.ne.s32.totalorder %s2887_s17, %s2888_s21  ;;  %p2893_p0 = scmp.lt.s32.totalorder %s2887_s17, %s5046_s9 }
  0x1e   : > { %442 = vst.msk [vmem:[#allocation2 + $0x8] sm:$0xff] %vm440_vm1, %v2776_v6  ;;  %v3092_v32 = vld [vmem:[%s3046_s27 + $0x24] sm:$0xff]   ;;  %v408_v36 = vunpack.c.h.bf16 %v353_v19  ;;  %v3100_v37 = vld [vmem:[%s3046_s27 + $0x78] sm:$0xff]   ;;  %v409_v39 = vunpack.c.l.bf16 %v355_v26  ;;  %v412_v40 = vunpack.c.l.bf16 %v3080_v27  ;;  %v413_v41 = vunpack.c.l.bf16 %v3083_v28  ;;  %v3107_v43 = vld [vmem:[%s3046_s27 + $0x2c] sm:$0x1]  ;;  %p2894_p1 = scmp.lt.s32.totalorder %s2892_s25, %s2888_s21 }
  0x1f   : > { %444 = vst.msk [vmem:[#allocation2 + $0x10] sm:$0x3] %vm443_vm2, %v388_v8  ;;  %v414_v42 = vunpack.c.h.bf16 %v3083_v28  ;;  %v3110_v44 = vld [vmem:[%s3046_s27 + $0x80] sm:$0x1]  ;;  %v415_v49 = vunpack.c.l.bf16 %v3089_v30  ;;  %v395_v50 = vunpack.c.l.bf16 %v3092_v32  ;;  %v396_v51 = vunpack.c.h.bf16 %v3092_v32  ;;  %p2890_p12 = pnand %p2889_p11, %p3028_p5 }
  0x20   : > { %445 = vst.msk [vmem:[#allocation2 + $0x18] sm:$0xff] %vm440_vm1, %v389_v10  ;;  %v2795_v57 = vunpack.c.l.bf16 %v3100_v37  ;;  %v397_v62 = vunpack.c.l.bf16 %v3107_v43  ;;  %v2796_v63 = vunpack.c.h.bf16 %v3100_v37  ;;  %v418_v6 = vunpack.c.l.bf16 %v3110_v44  ;;  %p2895_p2 = por %p2894_p1, %p2893_p0 }
  0x21   : > { %446 = vst.msk [vmem:[#allocation2 + $0x20] sm:$0xff] %vm440_vm1, %v390_v12  ;;  %p2891_p13 = pneg %p2890_p12 }
  0x22   : > { %447 = vst.msk [vmem:[#allocation2 + $0x28] sm:$0x3] %vm443_vm2, %v391_v14 }
  0x23   : > { %448 = vst.msk [vmem:[#allocation2 + $0x30] sm:$0xff] %vm440_vm1, %v2779_v15  ;;  %p2896_p3 = pnand %p2895_p2, %p2891_p13 }
  0x24   : > { %449 = vst.msk [vmem:[#allocation2 + $0x38] sm:$0xff] %vm440_vm1, %v2780_v20  ;;  %v498_v38 = vld [vmem:[#allocation2] sm:$0xff] }
  0x25   : > { %450 = vst.msk [vmem:[#allocation2 + $0x40] sm:$0x3] %vm443_vm2, %v394_v25  ;;  %v499_v45 = vld [vmem:[#allocation2 + $0x8] sm:$0xff]  ;;  %v531_v46 = vmul.f32 %v3060_v16, %v498_v38 }
  0x26   : > { %v563_v47 = vld [vmem:[#allocation2 + $0x1] sm:$0xff]  ;;  %v532_v52 = vmul.f32 %v3060_v16, %v499_v45  ;;  %v564_v53 = vld [vmem:[#allocation2 + $0x9] sm:$0xff]  ;;  %463 = vst.msk [vmem:[#allocation2 + $0xa8] sm:$0xff] %vm440_vm1, %v407_v31 }
  0x27   : > { %v660_v48 = vld [vmem:[#allocation2 + $0x2] sm:$0xff]  ;;  %v596_v54 = vmul.f32 %v3062_v17, %v563_v47  ;;  %v661_v55 = vld [vmem:[#allocation2 + $0xa] sm:$0xff]  ;;  %v597_v58 = vmul.f32 %v3062_v17, %v564_v53  ;;  %v758_v60 = vld [vmem:[#allocation2 + $0x18] sm:$0xff]  ;;  %464 = vst.msk [vmem:[#allocation2 + $0xb0] sm:$0xff] %vm440_vm1, %v408_v36 }
  0x28   : > { %v693_v56 = vmul.f32 %v3064_v18, %v660_v48  ;;  %v694_v59 = vmul.f32 %v3064_v18, %v661_v55  ;;  %v759_v1 = vld [vmem:[#allocation2 + $0x20] sm:$0xff]  ;;  %v791_v2 = vmul.f32 %v3068_v21, %v758_v60  ;;  %465 = vst.msk [vmem:[#allocation2 + $0xb8] sm:$0x3] %vm443_vm2, %v409_v39  ;;  %v533_v5 = vmul.f32 %v758_v60, %v3060_v16 }
  0x29   : > { %v628_v0 = vadd.f32 %v596_v54, %v531_v46  ;;  %v855_v3 = vld [vmem:[#allocation2 + $0x19] sm:$0xff]  ;;  %v629_v7 = vadd.f32 %v597_v58, %v532_v52  ;;  %v792_v8 = vmul.f32 %v3068_v21, %v759_v1  ;;  %v856_v9 = vld [vmem:[#allocation2 + $0x21] sm:$0xff]  ;;  %466 = vst.msk [vmem:[#allocation2 + $0xc0] sm:$0xff] %vm440_vm1, %v2791_v34  ;;  %v534_v20 = vmul.f32 %v759_v1, %v3060_v16 }
  0x2a   : > { %v952_v4 = vld [vmem:[#allocation2 + $0x1a] sm:$0xff]  ;;  %v888_v10 = vmul.f32 %v3070_v22, %v855_v3  ;;  %v953_v11 = vld [vmem:[#allocation2 + $0x22] sm:$0xff]  ;;  %v889_v14 = vmul.f32 %v3070_v22, %v856_v9  ;;  %v3142_v19 = vld [vmem:[#allocation2 + $0x30] sm:$0xff]  ;;  %467 = vst.msk [vmem:[#allocation2 + $0xc8] sm:$0xff] %vm440_vm1, %v2792_v35  ;;  %v598_v31 = vmul.f32 %v855_v3, %v3062_v17  ;;  %v599_v34 = vmul.f32 %v856_v9, %v3062_v17 }
  0x2b   : > { %v985_v12 = vmul.f32 %v3072_v23, %v952_v4  ;;  %v725_v13 = vadd.f32 %v693_v56, %v628_v0  ;;  %v986_v15 = vmul.f32 %v3072_v23, %v953_v11  ;;  %v726_v24 = vadd.f32 %v694_v59, %v629_v7  ;;  %v3146_v25 = vld [vmem:[#allocation2 + $0x38] sm:$0xff]  ;;  %468 = vst.msk [vmem:[#allocation2 + $0xd0] sm:$0x3] %vm443_vm2, %v412_v40 }
  0x2c   : > { %v1083_v26 = vmul.f32 %v3086_v29, %v3142_v19  ;;  %v3150_v27 = vld [vmem:[#allocation2 + $0x31] sm:$0xff]  ;;  %v1084_v35 = vmul.f32 %v3086_v29, %v3146_v25  ;;  %v3159_v38 = vld [vmem:[#allocation2 + $0x39] sm:$0xff]  ;;  %469 = vst.msk [vmem:[#allocation2 + $0xd8] sm:$0xff] %vm440_vm1, %v413_v41  ;;  %v630_v53 = vadd.f32 %v598_v31, %v533_v5  ;;  %v631_v59 = vadd.f32 %v599_v34, %v534_v20 }
  0x2d   : > { %v3152_v30 = vld [vmem:[#allocation2 + $0x32] sm:$0xff]  ;;  %v823_v36 = vadd.f32 %v791_v2, %v725_v13  ;;  %v1180_v39 = vmul.f32 %v3095_v33, %v3150_v27  ;;  %v3163_v45 = vld [vmem:[#allocation2 + $0x3a] sm:$0xff]  ;;  %v824_v40 = vadd.f32 %v792_v8, %v726_v24  ;;  %v1181_v47 = vmul.f32 %v3095_v33, %v3159_v38  ;;  %470 = vst.msk [vmem:[#allocation2 + $0xe0] sm:$0xff] %vm440_vm1, %v414_v42  ;;  %v512_v52 = vld [vmem:[#allocation2 + $0xa8] sm:$0xff] }
  0x2e   : > { %v3167_v46 = vmul.f32 %v3127_v61, %v3152_v30  ;;  %v3174_v48 = vmul.f32 %v3127_v61, %v3163_v45  ;;  %471 = vst.msk [vmem:[#allocation2 + $0xe8] sm:$0x3] %vm443_vm2, %v415_v49  ;;  %v513_v55 = vld [vmem:[#allocation2 + $0xb0] sm:$0xff]  ;;  %v545_v41 = vmul.f32 %v3060_v16, %v512_v52  ;;  %v695_v60 = vmul.f32 %v952_v4, %v3064_v18 }
  0x2f   : > { %v920_v54 = vadd.f32 %v888_v10, %v823_v36  ;;  %v577_v56 = vld [vmem:[#allocation2 + $0xa9] sm:$0xff]  ;;  %v921_v0 = vadd.f32 %v889_v14, %v824_v40  ;;  %v546_v1 = vmul.f32 %v3060_v16, %v513_v55  ;;  %v578_v2 = vld [vmem:[#allocation2 + $0xb1] sm:$0xff]  ;;  %451 = vst.msk [vmem:[#allocation2 + $0x48] sm:$0xff] %vm440_vm1, %v395_v50  ;;  %v696_v4 = vmul.f32 %v953_v11, %v3064_v18 }
  0x30   : > { %v674_v58 = vld [vmem:[#allocation2 + $0xaa] sm:$0xff]  ;;  %v610_v28 = vmul.f32 %v3062_v17, %v577_v56  ;;  %v675_v42 = vld [vmem:[#allocation2 + $0xb2] sm:$0xff]  ;;  %v611_v5 = vmul.f32 %v3062_v17, %v578_v2  ;;  %v3190_v8 = vld [vmem:[#allocation2 + $0xc0] sm:$0xff]  ;;  %452 = vst.msk [vmem:[#allocation2 + $0x50] sm:$0xff] %vm440_vm1, %v396_v51  ;;  %v727_v32 = vadd.f32 %v695_v60, %v630_v53 }
  0x31   : > { %v707_v3 = vmul.f32 %v3064_v18, %v674_v58  ;;  %v1017_v49 = vadd.f32 %v985_v12, %v920_v54  ;;  %v708_v7 = vmul.f32 %v3064_v18, %v675_v42  ;;  %v1018_v9 = vadd.f32 %v986_v15, %v921_v0  ;;  %v3196_v13 = vld [vmem:[#allocation2 + $0xc8] sm:$0xff]  ;;  %453 = vst.msk [vmem:[#allocation2 + $0x58] sm:$0x3] %vm443_vm2, %v397_v62 }
  0x32   : > { %v642_v10 = vadd.f32 %v610_v28, %v545_v41  ;;  %v805_v50 = vmul.f32 %v3068_v21, %v3190_v8  ;;  %v3200_v12 = vld [vmem:[#allocation2 + $0xc1] sm:$0xff]  ;;  %v643_v51 = vadd.f32 %v611_v5, %v546_v1  ;;  %v806_v11 = vmul.f32 %v3068_v21, %v3196_v13  ;;  %v3209_v15 = vld [vmem:[#allocation2 + $0xc9] sm:$0xff]  ;;  %472 = vst.msk [vmem:[#allocation2 + $0xf0] sm:$0xff] %vm440_vm1, %v2795_v57 }
  0x33   : > { %v3202_v14 = vld [vmem:[#allocation2 + $0xc2] sm:$0xff]  ;;  %v1115_v20 = vadd.f32 %v1083_v26, %v1017_v49  ;;  %v902_v24 = vmul.f32 %v3070_v22, %v3200_v12  ;;  %v3213_v31 = vld [vmem:[#allocation2 + $0xca] sm:$0xff]  ;;  %v1116_v43 = vadd.f32 %v1084_v35, %v1018_v9  ;;  %v903_v62 = vmul.f32 %v3070_v22, %v3209_v15  ;;  %v3222_v36 = vld [vmem:[#allocation2 + $0xd8] sm:$0xff]  ;;  %473 = vst.msk [vmem:[#allocation2 + $0xf8] sm:$0xff] %vm440_vm1, %v2796_v63 }
  0x34   : > { %v739_v34 = vadd.f32 %v707_v3, %v642_v10  ;;  %v999_v26 = vmul.f32 %v3072_v23, %v3202_v14  ;;  %v740_v52 = vadd.f32 %v708_v7, %v643_v51  ;;  %v1000_v53 = vmul.f32 %v3072_v23, %v3213_v31  ;;  %v3229_v57 = vld [vmem:[#allocation2 + $0xe0] sm:$0xff]  ;;  %474 = vst.msk [vmem:[#allocation2 + $0x100] sm:$0x3] %vm443_vm2, %v418_v6 }
  0x35   : > { %v1212_v40 = vadd.f32 %v1180_v39, %v1115_v20  ;;  %v1097_v35 = vmul.f32 %v3086_v29, %v3222_v36  ;;  %v3233_v54 = vld [vmem:[#allocation2 + $0xd9] sm:$0xff]  ;;  %v1213_v37 = vadd.f32 %v1181_v47, %v1116_v43  ;;  %v1098_v39 = vmul.f32 %v3086_v29, %v3229_v57  ;;  %v3242_v41 = vld [vmem:[#allocation2 + $0xe1] sm:$0xff] }
  0x36   : > { %v3235_v55 = vld [vmem:[#allocation2 + $0xda] sm:$0xff]  ;;  %v837_v63 = vadd.f32 %v805_v50, %v739_v34  ;;  %v1194_v56 = vmul.f32 %v3095_v33, %v3233_v54  ;;  %v3246_v58 = vld [vmem:[#allocation2 + $0xe2] sm:$0xff]  ;;  %v838_v0 = vadd.f32 %v806_v11, %v740_v52  ;;  %v1195_v44 = vmul.f32 %v3095_v33, %v3242_v41 }
  0x37   : > { %v1309_v60 = vadd.f32 %v3167_v46, %v1212_v40  ;;  %v1291_v6 = vmul.f32 %v3127_v61, %v3235_v55  ;;  %v1310_v47 = vadd.f32 %v3174_v48, %v1213_v37  ;;  %v1292_v2 = vmul.f32 %v3127_v61, %v3246_v58  ;;  %v3262_v5 = vld [vmem:[#allocation2 + $0x48] sm:$0xff]  ;;  %v3264_v7 = vld [vmem:[#allocation2 + $0x50] sm:$0xff] }
  0x38   : > { %v934_v1 = vadd.f32 %v902_v24, %v837_v63  ;;  %v728_v28 = vadd.f32 %v696_v4, %v631_v59  ;;  %v935_v42 = vadd.f32 %v903_v62, %v838_v0  ;;  %v793_v3 = vmul.f32 %v3142_v19, %v3068_v21  ;;  %v3266_v48 = vld [vmem:[#allocation2 + $0x49] sm:$0xff]  ;;  %v3272_v50 = vld [vmem:[#allocation2 + $0x51] sm:$0xff] }
  0x39   : > { %v794_v46 = vmul.f32 %v3146_v25, %v3068_v21  ;;  %v890_v49 = vmul.f32 %v3150_v27, %v3070_v22  ;;  %v1341_v9 = vpack.c.bf16 %v1310_v47, %v1309_v60  ;;  %v891_v59 = vmul.f32 %v3159_v38, %v3070_v22  ;;  %v3276_v43 = vld [vmem:[#allocation2 + $0x4a] sm:$0xff]  ;;  %v3278_v34 = vld [vmem:[#allocation2 + $0x52] sm:$0xff] }
  0x3a   : > { %v1031_v10 = vadd.f32 %v999_v26, %v934_v1  ;;  %v987_v4 = vmul.f32 %v3152_v30, %v3072_v23  ;;  %v1032_v20 = vadd.f32 %v1000_v53, %v935_v42  ;;  %v825_v51 = vadd.f32 %v793_v3, %v727_v32 }
  0x3b   : > { %v826_v11 = vadd.f32 %v794_v46, %v728_v28  ;;  %v988_v24 = vmul.f32 %v3163_v45, %v3072_v23  ;;  %2744 = vmatmul.msk.bf16.vlgmr.msra.gmra.mxu0 %vm440_vm1, %v1341_v9  ;;  %v1085_v26 = vmul.f32 %v3086_v29, %v3262_v5  ;;  %v1086_v40 = vmul.f32 %v3086_v29, %v3264_v7 }
  0x3c   : > { %v1129_v62 = vadd.f32 %v1097_v35, %v1031_v10  ;;  %v1182_v32 = vmul.f32 %v3095_v33, %v3266_v48  ;;  %v1130_v52 = vadd.f32 %v1098_v39, %v1032_v20  ;;  %v922_v53 = vadd.f32 %v890_v49, %v825_v51 }
  0x3d   : > { %v923_v37 = vadd.f32 %v891_v59, %v826_v11  ;;  %v1183_v63 = vmul.f32 %v3095_v33, %v3272_v50  ;;  %v1279_v0 = vmul.f32 %v3127_v61, %v3276_v43  ;;  %v1280_v35 = vmul.f32 %v3127_v61, %v3278_v34 }
  0x3e   : > { %v1226_v60 = vadd.f32 %v1194_v56, %v1129_v62  ;;  %v547_v47 = vmul.f32 %v3190_v8, %v3060_v16  ;;  %v1227_v1 = vadd.f32 %v1195_v44, %v1130_v52  ;;  %v1019_v28 = vadd.f32 %v987_v4, %v922_v53  ;;  %v3325_v52 = vld [vmem:[#allocation2 + $0xfa] sm:$0xff] }
  0x3f   : > { %v1020_v42 = vadd.f32 %v988_v24, %v923_v37  ;;  %v548_v39 = vmul.f32 %v3196_v13, %v3060_v16  ;;  %v612_v46 = vmul.f32 %v3200_v12, %v3062_v17  ;;  %v613_v56 = vmul.f32 %v3209_v15, %v3062_v17 }
  0x40   : > { %v1323_v3 = vadd.f32 %v1291_v6, %v1226_v60  ;;  %v709_v49 = vmul.f32 %v3202_v14, %v3064_v18  ;;  %v1324_v9 = vadd.f32 %v1292_v2, %v1227_v1  ;;  %v1117_v10 = vadd.f32 %v1085_v26, %v1019_v28  ;;  %v3309_v6 = vld [vmem:[#allocation2 + $0xf0] sm:$0xff]  ;;  %v3313_v2 = vld [vmem:[#allocation2 + $0xf8] sm:$0xff] }
  0x41   : > { %v1118_v59 = vadd.f32 %v1086_v40, %v1020_v42  ;;  %v710_v8 = vmul.f32 %v3213_v31, %v3064_v18  ;;  %v644_v44 = vadd.f32 %v612_v46, %v547_v47  ;;  %v645_v4 = vadd.f32 %v613_v56, %v548_v39  ;;  %v3315_v31 = vld [vmem:[#allocation2 + $0xf1] sm:$0xff]  ;;  %v3321_v40 = vld [vmem:[#allocation2 + $0xf9] sm:$0xff] }
  0x42   : > { %v807_v13 = vmul.f32 %v3222_v36, %v3068_v21  ;;  %v808_v12 = vmul.f32 %v3229_v57, %v3068_v21  ;;  %v1348_v15 = vpack.c.bf16 %v1324_v9, %v1323_v3  ;;  %v1214_v20 = vadd.f32 %v1182_v32, %v1117_v10  ;;  %v3323_v32 = vld [vmem:[#allocation2 + $0xf2] sm:$0xff] }
  0x43   : > { %v1215_v51 = vadd.f32 %v1183_v63, %v1118_v59  ;;  %v904_v14 = vmul.f32 %v3233_v54, %v3070_v22  ;;  %v741_v11 = vadd.f32 %v709_v49, %v644_v44  ;;  %v742_v24 = vadd.f32 %v710_v8, %v645_v4  ;;  %v2810_v47 = vld [vmem:[%s3046_s27 + $0x30] sm:$0xff]   ;;  %v346_v3 = vld [vmem:[%s3046_s27 + $0x38] sm:$0x1] }
  0x44   : > { %v905_v62 = vmul.f32 %v3242_v41, %v3070_v22  ;;  %v1001_v26 = vmul.f32 %v3235_v55, %v3072_v23  ;;  %2751 = vmatmul.msk.bf16.vlgmr.msra.gmra.mxu3 %vm440_vm1, %v1348_v15  ;;  %v1311_v53 = vadd.f32 %v1279_v0, %v1214_v20  ;;  %v1002_v63 = vmul.f32 %v3246_v58, %v3072_v23 }
  0x45   : > { %v1312_v37 = vadd.f32 %v1280_v35, %v1215_v51  ;;  %v1099_v60 = vmul.f32 %v3086_v29, %v3309_v6  ;;  %v839_v1 = vadd.f32 %v807_v13, %v741_v11  ;;  %v840_v28 = vadd.f32 %v808_v12, %v742_v24  ;;  %v365_v12 = vld [vmem:[%s3046_s27 + $0x84] sm:$0xff]  }
  0x46   : > { %v1100_v42 = vmul.f32 %v3086_v29, %v3313_v2  ;;  %v1196_v39 = vmul.f32 %v3095_v33, %v3315_v31  ;;  %v1197_v0 = vmul.f32 %v3095_v33, %v3321_v40  ;;  %v1293_v35 = vmul.f32 %v3127_v61, %v3323_v32 }
  0x47   : > { %v1342_v46 = vpack.c.bf16 %v1312_v37, %v1311_v53  ;;  %v1294_v56 = vmul.f32 %v3127_v61, %v3325_v52  ;;  %v936_v49 = vadd.f32 %v904_v14, %v839_v1  ;;  %v937_v9 = vadd.f32 %v905_v62, %v840_v28 }
  0x48   : > { %v2783_v10 = vunpack.c.l.bf16 %v2810_v47  ;;  %v2784_v59 = vunpack.c.h.bf16 %v2810_v47  ;;  %v400_v8 = vunpack.c.l.bf16 %v346_v3  ;;  %v535_v44 = vmul.f32 %v3142_v19, %v3060_v16 }
  0x49   : > { %v536_v4 = vmul.f32 %v3146_v25, %v3060_v16  ;;  %v600_v13 = vmul.f32 %v3150_v27, %v3062_v17  ;;  %v1033_v15 = vadd.f32 %v1001_v26, %v936_v49  ;;  %v1034_v20 = vadd.f32 %v1002_v63, %v937_v9 }
  0x4a   : > { %454 = vst.msk [vmem:[#allocation2 + $0x60] sm:$0xff] %vm440_vm1, %v2783_v10  ;;  %v601_v51 = vmul.f32 %v3159_v38, %v3062_v17  ;;  %v697_v14 = vmul.f32 %v3152_v30, %v3064_v18  ;;  %v698_v25 = vmul.f32 %v3163_v45, %v3064_v18  ;;  %v795_v27 = vmul.f32 %v3262_v5, %v3068_v21  ;;  %v367_v30 = vld [vmem:[%s3046_s27 + $0x8c] sm:$0x1] }
  0x4b   : > { %455 = vst.msk [vmem:[#allocation2 + $0x68] sm:$0xff] %vm440_vm1, %v2784_v59  ;;  %v632_v19 = vadd.f32 %v600_v13, %v535_v44  ;;  %v796_v11 = vmul.f32 %v3264_v7, %v3068_v21  ;;  %2745 = vmatmul.msk.bf16.gmra.mxu0 %vm440_vm1, %v1342_v46  ;;  %v1131_v24 = vadd.f32 %v1099_v60, %v1033_v15  ;;  %v419_v26 = vunpack.c.l.bf16 %v365_v12 }
  0x4c   : > { %v1132_v62 = vadd.f32 %v1100_v42, %v1034_v20  ;;  %456 = vst.msk [vmem:[#allocation2 + $0x70] sm:$0x3] %vm443_vm2, %v400_v8  ;;  %v633_v38 = vadd.f32 %v601_v51, %v536_v4  ;;  %v892_v37 = vmul.f32 %v3266_v48, %v3070_v22  ;;  %v893_v45 = vmul.f32 %v3272_v50, %v3070_v22 }
  0x4d   : > { %v729_v53 = vadd.f32 %v697_v14, %v632_v19  ;;  %v989_v63 = vmul.f32 %v3276_v43, %v3072_v23  ;;  %v1228_v47 = vadd.f32 %v1196_v39, %v1131_v24  ;;  %v990_v60 = vmul.f32 %v3278_v34, %v3072_v23  ;;  %475 = vst.msk [vmem:[#allocation2 + $0x108] sm:$0xff] %vm440_vm1, %v419_v26 }
  0x4e   : > { %v1229_v1 = vadd.f32 %v1197_v0, %v1132_v62  ;;  %v730_v28 = vadd.f32 %v698_v25, %v633_v38  ;;  %v420_v3 = vunpack.c.h.bf16 %v365_v12  ;;  %v421_v46 = vunpack.c.l.bf16 %v367_v30 }
  0x4f   : > { %v827_v42 = vadd.f32 %v795_v27, %v729_v53  ;;  %v549_v49 = vmul.f32 %v3222_v36, %v3060_v16  ;;  %v1325_v9 = vadd.f32 %v1293_v35, %v1228_v47  ;;  %v550_v8 = vmul.f32 %v3229_v57, %v3060_v16  ;;  %v347_v53 = vld [vmem:[%s3046_s27 + $0x3c] sm:$0xff]  }
  0x50   : > { %v1326_v10 = vadd.f32 %v1294_v56, %v1229_v1  ;;  %v828_v59 = vadd.f32 %v796_v11, %v730_v28  ;;  %476 = vst.msk [vmem:[#allocation2 + $0x110] sm:$0xff] %vm440_vm1, %v420_v3  ;;  %v614_v44 = vmul.f32 %v3233_v54, %v3062_v17  ;;  %v615_v4 = vmul.f32 %v3242_v41, %v3062_v17  ;;  %v349_v3 = vld [vmem:[%s3046_s27 + $0x44] sm:$0x1] }
  0x51   : > { %v924_v39 = vadd.f32 %v892_v37, %v827_v42  ;;  %v3379_v0 = vld [vmem:[#allocation2 + $0x60] sm:$0xff]  ;;  %v711_v36 = vmul.f32 %v3235_v55, %v3064_v18  ;;  %477 = vst.msk [vmem:[#allocation2 + $0x118] sm:$0x3] %vm443_vm2, %v421_v46  ;;  %v712_v54 = vmul.f32 %v3246_v58, %v3064_v18  ;;  %v809_v38 = vmul.f32 %v3309_v6, %v3068_v21 }
  0x52   : > { %v1349_v35 = vpack.c.bf16 %v1326_v10, %v1325_v9  ;;  %v925_v56 = vadd.f32 %v893_v45, %v828_v59  ;;  %v3388_v13 = vld [vmem:[#allocation2 + $0x68] sm:$0xff]  ;;  %v1087_v57 = vmul.f32 %v3086_v29, %v3379_v0  ;;  %v646_v11 = vadd.f32 %v614_v44, %v549_v49 }
  0x53   : > { %v3392_v12 = vld [vmem:[#allocation2 + $0x61] sm:$0xff]  ;;  %v1021_v41 = vadd.f32 %v989_v63, %v924_v39  ;;  %v1088_v55 = vmul.f32 %v3086_v29, %v3388_v13  ;;  %v3401_v20 = vld [vmem:[#allocation2 + $0x69] sm:$0xff]  ;;  %v647_v62 = vadd.f32 %v615_v4, %v550_v8  ;;  %v810_v30 = vmul.f32 %v3313_v2, %v3068_v21 }
  0x54   : > { %v3394_v15 = vld [vmem:[#allocation2 + $0x62] sm:$0xff]  ;;  %v1184_v51 = vmul.f32 %v3095_v33, %v3392_v12  ;;  %v3405_v14 = vld [vmem:[#allocation2 + $0x6a] sm:$0xff]  ;;  %v1022_v25 = vadd.f32 %v990_v60, %v925_v56  ;;  %v1185_v27 = vmul.f32 %v3095_v33, %v3401_v20  ;;  %2752 = vmatmul.msk.bf16.gmra.mxu3 %vm440_vm1, %v1349_v35  ;;  %v743_v45 = vadd.f32 %v711_v36, %v646_v11 }
  0x55   : > { %v1281_v19 = vmul.f32 %v3127_v61, %v3394_v15  ;;  %v1282_v58 = vmul.f32 %v3127_v61, %v3405_v14  ;;  %v1119_v24 = vadd.f32 %v1087_v57, %v1021_v41  ;;  %v3418_v26 = vld [vmem:[#allocation2 + $0x108] sm:$0xff]  ;;  %v906_v63 = vmul.f32 %v3315_v31, %v3070_v22 }
  0x56   : > { %v1120_v37 = vadd.f32 %v1088_v55, %v1022_v25  ;;  %v907_v47 = vmul.f32 %v3321_v40, %v3070_v22  ;;  %v744_v28 = vadd.f32 %v712_v54, %v647_v62  ;;  %v1003_v60 = vmul.f32 %v3323_v32, %v3072_v23 }
  0x57   : > { %v1216_v1 = vadd.f32 %v1184_v51, %v1119_v24  ;;  %v1004_v42 = vmul.f32 %v3325_v52, %v3072_v23  ;;  %v841_v49 = vadd.f32 %v809_v38, %v743_v45  ;;  %v3430_v9 = vld [vmem:[#allocation2 + $0x110] sm:$0xff]  ;;  %v1101_v10 = vmul.f32 %v3086_v29, %v3418_v26 }
  0x58   : > { %v1217_v46 = vadd.f32 %v1185_v27, %v1120_v37  ;;  %v3434_v59 = vld [vmem:[#allocation2 + $0x109] sm:$0xff]  ;;  %v401_v39 = vunpack.c.l.bf16 %v347_v53  ;;  %v842_v4 = vadd.f32 %v810_v30, %v744_v28  ;;  %v1102_v36 = vmul.f32 %v3086_v29, %v3430_v9  ;;  %v3440_v35 = vld [vmem:[#allocation2 + $0x111] sm:$0xff] }
  0x59   : > { %v3436_v8 = vld [vmem:[#allocation2 + $0x10a] sm:$0xff]  ;;  %v1313_v44 = vadd.f32 %v1281_v19, %v1216_v1  ;;  %v1198_v56 = vmul.f32 %v3095_v33, %v3434_v59  ;;  %v3444_v57 = vld [vmem:[#allocation2 + $0x112] sm:$0xff]  ;;  %v938_v41 = vadd.f32 %v906_v63, %v841_v49  ;;  %v1199_v55 = vmul.f32 %v3095_v33, %v3440_v35 }
  0x5a   : > { %v1314_v54 = vadd.f32 %v1282_v58, %v1217_v46  ;;  %v1295_v51 = vmul.f32 %v3127_v61, %v3436_v8  ;;  %457 = vst.msk [vmem:[#allocation2 + $0x78] sm:$0xff] %vm440_vm1, %v401_v39  ;;  %v939_v19 = vadd.f32 %v907_v47, %v842_v4  ;;  %v1296_v25 = vmul.f32 %v3127_v61, %v3444_v57  ;;  %v2814_v24 = vld [vmem:[%s3046_s27 + $0x90] sm:$0xff]  }
  0x5b   : > { %v402_v27 = vunpack.c.h.bf16 %v347_v53  ;;  %v403_v11 = vunpack.c.l.bf16 %v349_v3  ;;  %v1035_v38 = vadd.f32 %v1003_v60, %v938_v41  ;;  %v537_v58 = vmul.f32 %v3262_v5, %v3060_v16 }
  0x5c   : > { %v1343_v62 = vpack.c.bf16 %v1314_v54, %v1313_v44  ;;  %v538_v30 = vmul.f32 %v3264_v7, %v3060_v16  ;;  %v1036_v37 = vadd.f32 %v1004_v42, %v939_v19  ;;  %v602_v45 = vmul.f32 %v3266_v48, %v3062_v17  ;;  %v370_v42 = vld [vmem:[%s3046_s27 + $0x98] sm:$0x1] }
  0x5d   : > { %458 = vst.msk [vmem:[#allocation2 + $0x80] sm:$0xff] %vm440_vm1, %v402_v27  ;;  %v603_v53 = vmul.f32 %v3272_v50, %v3062_v17  ;;  %v699_v63 = vmul.f32 %v3276_v43, %v3064_v18  ;;  %v1133_v47 = vadd.f32 %v1101_v10, %v1035_v38  ;;  %v700_v5 = vmul.f32 %v3278_v34, %v3064_v18 }
  0x5e   : > { %2746 = vmatmul.msk.bf16.gmra.mxu0 %vm440_vm1, %v1343_v62  ;;  %459 = vst.msk [vmem:[#allocation2 + $0x88] sm:$0x3] %vm443_vm2, %v403_v11  ;;  %v797_v7 = vmul.f32 %v3379_v0, %v3068_v21  ;;  %v2799_v1 = vunpack.c.l.bf16 %v2814_v24  ;;  %v1134_v28 = vadd.f32 %v1102_v36, %v1036_v37  ;;  %v634_v48 = vadd.f32 %v602_v45, %v537_v58 }
  0x5f   : > { %v635_v60 = vadd.f32 %v603_v53, %v538_v30  ;;  %v798_v50 = vmul.f32 %v3388_v13, %v3068_v21  ;;  %v1230_v43 = vadd.f32 %v1198_v56, %v1133_v47  ;;  %v894_v3 = vmul.f32 %v3392_v12, %v3070_v22 }
  0x60   : > { %v895_v46 = vmul.f32 %v3401_v20, %v3070_v22  ;;  %v991_v34 = vmul.f32 %v3394_v15, %v3072_v23  ;;  %478 = vst.msk [vmem:[#allocation2 + $0x120] sm:$0xff] %vm440_vm1, %v2799_v1  ;;  %v1231_v49 = vadd.f32 %v1199_v55, %v1134_v28  ;;  %v731_v10 = vadd.f32 %v699_v63, %v634_v48 }
  0x61   : > { %v732_v39 = vadd.f32 %v700_v5, %v635_v60  ;;  %v992_v44 = vmul.f32 %v3405_v14, %v3072_v23  ;;  %v3483_v4 = vld [vmem:[#allocation2 + $0x78] sm:$0xff]  ;;  %v1327_v36 = vadd.f32 %v1295_v51, %v1230_v43  ;;  %v2800_v54 = vunpack.c.h.bf16 %v2814_v24 }
  0x62   : > { %v1089_v56 = vmul.f32 %v3086_v29, %v3483_v4  ;;  %v424_v41 = vunpack.c.l.bf16 %v370_v42  ;;  %v1328_v19 = vadd.f32 %v1296_v25, %v1231_v49  ;;  %v829_v27 = vadd.f32 %v797_v7, %v731_v10 }
  0x63   : > { %v830_v11 = vadd.f32 %v798_v50, %v732_v39  ;;  %v551_v62 = vmul.f32 %v3309_v6, %v3060_v16  ;;  %479 = vst.msk [vmem:[#allocation2 + $0x128] sm:$0xff] %vm440_vm1, %v2800_v54  ;;  %v552_v51 = vmul.f32 %v3313_v2, %v3060_v16  ;;  %v616_v24 = vmul.f32 %v3315_v31, %v3062_v17  ;;  %v352_v54 = vld [vmem:[%s3046_s27 + $0x50] sm:$0x1] }
  0x64   : > { %v3489_v55 = vld [vmem:[#allocation2 + $0x80] sm:$0xff]  ;;  %v617_v25 = vmul.f32 %v3321_v40, %v3062_v17  ;;  %v713_v6 = vmul.f32 %v3323_v32, %v3064_v18  ;;  %v1350_v30 = vpack.c.bf16 %v1328_v19, %v1327_v36  ;;  %v926_v37 = vadd.f32 %v894_v3, %v829_v27  ;;  %480 = vst.msk [vmem:[#allocation2 + $0x130] sm:$0x3] %vm443_vm2, %v424_v41  ;;  %v2811_v3 = vld [vmem:[%s3046_s27 + $0x48] sm:$0xff]  }
  0x65   : > { %v3491_v38 = vld [vmem:[#allocation2 + $0x79] sm:$0xff]  ;;  %v927_v45 = vadd.f32 %v895_v46, %v830_v11  ;;  %v1090_v53 = vmul.f32 %v3086_v29, %v3489_v55  ;;  %v3506_v63 = vld [vmem:[#allocation2 + $0x81] sm:$0xff]  ;;  %v648_v1 = vadd.f32 %v616_v24, %v551_v62  ;;  %v714_v60 = vmul.f32 %v3325_v52, %v3064_v18 }
  0x66   : > { %v3493_v58 = vld [vmem:[#allocation2 + $0x7a] sm:$0xff]  ;;  %v3508_v47 = vld [vmem:[#allocation2 + $0x82] sm:$0xff]  ;;  %v1186_v2 = vmul.f32 %v3095_v33, %v3491_v38  ;;  %v1187_v31 = vmul.f32 %v3095_v33, %v3506_v63  ;;  %2753 = vmatmul.msk.bf16.gmra.mxu3 %vm440_vm1, %v1350_v30  ;;  %v1023_v5 = vadd.f32 %v991_v34, %v926_v37  ;;  %v649_v28 = vadd.f32 %v617_v25, %v552_v51 }
  0x67   : > { %v1283_v40 = vmul.f32 %v3127_v61, %v3493_v58  ;;  %v1284_v32 = vmul.f32 %v3127_v61, %v3508_v47  ;;  %v1024_v7 = vadd.f32 %v992_v44, %v927_v45  ;;  %v3520_v48 = vld [vmem:[#allocation2 + $0x120] sm:$0xff]  ;;  %v811_v50 = vmul.f32 %v3418_v26, %v3068_v21 }
  0x68   : > { %v812_v42 = vmul.f32 %v3430_v9, %v3068_v21  ;;  %v908_v43 = vmul.f32 %v3434_v59, %v3070_v22  ;;  %v1121_v46 = vadd.f32 %v1089_v56, %v1023_v5  ;;  %v745_v49 = vadd.f32 %v713_v6, %v648_v1 }
  0x69   : > { %v1122_v34 = vadd.f32 %v1090_v53, %v1024_v7  ;;  %v909_v10 = vmul.f32 %v3440_v35, %v3070_v22  ;;  %v746_v39 = vadd.f32 %v714_v60, %v649_v28  ;;  %v1005_v52 = vmul.f32 %v3436_v8, %v3072_v23 }
  0x6a   : > { %v1006_v44 = vmul.f32 %v3444_v57, %v3072_v23  ;;  %v1103_v36 = vmul.f32 %v3086_v29, %v3520_v48  ;;  %v1218_v41 = vadd.f32 %v1186_v2, %v1121_v46  ;;  %v843_v27 = vadd.f32 %v811_v50, %v745_v49  ;;  %v3540_v56 = vld [vmem:[#allocation2 + $0x128] sm:$0xff]  ;;  %v371_v50 = vld [vmem:[%s3046_s27 + $0x9c] sm:$0xff]  }
  0x6b   : > { %v1219_v19 = vadd.f32 %v1187_v31, %v1122_v34  ;;  %v3542_v11 = vld [vmem:[#allocation2 + $0x121] sm:$0xff]  ;;  %v2787_v51 = vunpack.c.l.bf16 %v2811_v3  ;;  %v844_v24 = vadd.f32 %v812_v42, %v746_v39  ;;  %v1104_v25 = vmul.f32 %v3086_v29, %v3540_v56  ;;  %v3548_v6 = vld [vmem:[#allocation2 + $0x129] sm:$0xff] }
  0x6c   : > { %v3544_v62 = vld [vmem:[#allocation2 + $0x122] sm:$0xff]  ;;  %v1200_v30 = vmul.f32 %v3095_v33, %v3542_v11  ;;  %v3552_v37 = vld [vmem:[#allocation2 + $0x12a] sm:$0xff]  ;;  %v1315_v53 = vadd.f32 %v1283_v40, %v1218_v41  ;;  %v940_v31 = vadd.f32 %v908_v43, %v843_v27  ;;  %v1201_v5 = vmul.f32 %v3095_v33, %v3548_v6 }
  0x6d   : > { %v1297_v45 = vmul.f32 %v3127_v61, %v3544_v62  ;;  %v1316_v2 = vadd.f32 %v1284_v32, %v1219_v19  ;;  %460 = vst.msk [vmem:[#allocation2 + $0x90] sm:$0xff] %vm440_vm1, %v2787_v51  ;;  %v941_v7 = vadd.f32 %v909_v10, %v844_v24  ;;  %v1298_v1 = vmul.f32 %v3127_v61, %v3552_v37 }
  0x6e   : > { %v2788_v28 = vunpack.c.h.bf16 %v2811_v3  ;;  %v406_v60 = vunpack.c.l.bf16 %v352_v54  ;;  %v1037_v46 = vadd.f32 %v1005_v52, %v940_v31  ;;  %v539_v34 = vmul.f32 %v3379_v0, %v3060_v16  ;;  %v373_v54 = vld [vmem:[%s3046_s27 + $0xa4] sm:$0x1] }
  0x6f   : > { %v1344_v42 = vpack.c.bf16 %v1316_v2, %v1315_v53  ;;  %v540_v40 = vmul.f32 %v3388_v13, %v3060_v16  ;;  %v1038_v32 = vadd.f32 %v1006_v44, %v941_v7  ;;  %v604_v43 = vmul.f32 %v3392_v12, %v3062_v17 }
  0x70   : > { %461 = vst.msk [vmem:[#allocation2 + $0x98] sm:$0xff] %vm440_vm1, %v2788_v28  ;;  %v605_v3 = vmul.f32 %v3401_v20, %v3062_v17  ;;  %v701_v49 = vmul.f32 %v3394_v15, %v3064_v18  ;;  %v1135_v10 = vadd.f32 %v1103_v36, %v1037_v46  ;;  %v702_v0 = vmul.f32 %v3405_v14, %v3064_v18 }
  0x71   : > { %2747 = vmatmul.msk.bf16.gmra.mxu0 %vm440_vm1, %v1344_v42  ;;  %462 = vst.msk [vmem:[#allocation2 + $0xa0] sm:$0x3] %vm443_vm2, %v406_v60  ;;  %v799_v13 = vmul.f32 %v3483_v4, %v3068_v21  ;;  %v425_v39 = vunpack.c.l.bf16 %v371_v50  ;;  %v1136_v52 = vadd.f32 %v1104_v25, %v1038_v32  ;;  %v636_v12 = vadd.f32 %v604_v43, %v539_v34 }
  0x72   : > { %v637_v44 = vadd.f32 %v605_v3, %v540_v40  ;;  %v800_v20 = vmul.f32 %v3489_v55, %v3068_v21  ;;  %v1232_v15 = vadd.f32 %v1200_v30, %v1135_v10  ;;  %v896_v36 = vmul.f32 %v3491_v38, %v3070_v22 }
  0x73   : > { %v897_v41 = vmul.f32 %v3506_v63, %v3070_v22  ;;  %v993_v14 = vmul.f32 %v3493_v58, %v3072_v23  ;;  %481 = vst.msk [vmem:[#allocation2 + $0x138] sm:$0xff] %vm440_vm1, %v425_v39  ;;  %v1233_v19 = vadd.f32 %v1201_v5, %v1136_v52  ;;  %v733_v27 = vadd.f32 %v701_v49, %v636_v12 }
  0x74   : > { %v734_v51 = vadd.f32 %v702_v0, %v637_v44  ;;  %v994_v24 = vmul.f32 %v3508_v47, %v3072_v23  ;;  %v3591_v25 = vld [vmem:[#allocation2 + $0x90] sm:$0xff]  ;;  %v1329_v30 = vadd.f32 %v1297_v45, %v1232_v15  ;;  %v426_v2 = vunpack.c.h.bf16 %v371_v50 }
  0x75   : > { %v1091_v53 = vmul.f32 %v3086_v29, %v3591_v25  ;;  %v427_v31 = vunpack.c.l.bf16 %v373_v54  ;;  %v1330_v7 = vadd.f32 %v1298_v1, %v1233_v19  ;;  %v831_v28 = vadd.f32 %v799_v13, %v733_v27 }
  0x76   : > { %v832_v60 = vadd.f32 %v800_v20, %v734_v51  ;;  %v553_v42 = vmul.f32 %v3418_v26, %v3060_v16  ;;  %482 = vst.msk [vmem:[#allocation2 + $0x140] sm:$0xff] %vm440_vm1, %v426_v2  ;;  %v554_v45 = vmul.f32 %v3430_v9, %v3060_v16  ;;  %v618_v50 = vmul.f32 %v3434_v59, %v3062_v17 }
  0x77   : > { %v3597_v5 = vld [vmem:[#allocation2 + $0x98] sm:$0xff]  ;;  %v619_v1 = vmul.f32 %v3440_v35, %v3062_v17  ;;  %v715_v26 = vmul.f32 %v3436_v8, %v3064_v18  ;;  %v1351_v40 = vpack.c.bf16 %v1330_v7, %v1329_v30  ;;  %v928_v32 = vadd.f32 %v896_v36, %v831_v28  ;;  %483 = vst.msk [vmem:[#allocation2 + $0x148] sm:$0x3] %vm443_vm2, %v427_v31 }
  0x78   : > { %v3599_v46 = vld [vmem:[#allocation2 + $0x91] sm:$0xff]  ;;  %v929_v43 = vadd.f32 %v897_v41, %v832_v60  ;;  %v1092_v3 = vmul.f32 %v3086_v29, %v3597_v5  ;;  %v3614_v49 = vld [vmem:[#allocation2 + $0x99] sm:$0xff]  ;;  %v650_v39 = vadd.f32 %v618_v50, %v553_v42  ;;  %v716_v44 = vmul.f32 %v3444_v57, %v3064_v18 }
  0x79   : > { %v3601_v34 = vld [vmem:[#allocation2 + $0x92] sm:$0xff]  ;;  %v3616_v10 = vld [vmem:[#allocation2 + $0x9a] sm:$0xff]  ;;  %v1188_v9 = vmul.f32 %v3095_v33, %v3599_v46  ;;  %v1189_v59 = vmul.f32 %v3095_v33, %v3614_v49  ;;  %2754 = vmatmul.msk.bf16.gmra.mxu3 %vm440_vm1, %v1351_v40  ;;  %v1025_v0 = vadd.f32 %v993_v14, %v928_v32  ;;  %v651_v52 = vadd.f32 %v619_v1, %v554_v45 }
  0x7a   : > { %v1285_v8 = vmul.f32 %v3127_v61, %v3601_v34  ;;  %v1286_v35 = vmul.f32 %v3127_v61, %v3616_v10  ;;  %v1026_v13 = vadd.f32 %v994_v24, %v929_v43  ;;  %v3628_v12 = vld [vmem:[#allocation2 + $0x138] sm:$0xff]  ;;  %v813_v20 = vmul.f32 %v3520_v48, %v3068_v21 }
  0x7b   : > { %v814_v54 = vmul.f32 %v3540_v56, %v3068_v21  ;;  %v910_v15 = vmul.f32 %v3542_v11, %v3070_v22  ;;  %v1123_v36 = vadd.f32 %v1091_v53, %v1025_v0  ;;  %v747_v14 = vadd.f32 %v715_v26, %v650_v39 }
  0x7c   : > { %v1124_v41 = vadd.f32 %v1092_v3, %v1026_v13  ;;  %v911_v19 = vmul.f32 %v3548_v6, %v3070_v22  ;;  %v748_v27 = vadd.f32 %v716_v44, %v651_v52  ;;  %v1007_v51 = vmul.f32 %v3544_v62, %v3072_v23 }
  0x7d   : > { %v1008_v57 = vmul.f32 %v3552_v37, %v3072_v23  ;;  %v1105_v24 = vmul.f32 %v3086_v29, %v3628_v12  ;;  %v1220_v30 = vadd.f32 %v1188_v9, %v1123_v36  ;;  %v845_v31 = vadd.f32 %v813_v20, %v747_v14  ;;  %v3646_v7 = vld [vmem:[#allocation2 + $0x140] sm:$0xff]  ;;  %v3687_v36 = vld [vmem:[#allocation2 + $0xb0] sm:$0xff] }
  0x7e   : > { %v1221_v2 = vadd.f32 %v1189_v59, %v1124_v41  ;;  %v3648_v53 = vld [vmem:[#allocation2 + $0x139] sm:$0xff]  ;;  %v541_v60 = vmul.f32 %v3483_v4, %v3060_v16  ;;  %v846_v42 = vadd.f32 %v814_v54, %v748_v27  ;;  %v1106_v45 = vmul.f32 %v3086_v29, %v3646_v7  ;;  %v3656_v50 = vld [vmem:[#allocation2 + $0x141] sm:$0xff]  ;;  %v3689_v41 = vld [vmem:[#allocation2 + $0xa9] sm:$0xff] }
  0x7f   : > { %v3650_v28 = vld [vmem:[#allocation2 + $0x13a] sm:$0xff]  ;;  %v1202_v1 = vmul.f32 %v3095_v33, %v3648_v53  ;;  %v3660_v26 = vld [vmem:[#allocation2 + $0x142] sm:$0xff]  ;;  %v1317_v32 = vadd.f32 %v1285_v8, %v1220_v30  ;;  %v942_v3 = vadd.f32 %v910_v15, %v845_v31  ;;  %v1203_v4 = vmul.f32 %v3095_v33, %v3656_v50 }
  0x80   : > { %v1299_v40 = vmul.f32 %v3127_v61, %v3650_v28  ;;  %v1318_v43 = vadd.f32 %v1286_v35, %v1221_v2  ;;  %v943_v9 = vadd.f32 %v911_v19, %v846_v42  ;;  %v1300_v59 = vmul.f32 %v3127_v61, %v3660_v26  ;;  %v2815_v42 = vld [vmem:[%s3046_s27 + $0xa8] sm:$0xff]  }
  0x81   : > { %v542_v0 = vmul.f32 %v3489_v55, %v3060_v16  ;;  %v606_v13 = vmul.f32 %v3491_v38, %v3062_v17  ;;  %v1039_v52 = vadd.f32 %v1007_v51, %v942_v3  ;;  %v607_v8 = vmul.f32 %v3506_v63, %v3062_v17  ;;  %v3680_v55 = vld [vmem:[#allocation2 + $0xa8] sm:$0xff]  ;;  %v3695_v51 = vld [vmem:[#allocation2 + $0xb1] sm:$0xff] }
  0x82   : > { %v1345_v39 = vpack.c.bf16 %v1318_v43, %v1317_v32  ;;  %v703_v35 = vmul.f32 %v3493_v58, %v3064_v18  ;;  %v1040_v44 = vadd.f32 %v1008_v57, %v943_v9  ;;  %v704_v54 = vmul.f32 %v3508_v47, %v3064_v18  ;;  %v3697_v57 = vld [vmem:[#allocation2 + $0xaa] sm:$0xff] }
  0x83   : > { %v638_v20 = vadd.f32 %v606_v13, %v541_v60  ;;  %v801_v61 = vmul.f32 %v3591_v25, %v3068_v21  ;;  %v1137_v38 = vadd.f32 %v1105_v24, %v1039_v52  ;;  %v639_v15 = vadd.f32 %v607_v8, %v542_v0  ;;  %v3703_v60 = vld [vmem:[#allocation2 + $0xb2] sm:$0xff] }
  0x84   : > { %2748 = vmatmul.msk.bf16.gmra.mxu0 %vm440_vm1, %v1345_v39  ;;  %v802_v63 = vmul.f32 %v3597_v5, %v3068_v21  ;;  %v898_v58 = vmul.f32 %v3599_v46, %v3070_v22  ;;  %v1138_v47 = vadd.f32 %v1106_v45, %v1040_v44  ;;  %v899_v19 = vmul.f32 %v3614_v49, %v3070_v22  ;;  %v3716_v39 = vld [vmem:[%s5038_s1 + $0x8] ss:$0 sm:$0xff] }
  0x85   : > { %v735_v14 = vadd.f32 %v703_v35, %v638_v20  ;;  %v995_v27 = vmul.f32 %v3601_v34, %v3072_v23  ;;  %v1234_v24 = vadd.f32 %v1202_v1, %v1137_v38  ;;  %v736_v30 = vadd.f32 %v704_v54, %v639_v15  ;;  %v376_v1 = vld [vmem:[%s3046_s27 + $0xb0] sm:$0x1]  ;;  %v3725_v38 = vld [vmem:[%s3046_s27 + $0xb4] sm:$0xff]  }
  0x86   : > { %v996_v2 = vmul.f32 %v3616_v10, %v3072_v23  ;;  %v1093_v31 = vmul.f32 %v3086_v29, %v3680_v55  ;;  %v1235_v45 = vadd.f32 %v1203_v4, %v1138_v47  ;;  %v1094_v43 = vmul.f32 %v3086_v29, %v3687_v36 }
  0x87   : > { %v833_v32 = vadd.f32 %v801_v61, %v735_v14  ;;  %v1190_v3 = vmul.f32 %v3095_v33, %v3689_v41  ;;  %v1331_v9 = vadd.f32 %v1299_v40, %v1234_v24  ;;  %v834_v0 = vadd.f32 %v802_v63, %v736_v30 }
  0x88   : > { %v1191_v13 = vmul.f32 %v3095_v33, %v3695_v51  ;;  %v1287_v4 = vmul.f32 %v3716_v39, %v3697_v57  ;;  %v1332_v52 = vadd.f32 %v1300_v59, %v1235_v45  ;;  %v1288_v35 = vmul.f32 %v3716_v39, %v3703_v60 }
  0x89   : > { %v930_v8 = vadd.f32 %v898_v58, %v833_v32  ;;  %v2803_v44 = vunpack.c.l.bf16 %v2815_v42  ;;  %v931_v20 = vadd.f32 %v899_v19, %v834_v0  ;;  %v2804_v40 = vunpack.c.h.bf16 %v2815_v42 }
  0x8a   : > { %v430_v54 = vunpack.c.l.bf16 %v376_v1  ;;  %v555_v61 = vmul.f32 %v3520_v48, %v3060_v16  ;;  %v1352_v15 = vpack.c.bf16 %v1332_v52, %v1331_v9  ;;  %v556_v59 = vmul.f32 %v3540_v56, %v3060_v16 }
  0x8b   : > { %v1027_v63 = vadd.f32 %v995_v27, %v930_v8  ;;  %484 = vst.msk [vmem:[#allocation2 + $0x150] sm:$0xff] %vm440_vm1, %v2803_v44  ;;  %v620_v58 = vmul.f32 %v3542_v11, %v3062_v17  ;;  %v1028_v47 = vadd.f32 %v996_v2, %v931_v20  ;;  %v621_v14 = vmul.f32 %v3548_v6, %v3062_v17 }
  0x8c   : > { %485 = vst.msk [vmem:[#allocation2 + $0x158] sm:$0xff] %vm440_vm1, %v2804_v40  ;;  %v717_v48 = vmul.f32 %v3544_v62, %v3064_v18  ;;  %v718_v19 = vmul.f32 %v3552_v37, %v3064_v18  ;;  %2755 = vmatmul.msk.bf16.gmra.mxu3 %vm440_vm1, %v1352_v15  ;;  %v815_v11 = vmul.f32 %v3628_v12, %v3068_v21  ;;  %v431_v24 = vunpack.c.l.bf16 %v3725_v38 }
  0x8d   : > { %v1125_v27 = vadd.f32 %v1093_v31, %v1027_v63  ;;  %486 = vst.msk [vmem:[#allocation2 + $0x160] sm:$0x3] %vm443_vm2, %v430_v54  ;;  %v652_v56 = vadd.f32 %v620_v58, %v555_v61  ;;  %v1126_v30 = vadd.f32 %v1094_v43, %v1028_v47  ;;  %v653_v2 = vadd.f32 %v621_v14, %v556_v59 }
  0x8e   : > { %v816_v6 = vmul.f32 %v3646_v7, %v3068_v21  ;;  %v912_v62 = vmul.f32 %v3648_v53, %v3070_v22  ;;  %v913_v31 = vmul.f32 %v3656_v50, %v3070_v22  ;;  %v1009_v45 = vmul.f32 %v3650_v28, %v3072_v23  ;;  %487 = vst.msk [vmem:[#allocation2 + $0x168] sm:$0xff] %vm440_vm1, %v431_v24 }
  0x8f   : > { %v1222_v37 = vadd.f32 %v1190_v3, %v1125_v27  ;;  %v749_v42 = vadd.f32 %v717_v48, %v652_v56  ;;  %v1223_v32 = vadd.f32 %v1191_v13, %v1126_v30  ;;  %v750_v1 = vadd.f32 %v718_v19, %v653_v2  ;;  %v1062_v30 = vld [vmem:[#allocation2 + $0xc0] sm:$0xff]  ;;  %v1063_v2 = vld [vmem:[#allocation2 + $0xc8] sm:$0xff] }
  0x90   : > { %v1010_v43 = vmul.f32 %v3660_v26, %v3072_v23  ;;  %v543_v9 = vmul.f32 %v3591_v25, %v3060_v16  ;;  %v544_v3 = vmul.f32 %v3597_v5, %v3060_v16  ;;  %v608_v8 = vmul.f32 %v3599_v46, %v3062_v17 }
  0x91   : > { %v1319_v0 = vadd.f32 %v1287_v4, %v1222_v37  ;;  %v847_v52 = vadd.f32 %v815_v11, %v749_v42  ;;  %v1320_v44 = vadd.f32 %v1288_v35, %v1223_v32  ;;  %v848_v20 = vadd.f32 %v816_v6, %v750_v1 }
  0x92   : > { %v3761_v40 = vld [vmem:[#allocation2 + $0x150] sm:$0xff]  ;;  %v609_v13 = vmul.f32 %v3614_v49, %v3062_v17  ;;  %v705_v54 = vmul.f32 %v3601_v34, %v3064_v18  ;;  %v640_v46 = vadd.f32 %v608_v8, %v543_v9  ;;  %v706_v35 = vmul.f32 %v3616_v10, %v3064_v18  ;;  %v1256_v9 = vld [vmem:[#allocation2 + $0xc2] sm:$0xff] }
  0x93   : > { %v944_v61 = vadd.f32 %v912_v62, %v847_v52  ;;  %v3767_v25 = vld [vmem:[#allocation2 + $0x158] sm:$0xff]  ;;  %v1107_v4 = vmul.f32 %v3086_v29, %v3761_v40  ;;  %v1346_v63 = vpack.c.bf16 %v1320_v44, %v1319_v0  ;;  %v945_v59 = vadd.f32 %v913_v31, %v848_v20  ;;  %v1159_v31 = vld [vmem:[#allocation2 + $0xc1] sm:$0xff]  ;;  %v1257_v0 = vld [vmem:[#allocation2 + $0xca] sm:$0xff] }
  0x94   : > { %v3771_v5 = vld [vmem:[#allocation2 + $0x151] sm:$0xff]  ;;  %v1108_v49 = vmul.f32 %v3086_v29, %v3767_v25  ;;  %v3779_v34 = vld [vmem:[#allocation2 + $0x159] sm:$0xff]  ;;  %v641_v56 = vadd.f32 %v609_v13, %v544_v3  ;;  %v737_v11 = vadd.f32 %v705_v54, %v640_v46  ;;  %v803_v24 = vmul.f32 %v3680_v55, %v3068_v21 }
  0x95   : > { %v3773_v15 = vld [vmem:[#allocation2 + $0x152] sm:$0xff]  ;;  %v1204_v58 = vmul.f32 %v3095_v33, %v3771_v5  ;;  %v3783_v47 = vld [vmem:[#allocation2 + $0x15a] sm:$0xff]  ;;  %v1041_v14 = vadd.f32 %v1009_v45, %v944_v61  ;;  %v1205_v48 = vmul.f32 %v3095_v33, %v3779_v34  ;;  %2749 = vmatmul.msk.bf16.gmra.mxu0 %vm440_vm1, %v1346_v63  ;;  %v1042_v27 = vadd.f32 %v1010_v43, %v945_v59  ;;  %v1160_v43 = vld [vmem:[#allocation2 + $0xc9] sm:$0xff] }
  0x96   : > { %v1301_v19 = vmul.f32 %v3716_v39, %v3773_v15  ;;  %v1302_v10 = vmul.f32 %v3716_v39, %v3783_v47  ;;  %v804_v62 = vmul.f32 %v3687_v36, %v3068_v21  ;;  %v900_v37 = vmul.f32 %v3689_v41, %v3070_v22  ;;  %v379_v13 = vld [vmem:[%s3046_s27 + $0xbc] sm:$0x1] }
  0x97   : > { %v1139_v6 = vadd.f32 %v1107_v4, %v1041_v14  ;;  %v901_v42 = vmul.f32 %v3695_v51, %v3070_v22  ;;  %v1140_v45 = vadd.f32 %v1108_v49, %v1042_v27  ;;  %v738_v32 = vadd.f32 %v706_v35, %v641_v56 }
  0x98   : > { %v835_v1 = vadd.f32 %v803_v24, %v737_v11  ;;  %v997_v55 = vmul.f32 %v3697_v57, %v3072_v23  ;;  %v998_v36 = vmul.f32 %v3703_v60, %v3072_v23  ;;  %v1095_v41 = vmul.f32 %v3086_v29, %v1062_v30  ;;  %v3831_v30 = vld [vmem:[#allocation2 + $0x168] sm:$0xff] }
  0x99   : > { %v1236_v52 = vadd.f32 %v1204_v58, %v1139_v6  ;;  %v1096_v3 = vmul.f32 %v3086_v29, %v1063_v2  ;;  %v1237_v51 = vadd.f32 %v1205_v48, %v1140_v45  ;;  %v836_v8 = vadd.f32 %v804_v62, %v738_v32  ;;  %v2816_v2 = vld [vmem:[%s3046_s27 + $0xc0] sm:$0xff]  }
  0x9a   : > { %v932_v44 = vadd.f32 %v900_v37, %v835_v1  ;;  %v1192_v20 = vmul.f32 %v3095_v33, %v1159_v31  ;;  %v1193_v57 = vmul.f32 %v3095_v33, %v1160_v43  ;;  %v1289_v61 = vmul.f32 %v3716_v39, %v1256_v9  ;;  %v382_v37 = vld [vmem:[%s3046_s27 + $0xc8] sm:$0x1] }
  0x9b   : > { %v1333_v54 = vadd.f32 %v1301_v19, %v1236_v52  ;;  %v1290_v4 = vmul.f32 %v3716_v39, %v1257_v0  ;;  %v1334_v46 = vadd.f32 %v1302_v10, %v1237_v51  ;;  %v933_v35 = vadd.f32 %v901_v42, %v836_v8 }
  0x9c   : > { %v1029_v60 = vadd.f32 %v997_v55, %v932_v44  ;;  %v432_v63 = vunpack.c.h.bf16 %v3725_v38  ;;  %v433_v59 = vunpack.c.l.bf16 %v379_v13  ;;  %v557_v49 = vmul.f32 %v3628_v12, %v3060_v16 }
  0x9d   : > { %v558_v58 = vmul.f32 %v3646_v7, %v3060_v16  ;;  %v622_v14 = vmul.f32 %v3648_v53, %v3062_v17  ;;  %v1353_v48 = vpack.c.bf16 %v1334_v46, %v1333_v54  ;;  %v1030_v19 = vadd.f32 %v998_v36, %v933_v35 }
  0x9e   : > { %v1127_v27 = vadd.f32 %v1095_v41, %v1029_v60  ;;  %488 = vst.msk [vmem:[#allocation2 + $0x170] sm:$0xff] %vm440_vm1, %v432_v63  ;;  %v623_v10 = vmul.f32 %v3656_v50, %v3062_v17  ;;  %v719_v12 = vmul.f32 %v3650_v28, %v3064_v18  ;;  %v720_v7 = vmul.f32 %v3660_v26, %v3064_v18 }
  0x9f   : > { %489 = vst.msk [vmem:[#allocation2 + $0x178] sm:$0x3] %vm443_vm2, %v433_v59  ;;  %v654_v38 = vadd.f32 %v622_v14, %v557_v49  ;;  %v817_v53 = vmul.f32 %v3761_v40, %v3068_v21  ;;  %2756 = vmatmul.msk.bf16.gmra.mxu3 %vm440_vm1, %v1353_v48  ;;  %v1128_v56 = vadd.f32 %v1096_v3, %v1030_v19  ;;  %v2807_v43 = vunpack.c.l.bf16 %v2816_v2 }
  0xa0   : > { %v1224_v11 = vadd.f32 %v1192_v20, %v1127_v27  ;;  %v655_v24 = vadd.f32 %v623_v10, %v558_v58  ;;  %v818_v50 = vmul.f32 %v3767_v25, %v3068_v21  ;;  %v914_v28 = vmul.f32 %v3771_v5, %v3070_v22  ;;  %v383_v27 = vld [vmem:[%s3046_s27 + $0xcc] sm:$0xff]  }
  0xa1   : > { %v751_v6 = vadd.f32 %v719_v12, %v654_v38  ;;  %v915_v26 = vmul.f32 %v3779_v34, %v3070_v22  ;;  %v1011_v62 = vmul.f32 %v3773_v15, %v3072_v23  ;;  %v1225_v42 = vadd.f32 %v1193_v57, %v1128_v56  ;;  %490 = vst.msk [vmem:[#allocation2 + $0x180] sm:$0xff] %vm440_vm1, %v2807_v43 }
  0xa2   : > { %v1321_v31 = vadd.f32 %v1289_v61, %v1224_v11  ;;  %v752_v45 = vadd.f32 %v720_v7, %v655_v24  ;;  %v1012_v32 = vmul.f32 %v3783_v47, %v3072_v23  ;;  %v1109_v55 = vmul.f32 %v3086_v29, %v3831_v30 }
  0xa3   : > { %v849_v1 = vadd.f32 %v817_v53, %v751_v6  ;;  %v2808_v9 = vunpack.c.h.bf16 %v2816_v2  ;;  %v1322_v0 = vadd.f32 %v1290_v4, %v1225_v42  ;;  %v436_v36 = vunpack.c.l.bf16 %v382_v37  ;;  %v385_v42 = vld [vmem:[%s3046_s27 + $0xd4] sm:$0x1] }
  0xa4   : > { %v850_v52 = vadd.f32 %v818_v50, %v752_v45  ;;  %v559_v41 = vmul.f32 %v3761_v40, %v3060_v16  ;;  %v560_v20 = vmul.f32 %v3767_v25, %v3060_v16  ;;  %v624_v13 = vmul.f32 %v3771_v5, %v3062_v17 }
  0xa5   : > { %v946_v3 = vadd.f32 %v914_v28, %v849_v1  ;;  %v1077_v51 = vld [vmem:[#allocation2 + $0x170] sm:$0xff]  ;;  %v625_v54 = vmul.f32 %v3779_v34, %v3062_v17  ;;  %v1347_v57 = vpack.c.bf16 %v1322_v0, %v1321_v31  ;;  %491 = vst.msk [vmem:[#allocation2 + $0x188] sm:$0xff] %vm440_vm1, %v2808_v9  ;;  %v721_v49 = vmul.f32 %v3773_v15, %v3064_v18 }
  0xa6   : > { %v1173_v8 = vld [vmem:[#allocation2 + $0x169] sm:$0xff]  ;;  %v947_v61 = vadd.f32 %v915_v26, %v850_v52  ;;  %v1110_v40 = vmul.f32 %v3086_v29, %v1077_v51  ;;  %v1174_v4 = vld [vmem:[#allocation2 + $0x171] sm:$0xff]  ;;  %492 = vst.msk [vmem:[#allocation2 + $0x190] sm:$0x3] %vm443_vm2, %v436_v36  ;;  %v656_v63 = vadd.f32 %v624_v13, %v559_v41  ;;  %v722_v14 = vmul.f32 %v3783_v47, %v3064_v18 }
  0xa7   : > { %v3847_v44 = vld [vmem:[#allocation2 + $0x16a] sm:$0xff]  ;;  %v1043_v46 = vadd.f32 %v1011_v62, %v946_v3  ;;  %v1206_v35 = vmul.f32 %v3095_v33, %v1173_v8  ;;  %v1207_v60 = vmul.f32 %v3095_v33, %v1174_v4  ;;  %v1271_v25 = vld [vmem:[#allocation2 + $0x172] sm:$0xff]  ;;  %2750 = vmatmul.msk.bf16.gmra.mxu0 %vm440_vm1, %v1347_v57  ;;  %v657_v59 = vadd.f32 %v625_v54, %v560_v20 }
  0xa8   : > { %v1303_v5 = vmul.f32 %v3716_v39, %v3847_v44  ;;  %v1044_v34 = vadd.f32 %v1012_v32, %v947_v61  ;;  %v819_v48 = vmul.f32 %v3831_v30, %v3068_v21  ;;  %v820_v19 = vmul.f32 %v1077_v51, %v3068_v21  ;;  %v1078_v50 = vld [vmem:[#allocation2 + $0x180] sm:$0xff] }
  0xa9   : > { %v1141_v58 = vadd.f32 %v1109_v55, %v1043_v46  ;;  %v1304_v38 = vmul.f32 %v3716_v39, %v1271_v25  ;;  %v753_v12 = vadd.f32 %v721_v49, %v656_v63  ;;  %v916_v7 = vmul.f32 %v1173_v8, %v3070_v22 }
  0xaa   : > { %v1142_v10 = vadd.f32 %v1110_v40, %v1044_v34  ;;  %v754_v56 = vadd.f32 %v722_v14, %v657_v59  ;;  %v917_v15 = vmul.f32 %v1174_v4, %v3070_v22  ;;  %v1013_v47 = vmul.f32 %v3847_v44, %v3072_v23 }
  0xab   : > { %v1238_v53 = vadd.f32 %v1206_v35, %v1141_v58  ;;  %v851_v24 = vadd.f32 %v819_v48, %v753_v12  ;;  %v437_v2 = vunpack.c.l.bf16 %v383_v27  ;;  %v1014_v26 = vmul.f32 %v1271_v25, %v3072_v23  ;;  %v3904_v48 = vld [vmem:[%s5040_s3] ss:$0 sm:$0xff] }
  0xac   : > { %v1239_v11 = vadd.f32 %v1207_v60, %v1142_v10  ;;  %v852_v28 = vadd.f32 %v820_v19, %v754_v56  ;;  %v1079_v62 = vld [vmem:[#allocation2 + $0x188] sm:$0xff]  ;;  %v438_v31 = vunpack.c.h.bf16 %v383_v27  ;;  %v1111_v1 = vmul.f32 %v3086_v29, %v1078_v50 }
  0xad   : > { %v1335_v6 = vadd.f32 %v1303_v5, %v1238_v53  ;;  %v1175_v37 = vld [vmem:[#allocation2 + $0x181] sm:$0xff]  ;;  %v948_v32 = vadd.f32 %v916_v7, %v851_v24  ;;  %v1176_v55 = vld [vmem:[#allocation2 + $0x189] sm:$0xff]  ;;  %493 = vst.msk [vmem:[#allocation2 + $0x198] sm:$0xff] %vm440_vm1, %v437_v2  ;;  %v1112_v9 = vmul.f32 %v3086_v29, %v1079_v62  ;;  %v439_v3 = vunpack.c.l.bf16 %v385_v42 }
  0xae   : > { %v1336_v45 = vadd.f32 %v1304_v38, %v1239_v11  ;;  %v949_v43 = vadd.f32 %v917_v15, %v852_v28  ;;  %v1208_v0 = vmul.f32 %v3095_v33, %v1175_v37  ;;  %v1209_v52 = vmul.f32 %v3095_v33, %v1176_v55  ;;  %494 = vst.msk [vmem:[#allocation2 + $0x1a0] sm:$0xff] %vm440_vm1, %v438_v31  ;;  %v1272_v46 = vld [vmem:[#allocation2 + $0x182] sm:$0xff] }
  0xaf   : > { %v1045_v41 = vadd.f32 %v1013_v47, %v948_v32  ;;  %v561_v20 = vmul.f32 %v3831_v30, %v3060_v16  ;;  %v562_v54 = vmul.f32 %v1077_v51, %v3060_v16  ;;  %v626_v57 = vmul.f32 %v1173_v8, %v3062_v17  ;;  %495 = vst.msk [vmem:[#allocation2 + $0x1a8] sm:$0x3] %vm443_vm2, %v439_v3  ;;  %v1273_v30 = vld [vmem:[#allocation2 + $0x18a] sm:$0xff] }
  0xb0   : > { %v1354_v36 = vpack.c.bf16 %v1336_v45, %v1335_v6  ;;  %v1046_v13 = vadd.f32 %v1014_v26, %v949_v43  ;;  %v627_v61 = vmul.f32 %v1174_v4, %v3062_v17  ;;  %v723_v35 = vmul.f32 %v3847_v44, %v3064_v18 }
  0xb1   : > { %v1143_v40 = vadd.f32 %v1111_v1, %v1045_v41  ;;  %v724_v60 = vmul.f32 %v1271_v25, %v3064_v18  ;;  %v658_v34 = vadd.f32 %v626_v57, %v561_v20  ;;  %v821_v16 = vmul.f32 %v1078_v50, %v3068_v21 }
  0xb2   : > { %2757 = vmatmul.msk.bf16.gmra.mxu3 %vm440_vm1, %v1354_v36  ;;  %v1144_v5 = vadd.f32 %v1112_v9, %v1046_v13  ;;  %v659_v63 = vadd.f32 %v627_v61, %v562_v54  ;;  %v822_v51 = vmul.f32 %v1079_v62, %v3068_v21  ;;  %v1305_v8 = vmul.f32 %v3716_v39, %v1272_v46 }
  0xb3   : > { %v1240_v17 = vadd.f32 %v1208_v0, %v1143_v40  ;;  %v755_v4 = vadd.f32 %v723_v35, %v658_v34  ;;  %v1306_v58 = vmul.f32 %v3716_v39, %v1273_v30  ;;  %v918_v44 = vmul.f32 %v1175_v37, %v3070_v22 }
  0xb4   : > { %v756_v59 = vadd.f32 %v724_v60, %v659_v63  ;;  %v1241_v49 = vadd.f32 %v1209_v52, %v1144_v5  ;;  %v919_v18 = vmul.f32 %v1176_v55, %v3070_v22  ;;  %v1015_v27 = vmul.f32 %v1272_v46, %v3072_v23  ;;  %v3912_v22 = vld [vmem:[%s5041_s4] ss:$0 sm:$0xff]  ;;  %v1080_v56 = vld [vmem:[#allocation2 + $0x198] sm:$0xff] }
  0xb5   : > { %v853_v25 = vadd.f32 %v821_v16, %v755_v4  ;;  %v1337_v21 = vadd.f32 %v1305_v8, %v1240_v17  ;;  %v1016_v10 = vmul.f32 %v1273_v30, %v3072_v23  ;;  %v1081_v15 = vld [vmem:[#allocation2 + $0x1a0] sm:$0xff]  ;;  %v2936_v24 = vmov 0.0  }
  0xb6   : > { %v854_v14 = vadd.f32 %v822_v51, %v756_v59  ;;  %v1338_v38 = vadd.f32 %v1306_v58, %v1241_v49  ;;  %1620 = vst.msk [vmem:[#allocation3 + $0xa8] sm:$0x1] %vm1613_vm3, %v2936_v24  ;;  %v1113_v23 = vmul.f32 %v3086_v29, %v1080_v56  ;;  %v1114_v47 = vmul.f32 %v3086_v29, %v1081_v15  ;;  %v1177_v26 = vld [vmem:[#allocation2 + $0x199] sm:$0xff]  ;;  %v1178_v62 = vld [vmem:[#allocation2 + $0x1a1] sm:$0xff] }
  0xb7   : > { %v950_v7 = vadd.f32 %v918_v44, %v853_v25  ;;  %1621 = vst.msk [vmem:[#allocation3 + $0xc0] sm:$0x1] %vm1613_vm3, %v2936_v24  ;;  %v1210_v29 = vmul.f32 %v3095_v33, %v1177_v26  ;;  %v1211_v37 = vmul.f32 %v3095_v33, %v1178_v62  ;;  %v1274_v32 = vld [vmem:[#allocation2 + $0x19a] sm:$0xff]  ;;  %v1275_v55 = vld [vmem:[#allocation2 + $0x1a2] sm:$0xff] }
  0xb8   : > { %v1419_v19 = vpop.f32.mrf.mxu0  ;;  %v951_v53 = vadd.f32 %v919_v18, %v854_v14  ;;  %v1355_v50 = vpack.c.bf16 %v1338_v38, %v1337_v21  ;;  %1622 = vst.msk [vmem:[#allocation3 + $0xd8] sm:$0x1] %vm1613_vm3, %v2936_v24  ;;  %v1307_v43 = vmul.f32 %v3716_v39, %v1274_v32  ;;  %v1308_v52 = vmul.f32 %v3716_v39, %v1275_v55  ;;  %v1678_v32 = vld [vmem:[%s5042_s5] sm:$0xff] }
  0xb9   : > { %v1503_v12 = vmul.f32 %v3904_v48, %v1419_v19  ;;  %v1047_v6 = vadd.f32 %v1015_v27, %v950_v7  ;;  %1636 = vst.msk [vmem:[#allocation3 + $0xb9] sm:$0x1] %vm1613_vm3, %v2936_v24 }
  0xba   : > { %v1048_v28 = vadd.f32 %v1016_v10, %v951_v53  ;;  %1637 = vst.msk [vmem:[#allocation3 + $0xd1] sm:$0x1] %vm1613_vm3, %v2936_v24 }
  0xbb   : > { %v1539_v11 = vadd.f32 %v3912_v22, %v1503_v12  ;;  %v1145_v31 = vadd.f32 %v1113_v23, %v1047_v6  ;;  %1638 = vst.msk [vmem:[#allocation3 + $0xe9] sm:$0x1] %vm1613_vm3, %v2936_v24 }
  0xbc   : > { %v1146_v45 = vadd.f32 %v1114_v47, %v1048_v28  ;;  %1604 = vst.msk [vmem:[#allocation3] sm:$0xff] %vm1603_vm4, %v2936_v24 }
  0xbd   : > { %v1571_v2 = vmax.f32 %v1539_v11, 0.0  ;;  %1605 = vst.msk [vmem:[#allocation3 + $0x8] sm:$0xff] %vm1603_vm4, %v2936_v24  ;;  %v1242_v9 = vadd.f32 %v1210_v29, %v1145_v31 }
  0xbe   : > { %1609 = vst.msk [vmem:[#allocation3 + $0x198] sm:$0xff] %vm1603_vm4, %v2936_v24  ;;  %v1243_v0 = vadd.f32 %v1211_v37, %v1146_v45 }
  0xbf   : > { %1646 = vst.msk [vmem:[#allocation3 + $0x19] sm:$0xff] %vm1603_vm4, %v1571_v2  ;;  %v1339_v13 = vadd.f32 %v1307_v43, %v1242_v9  ;;  %v4044_v43 = vperm.slane %v1678_v32, 0  ;;  %v4046_v9 = vperm.slane %v1678_v32, 1 }
  0xc0   : > { %v1421_v42 = vpop.f32.mrf.mxu0  ;;  %1610 = vst.msk [vmem:[#allocation3 + $0x1a0] sm:$0xff] %vm1603_vm4, %v2936_v24  ;;  %v1340_v54 = vadd.f32 %v1308_v52, %v1243_v0 }
  0xc1   : > { %v1504_v1 = vmul.f32 %v3904_v48, %v1421_v42  ;;  %1614 = vst.msk [vmem:[#allocation3 + $0x18] sm:$0x1] %vm1613_vm3, %v2936_v24 }
  0xc2   : > { %2758 = vmatmul.msk.bf16.gmra.mxu3 %vm440_vm1, %v1355_v50  ;;  %1615 = vst.msk [vmem:[#allocation3 + $0x30] sm:$0x1] %vm1613_vm3, %v2936_v24  ;;  %v1356_v46 = vpack.c.bf16 %v1340_v54, %v1339_v13 }
  0xc3   : > { %v1540_v33 = vadd.f32 %v3912_v22, %v1504_v1  ;;  %1616 = vst.msk [vmem:[#allocation3 + $0x48] sm:$0x1] %vm1613_vm3, %v2936_v24 }
  0xc4   : > { %1617 = vst.msk [vmem:[#allocation3 + $0x60] sm:$0x1] %vm1613_vm3, %v2936_v24 }
  0xc5   : > { %v1572_v36 = vmax.f32 %v1540_v33, 0.0  ;;  %1618 = vst.msk [vmem:[#allocation3 + $0x78] sm:$0x1] %vm1613_vm3, %v2936_v24 }
  0xc6   : > { %1619 = vst.msk [vmem:[#allocation3 + $0x90] sm:$0x1] %vm1613_vm3, %v2936_v24  ;;  %v4042_v55 = vld [vmem:[#allocation3 + $0x19] sm:$0xff] }
  0xc7   : > { %v1454_v41 = vpop.f32.mrf.mxu3  ;;  %1647 = vst.msk [vmem:[#allocation3 + $0x21] sm:$0xff] %vm1603_vm4, %v1572_v36  ;;  %v1780_v13 = vmul.f32 %v4046_v9, %v4042_v55 }
  0xc8   : > { %v1517_v3 = vmul.f32 %v3904_v48, %v1454_v41  ;;  %v1424_v20 = vpop.f32.mrf.mxu0  ;;  %1623 = vst.msk [vmem:[#allocation3 + $0xf0] sm:$0x1] %vm1613_vm3, %v2936_v24  ;;  %v4051_v41 = vld [vmem:[#allocation3 + $0x18] sm:$0xff] }
  0xc9   : > { %v1505_v39 = vmul.f32 %v3904_v48, %v1424_v20  ;;  %1624 = vst.msk [vmem:[#allocation3 + $0x108] sm:$0x1] %vm1613_vm3, %v2936_v24  ;;  %v1715_v20 = vmul.f32 %v4044_v43, %v4051_v41 }
  0xca   : > { %v1553_v57 = vadd.f32 %v3912_v22, %v1517_v3  ;;  %1625 = vst.msk [vmem:[#allocation3 + $0x120] sm:$0x1] %vm1613_vm3, %v2936_v24 }
  0xcb   : > { %v1541_v61 = vadd.f32 %v3912_v22, %v1505_v39  ;;  %1626 = vst.msk [vmem:[#allocation3 + $0x138] sm:$0x1] %vm1613_vm3, %v2936_v24 }
  0xcc   : > { %v1585_v40 = vmax.f32 %v1553_v57, 0.0  ;;  %1627 = vst.msk [vmem:[#allocation3 + $0x150] sm:$0x1] %vm1613_vm3, %v2936_v24 }
  0xcd   : > { %v1573_v35 = vmax.f32 %v1541_v61, 0.0  ;;  %1628 = vst.msk [vmem:[#allocation3 + $0x168] sm:$0x1] %vm1613_vm3, %v2936_v24 }
  0xce   : > { %1660 = vst.msk [vmem:[#allocation3 + $0xc1] sm:$0xff] %vm1603_vm4, %v1585_v40  ;;  %v4048_v0 = vld [vmem:[#allocation3 + $0x21] sm:$0xff] }
  0xcf   : > { %v1456_v60 = vpop.f32.mrf.mxu3  ;;  %1648 = vst.msk [vmem:[#allocation3 + $0x31] sm:$0xff] %vm1603_vm4, %v1573_v35  ;;  %v4053_v3 = vld [vmem:[#allocation3 + $0x20] sm:$0xff]  ;;  %v1781_v57 = vmul.f32 %v4046_v9, %v4048_v0 }
  0xd0   : > { %v1518_v5 = vmul.f32 %v3904_v48, %v1456_v60  ;;  %v1426_v30 = vpop.f32.mrf.mxu0  ;;  %1629 = vst.msk [vmem:[#allocation3 + $0x180] sm:$0x1] %vm1613_vm3, %v2936_v24  ;;  %v1716_v39 = vmul.f32 %v4044_v43, %v4053_v3  ;;  %v4065_v61 = vld [vmem:[#allocation3 + $0x1a] sm:$0xff] }
  0xd1   : > { %v1506_v34 = vmul.f32 %v3904_v48, %v1426_v30  ;;  %1630 = vst.msk [vmem:[#allocation3 + $0x29] sm:$0x1] %vm1613_vm3, %v2936_v24  ;;  %v1812_v30 = vadd.f32 %v1780_v13, %v1715_v20 }
  0xd2   : > { %2759 = vmatmul.msk.bf16.gmra.mxu3 %vm440_vm1, %v1356_v46  ;;  %v1554_v63 = vadd.f32 %v3912_v22, %v1518_v5  ;;  %1631 = vst.msk [vmem:[#allocation3 + $0x41] sm:$0x1] %vm1613_vm3, %v2936_v24  ;;  %v4067_v46 = vperm.slane %v1678_v32, 2 }
  0xd3   : > { %v1542_v16 = vadd.f32 %v3912_v22, %v1506_v34  ;;  %1632 = vst.msk [vmem:[#allocation3 + $0x59] sm:$0x1] %vm1613_vm3, %v2936_v24 }
  0xd4   : > { %v1586_v51 = vmax.f32 %v1554_v63, 0.0  ;;  %1633 = vst.msk [vmem:[#allocation3 + $0x71] sm:$0x1] %vm1613_vm3, %v2936_v24  ;;  %v1877_v34 = vmul.f32 %v4067_v46, %v4065_v61  ;;  %v1680_v63 = vld [vmem:[#allocation3] sm:$0xff] }
  0xd5   : > { %v1574_v17 = vmax.f32 %v1542_v16, 0.0  ;;  %1634 = vst.msk [vmem:[#allocation3 + $0x89] sm:$0x1] %vm1613_vm3, %v2936_v24  ;;  %v1745_v16 = vld [vmem:[#allocation3 + $0x1] sm:$0xff] }
  0xd6   : > { %1661 = vst.msk [vmem:[#allocation3 + $0xc9] sm:$0xff] %vm1603_vm4, %v1586_v51 }
  0xd7   : > { %v1459_v8 = vpop.f32.mrf.mxu3  ;;  %1649 = vst.msk [vmem:[#allocation3 + $0x39] sm:$0xff] %vm1603_vm4, %v1574_v17  ;;  %v4076_v17 = vld [vmem:[#allocation3 + $0x30] sm:$0xff] }
  0xd8   : > { %v1519_v4 = vmul.f32 %v3904_v48, %v1459_v8  ;;  %1635 = vst.msk [vmem:[#allocation3 + $0xa1] sm:$0x1] %vm1613_vm3, %v2936_v24  ;;  %v4069_v35 = vld [vmem:[#allocation3 + $0x22] sm:$0xff]  ;;  %v1813_v8 = vadd.f32 %v1781_v57, %v1716_v39 }
  0xd9   : > { %1639 = vst.msk [vmem:[#allocation3 + $0x101] sm:$0x1] %vm1613_vm3, %v2936_v24 }
  0xda   : > { %v1555_v59 = vadd.f32 %v3912_v22, %v1519_v4  ;;  %1640 = vst.msk [vmem:[#allocation3 + $0x119] sm:$0x1] %vm1613_vm3, %v2936_v24  ;;  %v1878_v4 = vmul.f32 %v4067_v46, %v4069_v35 }
  0xdb   : > { %v1429_v49 = vpop.f32.mrf.mxu0  ;;  %1641 = vst.msk [vmem:[#allocation3 + $0x131] sm:$0x1] %vm1613_vm3, %v2936_v24 }
  0xdc   : > { %v1507_v58 = vmul.f32 %v3904_v48, %v1429_v49  ;;  %v1587_v44 = vmax.f32 %v1555_v59, 0.0  ;;  %1642 = vst.msk [vmem:[#allocation3 + $0x149] sm:$0x1] %vm1613_vm3, %v2936_v24  ;;  %v4080_v49 = vperm.slane %v1678_v32, 3 }
  0xdd   : > { %1643 = vst.msk [vmem:[#allocation3 + $0x161] sm:$0x1] %vm1613_vm3, %v2936_v24 }
  0xde   : > { %v1543_v18 = vadd.f32 %v3912_v22, %v1507_v58  ;;  %1662 = vst.msk [vmem:[#allocation3 + $0xd9] sm:$0xff] %vm1603_vm4, %v1587_v44  ;;  %v4082_v58 = vld [vmem:[#allocation3 + $0x38] sm:$0xff] }
  0xdf   : > { %v1461_v25 = vpop.f32.mrf.mxu3  ;;  %1644 = vst.msk [vmem:[#allocation3 + $0x179] sm:$0x1] %vm1613_vm3, %v2936_v24  ;;  %v4130_v57 = vld [vmem:[#allocation3 + $0x32] sm:$0xff] }
  0xe0   : > { %v1575_v14 = vmax.f32 %v1543_v18, 0.0  ;;  %v1520_v21 = vmul.f32 %v3904_v48, %v1461_v25  ;;  %1645 = vst.msk [vmem:[#allocation3 + $0x191] sm:$0x1] %vm1613_vm3, %v2936_v24  ;;  %v1681_v25 = vld [vmem:[#allocation3 + $0x8] sm:$0xff] }
  0xe1   : > { %1607 = vst.msk [vmem:[#allocation3 + $0x10] sm:$0x3] %vm1606_vm5, %v2936_v24 }
  0xe2   : > { %1650 = vst.msk [vmem:[#allocation3 + $0x49] sm:$0xff] %vm1603_vm4, %v1575_v14  ;;  %v1556_v19 = vadd.f32 %v3912_v22, %v1520_v21  ;;  %v1713_v14 = vmul.f32 %v4044_v43, %v1680_v63  ;;  %v1778_v21 = vmul.f32 %v4046_v9, %v1745_v16  ;;  %v1972_v63 = vmul.f32 %v4080_v49, %v4051_v41 }
  0xe3   : > { %v1431_v27 = vpop.f32.mrf.mxu0  ;;  %1611 = vst.msk [vmem:[#allocation3 + $0x1a8] sm:$0x3] %vm1606_vm5, %v2936_v24 }
  0xe4   : > { %v1508_v10 = vmul.f32 %v3904_v48, %v1431_v27  ;;  %v1588_v38 = vmax.f32 %v1556_v19, 0.0  ;;  %5108 = vst [vmem:[#allocation7_spill] sm:$0xff] %v4044_v43  ;;  %v4087_v19 = vperm.slane %v1678_v32, 4  ;;  %v1909_v27 = vadd.f32 %v1877_v34, %v1812_v30 }
  0xe5   : > { %5109 = vst [vmem:[#allocation8_spill] sm:$0xff] %v4046_v9 }
  0xe6   : > { %v1544_v12 = vadd.f32 %v3912_v22, %v1508_v10  ;;  %1663 = vst.msk [vmem:[#allocation3 + $0xe1] sm:$0xff] %vm1603_vm4, %v1588_v38  ;;  %v1974_v10 = vmul.f32 %v4080_v49, %v4076_v17 }
  0xe7   : > { %5110 = vst [vmem:[#allocation9_spill] sm:$0xff] %v4067_v46 }
  0xe8   : > { %v1576_v7 = vmax.f32 %v1544_v12, 0.0  ;;  %v1746_v38 = vld [vmem:[#allocation3 + $0x9] sm:$0xff] }
  0xe9   : > { %v1464_v53 = vpop.f32.mrf.mxu3  ;;  %v1842_v12 = vld [vmem:[#allocation3 + $0x2] sm:$0xff] }
  0xea   : > { %1651 = vst.msk [vmem:[#allocation3 + $0x51] sm:$0xff] %vm1603_vm4, %v1576_v7  ;;  %v1521_v56 = vmul.f32 %v3904_v48, %v1464_v53  ;;  %v1953_v53 = vld [vmem:[#allocation3 + $0xc0] sm:$0xff] }
  0xec   : > { %v1557_v15 = vadd.f32 %v3912_v22, %v1521_v56  ;;  %v4093_v56 = vperm.slane %v1678_v32, 6 }
  0xee   : > { %v1434_v11 = vpop.f32.mrf.mxu0  ;;  %v1589_v23 = vmax.f32 %v1557_v15, 0.0  ;;  %5111 = vst [vmem:[#allocation10_spill] sm:$0xff] %v4093_v56  ;;  %v4095_v15 = vld [vmem:[#allocation3 + $0x31] sm:$0xff] }
  0xef   : > { %v1509_v47 = vmul.f32 %v3904_v48, %v1434_v11  ;;  %v1910_v11 = vadd.f32 %v1878_v4, %v1813_v8  ;;  %v1782_v39 = vmul.f32 %v4046_v9, %v4095_v15  ;;  %v4140_v8 = vld [vmem:[#allocation3 + $0xc9] sm:$0xff]  ;;  %v1718_v4 = vmul.f32 %v4044_v43, %v4082_v58 }
  0xf0   : > { %1664 = vst.msk [vmem:[#allocation3 + $0xf1] sm:$0xff] %vm1603_vm4, %v1589_v23  ;;  %v1975_v23 = vmul.f32 %v4080_v49, %v4082_v58 }
  0xf1   : > { %v1545_v50 = vadd.f32 %v3912_v22, %v1509_v47  ;;  %v1466_v2 = vpop.f32.mrf.mxu3  ;;  %v2050_v47 = vld [vmem:[#allocation3 + $0xc1] sm:$0xff] }
  0xf2   : > { %v1522_v6 = vmul.f32 %v3904_v48, %v1466_v2  ;;  %v4101_v2 = vld [vmem:[#allocation3 + $0x39] sm:$0xff] }
  0xf3   : > { %v1577_v28 = vmax.f32 %v1545_v50, 0.0  ;;  %v4099_v50 = vperm.slane %v1678_v32, 7  ;;  %v2072_v20 = vmul.f32 %v4087_v19, %v4101_v2 }
  0xf4   : > { %v1558_v26 = vadd.f32 %v3912_v22, %v1522_v6  ;;  %v1714_v6 = vmul.f32 %v4044_v43, %v1681_v25 }
  0xf5   : > { %1652 = vst.msk [vmem:[#allocation3 + $0x61] sm:$0xff] %vm1603_vm4, %v1577_v28  ;;  %v4124_v13 = vmul.f32 %v4099_v50, %v2050_v47 }
  0xf6   : > { %v1436_v62 = vpop.f32.mrf.mxu0  ;;  %v1590_v24 = vmax.f32 %v1558_v26, 0.0  ;;  %5112 = vst [vmem:[#allocation11_spill] sm:$0xff] %v4099_v50  ;;  %v1779_v26 = vmul.f32 %v4046_v9, %v1746_v38 }
  0xf7   : > { %v1510_v29 = vmul.f32 %v3904_v48, %v1436_v62  ;;  %v1810_v62 = vadd.f32 %v1778_v21, %v1713_v14  ;;  %5114 = vst [vmem:[#allocation13_spill] sm:$0xff] %v4124_v13 }
  0xf8   : > { %1665 = vst.msk [vmem:[#allocation3 + $0xf9] sm:$0xff] %vm1603_vm4, %v1590_v24  ;;  %v1875_v24 = vmul.f32 %v4067_v46, %v1842_v12  ;;  %v1879_v12 = vmul.f32 %v4067_v46, %v4130_v57 }
  0xf9   : > { %v1546_v37 = vadd.f32 %v3912_v22, %v1510_v29  ;;  %v4107_v29 = vmul.f32 %v4080_v49, %v1953_v53 }
  0xfa   : > { %v1907_v34 = vadd.f32 %v1875_v24, %v1810_v62  ;;  %v2069_v24 = vmul.f32 %v4087_v19, %v4042_v55 }
  0xfb   : > { %v1578_v42 = vmax.f32 %v1546_v37, 0.0  ;;  %v4109_v37 = vperm.slane %v1678_v32, 5 }
  0xfc   : > { %v1469_v31 = vpop.f32.mrf.mxu3  ;;  %v2004_v62 = vadd.f32 %v1972_v63, %v1907_v34  ;;  %v2070_v34 = vmul.f32 %v4087_v19, %v4048_v0 }
  0xfd   : > { %1653 = vst.msk [vmem:[#allocation3 + $0x69] sm:$0xff] %vm1603_vm4, %v1578_v42  ;;  %v1523_v45 = vmul.f32 %v3904_v48, %v1469_v31  ;;  %v2006_v42 = vadd.f32 %v1974_v10, %v1909_v27  ;;  %v2071_v31 = vmul.f32 %v4087_v19, %v4095_v15  ;;  %v2168_v14 = vmul.f32 %v4109_v37, %v4130_v57  ;;  %v4155_v10 = vld [vmem:[#allocation3 + $0x48] sm:$0xff] }
  0xfe   : > { %v2166_v63 = vmul.f32 %v4109_v37, %v4065_v61 }
  0xff   : > { %v1559_v1 = vadd.f32 %v3912_v22, %v1523_v45  ;;  %v1843_v45 = vld [vmem:[#allocation3 + $0xa] sm:$0xff] }
 0x100   : > { %v1876_v30 = vmul.f32 %v4067_v46, %v1843_v45 }
 0x101   : > { %v1439_v33 = vpop.f32.mrf.mxu0  ;;  %v1591_v52 = vmax.f32 %v1559_v1, 0.0 }
 0x102   : > { %v1511_v36 = vmul.f32 %v3904_v48, %v1439_v33  ;;  %v4115_v33 = vmul.f32 %v4087_v19, %v2050_v47  ;;  %v1973_v47 = vmul.f32 %v4080_v49, %v4053_v3 }
 0x103   : > { %1666 = vst.msk [vmem:[#allocation3 + $0x109] sm:$0xff] %vm1603_vm4, %v1591_v52  ;;  %v4118_v52 = vmul.f32 %v4093_v56, %v1953_v53  ;;  %v4162_v53 = vmul.f32 %v4087_v19, %v4140_v8 }
 0x104   : > { %v1547_v54 = vadd.f32 %v3912_v22, %v1511_v36  ;;  %v1471_v40 = vpop.f32.mrf.mxu3  ;;  %v2007_v36 = vadd.f32 %v1975_v23, %v1910_v11  ;;  %v4164_v11 = vld [vmem:[#allocation3 + $0x50] sm:$0xff] }
 0x105   : > { %v1524_v60 = vmul.f32 %v3904_v48, %v1471_v40  ;;  %5113 = vst [vmem:[#allocation12_spill] sm:$0xff] %v4118_v52  ;;  %v4132_v40 = vld [vmem:[#allocation3 + $0x3a] sm:$0xff] }
 0x106   : > { %v1579_v5 = vmax.f32 %v1547_v54, 0.0  ;;  %v1717_v54 = vmul.f32 %v4044_v43, %v4076_v17  ;;  %v2104_v25 = vadd.f32 %v2072_v20, %v2007_v36  ;;  %v2169_v41 = vmul.f32 %v4109_v37, %v4132_v40  ;;  %v1751_v20 = vld [vmem:[#allocation3 + $0x49] sm:$0xff] }
 0x107   : > { %v1560_v51 = vadd.f32 %v3912_v22, %v1524_v60  ;;  %v4134_v60 = vld [vmem:[#allocation3 + $0xc8] sm:$0xff]  ;;  %v2266_v36 = vmul.f32 %v4093_v56, %v4155_v10 }
 0x108   : > { %1654 = vst.msk [vmem:[#allocation3 + $0x79] sm:$0xff] %vm1603_vm4, %v1579_v5  ;;  %v1811_v5 = vadd.f32 %v1779_v26, %v1714_v6  ;;  %v4153_v27 = vmul.f32 %v4080_v49, %v4134_v60  ;;  %v1814_v38 = vadd.f32 %v1782_v39, %v1717_v54  ;;  %v2147_v6 = vld [vmem:[#allocation3 + $0xc2] sm:$0xff]  ;;  %v1880_v26 = vmul.f32 %v4067_v46, %v4132_v40 }
 0x109   : > { %v1441_v59 = vpop.f32.mrf.mxu0  ;;  %v1592_v44 = vmax.f32 %v1560_v51, 0.0  ;;  %v1976_v39 = vmul.f32 %v4080_v49, %v4155_v10  ;;  %v4184_v55 = vmul.f32 %v4109_v37, %v2147_v6 }
 0x10a   : > { %v1512_v18 = vmul.f32 %v3904_v48, %v1441_v59  ;;  %v1783_v59 = vmul.f32 %v4046_v9, %v4101_v2  ;;  %v1908_v23 = vadd.f32 %v1876_v30, %v1811_v5  ;;  %v1911_v54 = vadd.f32 %v1879_v12, %v1814_v38  ;;  %v1848_v38 = vld [vmem:[#allocation3 + $0x4a] sm:$0xff] }
 0x10b   : > { %1667 = vst.msk [vmem:[#allocation3 + $0x111] sm:$0xff] %vm1603_vm4, %v1592_v44  ;;  %v2103_v44 = vadd.f32 %v2071_v31, %v2006_v42  ;;  %v2267_v5 = vmul.f32 %v4093_v56, %v4164_v11  ;;  %v2073_v12 = vmul.f32 %v4087_v19, %v1751_v20 }
 0x10c   : > { %v1548_v7 = vadd.f32 %v3912_v22, %v1512_v18  ;;  %v2005_v30 = vadd.f32 %v1973_v47, %v1908_v23  ;;  %v2008_v61 = vadd.f32 %v1976_v39, %v1911_v54  ;;  %v4202_v47 = vld [vmem:[%s5042_s5 + $0x8] ss:$0 sm:$0xff] }
 0x10d   : > { %v2200_v45 = vadd.f32 %v2168_v14, %v2103_v44  ;;  %v2101_v44 = vadd.f32 %v2069_v24, %v2004_v62  ;;  %v2363_v14 = vmul.f32 %v4099_v50, %v1751_v20  ;;  %5115 = vst [vmem:[#allocation14_spill] sm:$0xff] %v4202_v47  ;;  %v2167_v24 = vmul.f32 %v4109_v37, %v4069_v35 }
 0x10e   : > { %v1580_v28 = vmax.f32 %v1548_v7, 0.0  ;;  %v2102_v62 = vadd.f32 %v2070_v34, %v2005_v30  ;;  %v2460_v54 = vmul.f32 %v4202_v47, %v1848_v38  ;;  %v2105_v39 = vadd.f32 %v2073_v12, %v2008_v61 }
 0x10f   : > { %v1474_v1 = vpop.f32.mrf.mxu3  ;;  %v2170_v35 = vmul.f32 %v4109_v37, %v1848_v38  ;;  %v4227_v34 = vmul.f32 %v4099_v50, %v4140_v8 }
 0x110   : > { %1655 = vst.msk [vmem:[#allocation3 + $0x81] sm:$0xff] %vm1603_vm4, %v1580_v28  ;;  %v1525_v32 = vmul.f32 %v3904_v48, %v1474_v1  ;;  %v1815_v28 = vadd.f32 %v1783_v59, %v1718_v4  ;;  %v2201_v1 = vadd.f32 %v2169_v41, %v2104_v25  ;;  %v1977_v59 = vmul.f32 %v4080_v49, %v4164_v11 }
 0x111   : > { %v2298_v25 = vadd.f32 %v2266_v36, %v2200_v45  ;;  %v2198_v45 = vadd.f32 %v2166_v63, %v2101_v44  ;;  %5116 = vst [vmem:[#allocation15_spill] sm:$0xff] %v4227_v34  ;;  %v4232_v63 = vld [vmem:[#allocation3 + $0x60] sm:$0xff]  ;;  %v2202_v61 = vadd.f32 %v2170_v35, %v2105_v39  ;;  %v1881_v35 = vmul.f32 %v4067_v46, %v1848_v38 }
 0x112   : > { %v1561_v16 = vadd.f32 %v3912_v22, %v1525_v32  ;;  %v1444_v51 = vpop.f32.mrf.mxu0  ;;  %v4176_v32 = vld [vmem:[#allocation3 + $0x51] sm:$0xff]  ;;  %v1912_v4 = vadd.f32 %v1880_v26, %v1815_v28  ;;  %v4206_v28 = vmul.f32 %v4093_v56, %v4134_v60  ;;  %v2459_v38 = vmul.f32 %v4202_v47, %v4132_v40 }
 0x113   : > { %v1513_v18 = vmul.f32 %v3904_v48, %v1444_v51  ;;  %v2364_v41 = vmul.f32 %v4099_v50, %v4176_v32  ;;  %v4208_v26 = vld [vmem:[#allocation3 + $0x52] sm:$0xff] }
 0x114   : > { %v1593_v21 = vmax.f32 %v1561_v16, 0.0  ;;  %v2461_v30 = vmul.f32 %v4202_v47, %v4208_v26 }
 0x115   : > { %v1549_v7 = vadd.f32 %v3912_v22, %v1513_v18 }
 0x116   : > { %1668 = vst.msk [vmem:[#allocation3 + $0x121] sm:$0xff] %vm1603_vm4, %v1593_v21  ;;  %v2148_v21 = vld [vmem:[#allocation3 + $0xca] sm:$0xff] }
 0x117   : > { %v1476_v42 = vpop.f32.mrf.mxu3  ;;  %v1581_v31 = vmax.f32 %v1549_v7, 0.0  ;;  %v2299_v7 = vadd.f32 %v2267_v5, %v2201_v1  ;;  %v2264_v1 = vmul.f32 %v4093_v56, %v4076_v17  ;;  %v4218_v60 = vmul.f32 %v4109_v37, %v2148_v21  ;;  %v4414_v52 = vld [vmem:[#allocation3 + $0x82] sm:$0xff] }
 0x118   : > { %v1526_v3 = vmul.f32 %v3904_v48, %v1476_v42  ;;  %v2009_v42 = vadd.f32 %v1977_v59, %v1912_v4  ;;  %v4230_v17 = vmul.f32 %v4202_v47, %v2147_v6  ;;  %v4237_v59 = vmul.f32 %v4202_v47, %v2148_v21  ;;  %5134 = vst [vmem:[#allocation33_spill] sm:$0xff] %v4414_v52 }
 0x119   : > { %1656 = vst.msk [vmem:[#allocation3 + $0x91] sm:$0xff] %vm1603_vm4, %v1581_v31  ;;  %v2074_v31 = vmul.f32 %v4087_v19, %v4176_v32  ;;  %v2396_v5 = vadd.f32 %v2364_v41, %v2299_v7  ;;  %v1719_v6 = vmul.f32 %v4044_v43, %v4155_v10  ;;  %v1784_v41 = vmul.f32 %v4046_v9, %v1751_v20 }
 0x11a   : > { %v1562_v16 = vadd.f32 %v3912_v22, %v1526_v3  ;;  %v1446_v51 = vpop.f32.mrf.mxu0  ;;  %v2395_v3 = vadd.f32 %v2363_v14, %v2298_v25  ;;  %5117 = vst [vmem:[#allocation16_spill] sm:$0xff] %v4230_v17  ;;  %v2296_v25 = vadd.f32 %v2264_v1, %v2198_v45  ;;  %v4242_v14 = vld [vmem:[#allocation3 + $0x68] sm:$0xff]  ;;  %v2268_v21 = vmul.f32 %v4093_v56, %v4232_v63 }
 0x11b   : > { %v1514_v18 = vmul.f32 %v3904_v48, %v1446_v51  ;;  %v2265_v51 = vmul.f32 %v4093_v56, %v4082_v58  ;;  %5118 = vst [vmem:[#allocation17_spill] sm:$0xff] %v4237_v59  ;;  %v2106_v44 = vadd.f32 %v2074_v31, %v2009_v42  ;;  %v4251_v12 = vadd.f32 %v2461_v30, %v2396_v5  ;;  %v2245_v42 = vld [vmem:[#allocation3 + $0xd8] sm:$0xff] }
 0x11c   : > { %v1594_v0 = vmax.f32 %v1562_v16, 0.0  ;;  %v2199_v16 = vadd.f32 %v2167_v24, %v2102_v62  ;;  %v2361_v7 = vmul.f32 %v4099_v50, %v4095_v15  ;;  %v4257_v24 = vld [vmem:[#allocation3 + $0x61] sm:$0xff]  ;;  %v2362_v20 = vmul.f32 %v4099_v50, %v4101_v2  ;;  %v2342_v2 = vld [vmem:[#allocation3 + $0xd9] sm:$0xff] }
 0x11d   : > { %v1550_v23 = vadd.f32 %v3912_v22, %v1514_v18  ;;  %v2171_v18 = vmul.f32 %v4109_v37, %v4208_v26  ;;  %v1720_v31 = vmul.f32 %v4044_v43, %v4164_v11  ;;  %v1785_v45 = vmul.f32 %v4046_v9, %v4176_v32 }
 0x11e   : > { %1669 = vst.msk [vmem:[#allocation3 + $0x129] sm:$0xff] %vm1603_vm4, %v1594_v0  ;;  %v4247_v0 = vadd.f32 %v2460_v54, %v2395_v3  ;;  %v2297_v10 = vadd.f32 %v2265_v51, %v2199_v16  ;;  %v2269_v15 = vmul.f32 %v4093_v56, %v4242_v14  ;;  %v4268_v54 = vld [vmem:[#allocation3 + $0x69] sm:$0xff]  ;;  %v1816_v39 = vadd.f32 %v1784_v41, %v1719_v6  ;;  %v2246_v51 = vld [vmem:[#allocation3 + $0xe0] sm:$0xff] }
 0x11f   : > { %v1582_v36 = vmax.f32 %v1550_v23, 0.0  ;;  %v2203_v1 = vadd.f32 %v2171_v18, %v2106_v44  ;;  %v2300_v5 = vadd.f32 %v2268_v21, %v2202_v61  ;;  %v2365_v11 = vmul.f32 %v4099_v50, %v4257_v24  ;;  %v4283_v6 = vld [vmem:[#allocation3 + $0x6a] sm:$0xff] }
 0x120   : > { %v2393_v30 = vadd.f32 %v2361_v7, %v2296_v25  ;;  %v2458_v32 = vmul.f32 %v4202_v47, %v4130_v57  ;;  %v2394_v44 = vadd.f32 %v2362_v20, %v2297_v10  ;;  %v1817_v25 = vadd.f32 %v1785_v45, %v1720_v31 }
 0x121   : > { %1657 = vst.msk [vmem:[#allocation3 + $0x99] sm:$0xff] %vm1603_vm4, %v1582_v36  ;;  %v1882_v57 = vmul.f32 %v4067_v46, %v4208_v26  ;;  %v2301_v41 = vadd.f32 %v2269_v15, %v2203_v1  ;;  %v4292_v21 = vmul.f32 %v4099_v50, %v2342_v2  ;;  %v1913_v40 = vadd.f32 %v1881_v35, %v1816_v39  ;;  %v2343_v26 = vld [vmem:[#allocation3 + $0xe1] sm:$0xff]  ;;  %v4305_v15 = vld [vmem:[#allocation3 + $0x90] sm:$0xff] }
 0x122   : > { %v1479_v4 = vpop.f32.mrf.mxu3  ;;  %v1978_v7 = vmul.f32 %v4080_v49, %v4232_v63  ;;  %v2397_v10 = vadd.f32 %v2365_v11, %v2300_v5  ;;  %v2529_v20 = vpack.c.bf16 %v4251_v12, %v4247_v0  ;;  %v2439_v1 = vld [vmem:[#allocation3 + $0xda] sm:$0xff]  ;;  %5120 = vst [vmem:[#allocation19_spill] sm:$0xff] %v4305_v15  ;;  %v2463_v39 = vmul.f32 %v4202_v47, %v4283_v6  ;;  %v2440_v35 = vld [vmem:[#allocation3 + $0xe2] sm:$0xff] }
 0x123   : > { %v1527_v8 = vmul.f32 %v3904_v48, %v1479_v4  ;;  %v4277_v4 = vmul.f32 %v4093_v56, %v2245_v42  ;;  %v4301_v42 = vadd.f32 %v2458_v32, %v2393_v30  ;;  %v1914_v2 = vadd.f32 %v1882_v57, %v1817_v25 }
 0x124   : > { %v1449_v58 = vpop.f32.mrf.mxu0  ;;  %v1979_v0 = vmul.f32 %v4080_v49, %v4242_v14  ;;  %v4315_v5 = vadd.f32 %v2459_v38, %v2394_v44  ;;  %v2010_v32 = vadd.f32 %v1978_v7, %v1913_v40  ;;  %v1725_v57 = vmul.f32 %v4044_v43, %v4305_v15 }
 0x125   : > { %v1563_v23 = vadd.f32 %v3912_v22, %v1527_v8  ;;  %v1515_v62 = vmul.f32 %v3904_v48, %v1449_v58  ;;  %v4281_v8 = vld [vmem:[#allocation3 + $0x62] sm:$0xff]  ;;  %v2366_v58 = vmul.f32 %v4099_v50, %v4268_v54  ;;  %5119 = vst [vmem:[#allocation18_spill] sm:$0xff] %v4301_v42  ;;  %v4406_v13 = vmul.f32 %v4109_v37, %v4283_v6 }
 0x126   : > { %5121 = vst [vmem:[#allocation20_spill] sm:$0xff] %v4315_v5 }
 0x127   : > { %v1595_v36 = vmax.f32 %v1563_v23, 0.0  ;;  %v1551_v3 = vadd.f32 %v3912_v22, %v1515_v62  ;;  %v4297_v62 = vmul.f32 %v4093_v56, %v2246_v51  ;;  %v2398_v12 = vadd.f32 %v2366_v58, %v2301_v41  ;;  %5132 = vst [vmem:[#allocation31_spill] sm:$0xff] %v4406_v13 }
 0x128   : > { %v4321_v51 = vmul.f32 %v4099_v50, %v2343_v26  ;;  %v4326_v25 = vld [vmem:[#allocation3 + $0x98] sm:$0xff]  ;;  %v4336_v58 = vmul.f32 %v4202_v47, %v2440_v35  ;;  %v4346_v26 = vadd.f32 %v1979_v0, %v1914_v2  ;;  %v4387_v0 = vld [vmem:[#allocation3 + $0x81] sm:$0xff]  ;;  %v4402_v50 = vmul.f32 %v4109_v37, %v4281_v8 }
 0x129   : > { %1670 = vst.msk [vmem:[#allocation3 + $0x139] sm:$0xff] %vm1603_vm4, %v1595_v36  ;;  %v1583_v16 = vmax.f32 %v1551_v3, 0.0  ;;  %v4307_v36 = vld [vmem:[#allocation3 + $0x91] sm:$0xff]  ;;  %v2462_v3 = vmul.f32 %v4202_v47, %v4281_v8  ;;  %v4330_v44 = vld [vmem:[#allocation3 + $0x99] sm:$0xff]  ;;  %v4364_v2 = vadd.f32 %v2463_v39, %v2398_v12  ;;  %v1789_v59 = vmul.f32 %v4046_v9, %v4387_v0 }
 0x12a   : > { %v1481_v18 = vpop.f32.mrf.mxu3  ;;  %5122 = vst [vmem:[#allocation21_spill] sm:$0xff] %v4321_v51  ;;  %v1790_v38 = vmul.f32 %v4046_v9, %v4307_v36  ;;  %v1791_v40 = vmul.f32 %v4046_v9, %v4330_v44  ;;  %v4342_v7 = vld [vmem:[#allocation3 + $0x92] sm:$0xff]  ;;  %v4358_v35 = vld [vmem:[#allocation3 + $0x9a] sm:$0xff]  ;;  %v1983_v42 = vmul.f32 %v4080_v49, %v4326_v25 }
 0x12b   : > { %v1528_v61 = vmul.f32 %v3904_v48, %v1481_v18  ;;  %1658 = vst.msk [vmem:[#allocation3 + $0xa9] sm:$0xff] %vm1603_vm4, %v1583_v16  ;;  %v2075_v16 = vmul.f32 %v4087_v19, %v4257_v24  ;;  %v4324_v18 = vmul.f32 %v4202_v47, %v2439_v1  ;;  %v4355_v1 = vsel %vm1603_vm4, %v2529_v20, 0 }
 0x12c   : > { %v1451_v23 = vpop.f32.mrf.mxu0  ;;  %5124 = vst [vmem:[#allocation23_spill] sm:$0xff] %v4336_v58  ;;  %v1887_v20 = vmul.f32 %v4067_v46, %v4342_v7  ;;  %v4410_v58 = vld [vmem:[#allocation3 + $0x7a] sm:$0xff] }
 0x12d   : > { %v1564_v31 = vadd.f32 %v3912_v22, %v1528_v61  ;;  %v1516_v45 = vmul.f32 %v3904_v48, %v1451_v23  ;;  %5123 = vst [vmem:[#allocation22_spill] sm:$0xff] %v4324_v18  ;;  %v1726_v61 = vmul.f32 %v4044_v43, %v4326_v25 }
 0x12e   : > { %5126 = vst [vmem:[#allocation25_spill] sm:$0xff] %v4355_v1  ;;  %v4374_v1 = vld [vmem:[#allocation3 + $0x78] sm:$0xff] }
 0x12f   : > { %v1596_v11 = vmax.f32 %v1564_v31, 0.0  ;;  %v1552_v30 = vadd.f32 %v3912_v22, %v1516_v45  ;;  %v4350_v31 = vmul.f32 %v4087_v19, %v4268_v54  ;;  %v4352_v45 = vadd.f32 %v2462_v3, %v2397_v10  ;;  %5128 = vst [vmem:[#allocation27_spill] sm:$0xff] %v4364_v2 }
 0x130   : > { %v1822_v3 = vadd.f32 %v1790_v38, %v1725_v57  ;;  %v4383_v57 = vld [vmem:[#allocation3 + $0x80] sm:$0xff]  ;;  %5130 = vst [vmem:[#allocation29_spill] sm:$0xff] %v4387_v0  ;;  %v1723_v17 = vmul.f32 %v4044_v43, %v4374_v1 }
 0x131   : > { %1671 = vst.msk [vmem:[#allocation3 + $0x141] sm:$0xff] %vm1603_vm4, %v1596_v11  ;;  %v1584_v41 = vmax.f32 %v1552_v30, 0.0  ;;  %v1721_v11 = vmul.f32 %v4044_v43, %v4232_v63  ;;  %v4362_v30 = vadd.f32 %v2075_v16, %v2010_v32  ;;  %v1786_v63 = vmul.f32 %v4046_v9, %v4257_v24  ;;  %v4385_v38 = vld [vmem:[#allocation3 + $0x79] sm:$0xff] }
 0x132   : > { %v4344_v23 = vld [vmem:[#allocation3 + $0xa9] sm:$0xff]  ;;  %v1823_v16 = vadd.f32 %v1791_v40, %v1726_v61  ;;  %v1724_v24 = vmul.f32 %v4044_v43, %v4383_v57  ;;  %v1722_v40 = vmul.f32 %v4044_v43, %v4242_v14  ;;  %5131 = vst [vmem:[#allocation30_spill] sm:$0xff] %v4402_v50  ;;  %v1885_v50 = vmul.f32 %v4067_v46, %v4410_v58 }
 0x133   : > { %5125 = vst [vmem:[#allocation24_spill] sm:$0xff] %v4344_v23  ;;  %v4368_v10 = vld [vmem:[#allocation3 + $0xa8] sm:$0xff]  ;;  %v1792_v32 = vmul.f32 %v4046_v9, %v4344_v23  ;;  %v1818_v18 = vadd.f32 %v1786_v63, %v1721_v11  ;;  %v1982_v11 = vmul.f32 %v4080_v49, %v4305_v15 }
 0x134   : > { %1659 = vst.msk [vmem:[#allocation3 + $0xb1] sm:$0xff] %vm1603_vm4, %v1584_v41  ;;  %v1888_v41 = vmul.f32 %v4067_v46, %v4358_v35  ;;  %v1727_v12 = vmul.f32 %v4044_v43, %v4368_v10  ;;  %v1984_v34 = vmul.f32 %v4080_v49, %v4368_v10 }
 0x135   : > { %5127 = vst [vmem:[#allocation26_spill] sm:$0xff] %v4362_v30  ;;  %v1484_v47 = vpop.f32.mrf.mxu3  ;;  %v1919_v30 = vadd.f32 %v1887_v20, %v1822_v3 }
 0x136   : > { %5129 = vst [vmem:[#allocation28_spill] sm:$0xff] %v4368_v10  ;;  %v1529_v39 = vmul.f32 %v3904_v48, %v1484_v47  ;;  %v1788_v47 = vmul.f32 %v4046_v9, %v4385_v38  ;;  %v1824_v14 = vadd.f32 %v1792_v32, %v1727_v12  ;;  %v1920_v0 = vadd.f32 %v1888_v41, %v1823_v16 }
 0x137   : > { %5133 = vst [vmem:[#allocation32_spill] sm:$0xff] %v4410_v58  ;;  %v1821_v10 = vadd.f32 %v1789_v59, %v1724_v24  ;;  %v2016_v24 = vadd.f32 %v1984_v34, %v1919_v30 }
 0x138   : > { %v1565_v61 = vadd.f32 %v3912_v22, %v1529_v39  ;;  %v1787_v39 = vmul.f32 %v4046_v9, %v4268_v54  ;;  %v1820_v13 = vadd.f32 %v1788_v47, %v1723_v17  ;;  %v1886_v54 = vmul.f32 %v4067_v46, %v4414_v52 }
 0x13a   : > { %v1597_v56 = vmax.f32 %v1565_v61, 0.0  ;;  %v1917_v58 = vadd.f32 %v1885_v50, %v1820_v13  ;;  %v1819_v2 = vadd.f32 %v1787_v39, %v1722_v40 }
 0x13b   : > { %v4418_v51 = vld [vmem:[#allocation3 + $0xb0] sm:$0xff] }
 0x13c   : > { %5135 = vst [vmem:[#allocation34_spill] sm:$0xff] %v4418_v51  ;;  %v4420_v3 = vld [vmem:[#allocation3 + $0xb1] sm:$0xff]  ;;  %v1728_v41 = vmul.f32 %v4044_v43, %v4418_v51  ;;  %v1985_v59 = vmul.f32 %v4080_v49, %v4418_v51  ;;  %v1918_v51 = vadd.f32 %v1886_v54, %v1821_v10 }
 0x13d   : > { %5136 = vst [vmem:[#allocation35_spill] sm:$0xff] %v4420_v3  ;;  %v4422_v20 = vld [vmem:[#allocation3 + $0xaa] sm:$0xff]  ;;  %v1793_v63 = vmul.f32 %v4046_v9, %v4420_v3  ;;  %v4433_v12 = vld [vmem:[#allocation3 + $0xb2] sm:$0xff]  ;;  %v1486_v32 = vpop.f32.mrf.mxu3  ;;  %v2082_v47 = vmul.f32 %v4087_v19, %v4420_v3 }
 0x13e   : > { %1672 = vst.msk [vmem:[#allocation3 + $0x151] sm:$0xff] %vm1603_vm4, %v1597_v56  ;;  %v1889_v17 = vmul.f32 %v4067_v46, %v4422_v20  ;;  %v1890_v16 = vmul.f32 %v4067_v46, %v4433_v12  ;;  %v2081_v56 = vmul.f32 %v4087_v19, %v4344_v23  ;;  %v1530_v61 = vmul.f32 %v3904_v48, %v1486_v32 }
 0x13f   : > { %v1825_v9 = vadd.f32 %v1793_v63, %v1728_v41  ;;  %v2017_v43 = vadd.f32 %v1985_v59, %v1920_v0  ;;  %v2179_v52 = vmul.f32 %v4109_v37, %v4433_v12  ;;  %v1884_v0 = vmul.f32 %v4067_v46, %v4283_v6  ;;  %v5139_v59 = vld [vmem:[#allocation18_spill] sm:$0xff] }
 0x140   : > { %v1921_v15 = vadd.f32 %v1889_v17, %v1824_v14  ;;  %v1566_v34 = vadd.f32 %v3912_v22, %v1530_v61  ;;  %v2113_v3 = vadd.f32 %v2081_v56, %v2016_v24  ;;  %v1883_v14 = vmul.f32 %v4067_v46, %v4281_v8  ;;  %v5138_v17 = vld [vmem:[#allocation20_spill] sm:$0xff]  ;;  %v5142_v24 = vld [vmem:[#allocation21_spill] sm:$0xff] }
 0x141   : > { %v1922_v30 = vadd.f32 %v1890_v16, %v1825_v9  ;;  %v2114_v5 = vadd.f32 %v2082_v47, %v2017_v43  ;;  %v2178_v10 = vmul.f32 %v4109_v37, %v4422_v20  ;;  %v2014_v9 = vadd.f32 %v1982_v11, %v1917_v58  ;;  %v5143_v56 = vld [vmem:[#allocation12_spill] sm:$0xff]  ;;  %v5144_v47 = vld [vmem:[#allocation29_spill] sm:$0xff] }
 0x142   : > { %v2018_v23 = vadd.f32 %v4107_v29, %v1921_v15  ;;  %v1598_v41 = vmax.f32 %v1566_v34, 0.0  ;;  %v2015_v54 = vadd.f32 %v1983_v42, %v1918_v51  ;;  %v2079_v43 = vmul.f32 %v4087_v19, %v4307_v36 }
 0x143   : > { %v2019_v50 = vadd.f32 %v4153_v27, %v1922_v30  ;;  %v2080_v29 = vmul.f32 %v4087_v19, %v4330_v44  ;;  %v2211_v27 = vadd.f32 %v2179_v52, %v2114_v5  ;;  %v1916_v58 = vadd.f32 %v1884_v0, %v1819_v2  ;;  %v5145_v30 = vld [vmem:[#allocation28_spill] sm:$0xff] }
 0x144   : > { %v2115_v13 = vadd.f32 %v4115_v33, %v2018_v23  ;;  %1673 = vst.msk [vmem:[#allocation3 + $0x159] sm:$0xff] %vm1603_vm4, %v1598_v41  ;;  %v2108_v33 = vadd.f32 %v4350_v31, %v4346_v26  ;;  %v1915_v23 = vadd.f32 %v1883_v14, %v1818_v18  ;;  %v1980_v42 = vmul.f32 %v4080_v49, %v4374_v1  ;;  %v5146_v14 = vld [vmem:[#allocation10_spill] sm:$0xff] }
 0x145   : > { %v2116_v8 = vadd.f32 %v4162_v53, %v2019_v50  ;;  %v1489_v15 = vpop.f32.mrf.mxu3  ;;  %v1981_v51 = vmul.f32 %v4080_v49, %v4383_v57  ;;  %v2111_v52 = vadd.f32 %v2079_v43, %v2014_v9  ;;  %v2112_v5 = vadd.f32 %v2080_v29, %v2015_v54  ;;  %v5147_v50 = vld [vmem:[#allocation22_spill] sm:$0xff]  ;;  %v5149_v54 = vld [vmem:[#allocation15_spill] sm:$0xff] }
 0x146   : > { %v2212_v6 = vadd.f32 %v4184_v55, %v2115_v13  ;;  %v1531_v40 = vmul.f32 %v3904_v48, %v1489_v15  ;;  %v2210_v55 = vadd.f32 %v2178_v10, %v2113_v3  ;;  %v2176_v26 = vmul.f32 %v4109_v37, %v4342_v7  ;;  %v5137_v3 = vld [vmem:[#allocation27_spill] sm:$0xff]  ;;  %v5150_v29 = vld [vmem:[#allocation34_spill] sm:$0xff]  ;;  %v5151_v15 = vld [vmem:[#allocation32_spill] sm:$0xff] }
 0x147   : > { %v2213_v39 = vadd.f32 %v4218_v60, %v2116_v8  ;;  %v2177_v18 = vmul.f32 %v4109_v37, %v4358_v35  ;;  %v2309_v48 = vadd.f32 %v4206_v28, %v2211_v27  ;;  %v2012_v60 = vadd.f32 %v1980_v42, %v1915_v23  ;;  %v5148_v10 = vld [vmem:[#allocation23_spill] sm:$0xff]  ;;  %v5152_v42 = vld [vmem:[#allocation26_spill] sm:$0xff] }
 0x148   : > { %v2310_v53 = vadd.f32 %v4277_v4, %v2212_v6  ;;  %v1567_v31 = vadd.f32 %v3912_v22, %v1531_v40  ;;  %v2077_v4 = vmul.f32 %v4087_v19, %v4385_v38  ;;  %v2530_v63 = vpack.c.bf16 %v5137_v3, %v4352_v45  ;;  %v5153_v40 = vld [vmem:[#allocation30_spill] sm:$0xff] }
 0x149   : > { %v2311_v2 = vadd.f32 %v4297_v62, %v2213_v39  ;;  %v5140_v32 = vpack.c.bf16 %v5138_v17, %v5139_v59  ;;  %v2078_v28 = vmul.f32 %v4087_v19, %v5144_v47  ;;  %v2208_v61 = vadd.f32 %v2176_v26, %v2111_v52  ;;  %v5154_v52 = vld [vmem:[#allocation13_spill] sm:$0xff]  ;;  %v4525_v17 = vld [vmem:[#allocation3 + $0x108] sm:$0xff]  ;;  %v4530_v59 = vld [vmem:[%s5041_s4] ss:$0 sm:$0xff] }
 0x14a   : > { %v2407_v11 = vadd.f32 %v4292_v21, %v2310_v53  ;;  %v1599_v22 = vmax.f32 %v1567_v31, 0.0  ;;  %v2308_v21 = vadd.f32 %v5143_v56, %v2210_v55  ;;  %v2209_v34 = vadd.f32 %v2177_v18, %v2112_v5  ;;  %v5155_v26 = vld [vmem:[#allocation33_spill] sm:$0xff]  ;;  %5159 = vst [vmem:[#allocation20_spill] sm:$0xff] %v4525_v17  ;;  %v4607_v45 = vld [vmem:[#allocation3 + $0x129] sm:$0xff] }
 0x14b   : > { %v4492_v16 = vsel %vm1603_vm4, %v5140_v32, 0  ;;  %v2408_v62 = vadd.f32 %v5142_v24, %v2311_v2  ;;  %v2274_v0 = vmul.f32 %v5146_v14, %v5145_v30  ;;  %v2013_v41 = vadd.f32 %v1981_v51, %v1916_v58  ;;  %v4515_v51 = vld [vmem:[%s5040_s3] ss:$0 sm:$0xff]  ;;  %v5156_v2 = vld [vmem:[#allocation24_spill] sm:$0xff]  ;;  %v5160_v24 = vld [vmem:[#allocation17_spill] sm:$0xff]  ;;  %5177 = vst [vmem:[#allocation32_spill] sm:$0xff] %v4607_v45 }
 0x14c   : > { %5141 = vst [vmem:[#allocation27_spill] sm:$0xff] %v4492_v16  ;;  %v2504_v13 = vadd.f32 %v5147_v50, %v2407_v11  ;;  %v2406_v43 = vadd.f32 %v5149_v54, %v2309_v48  ;;  %v2275_v8 = vmul.f32 %v5146_v14, %v5150_v29  ;;  %v2109_v27 = vadd.f32 %v2077_v4, %v2012_v60  ;;  %v5157_v11 = vld [vmem:[#allocation11_spill] sm:$0xff]  ;;  %v5162_v50 = vld [vmem:[#allocation16_spill] sm:$0xff] }
 0x14d   : > { %1674 = vst.msk [vmem:[#allocation3 + $0x169] sm:$0xff] %vm1603_vm4, %v1599_v22  ;;  %v2505_v9 = vadd.f32 %v5148_v10, %v2408_v62  ;;  %v1491_v6 = vpop.f32.mrf.mxu3  ;;  %v2174_v23 = vmul.f32 %v4109_v37, %v5151_v15  ;;  %v2204_v39 = vadd.f32 %v5153_v40, %v5152_v42  ;;  %v2270_v58 = vmul.f32 %v5146_v14, %v4374_v1  ;;  %v5158_v60 = vld [vmem:[#allocation35_spill] sm:$0xff]  ;;  %v5168_v42 = vld [vmem:[#allocation14_spill] sm:$0xff] }
 0x14e   : > { %v1532_v53 = vmul.f32 %v4515_v51, %v1491_v6  ;;  %v2405_v5 = vadd.f32 %v5154_v52, %v2308_v21  ;;  %v2175_v18 = vmul.f32 %v4109_v37, %v5155_v26  ;;  %v2306_v31 = vadd.f32 %v2274_v0, %v2208_v61  ;;  %v5161_v21 = vld [vmem:[#allocation31_spill] sm:$0xff]  ;;  %v5169_v52 = vld [vmem:[#allocation8_spill] sm:$0xff] }
 0x14f   : > { %v2535_v55 = vpack.c.bf16 %v2505_v9, %v2504_v13  ;;  %v2371_v48 = vmul.f32 %v5157_v11, %v5156_v2  ;;  %v2372_v1 = vmul.f32 %v5157_v11, %v5158_v60  ;;  %v2110_v4 = vadd.f32 %v2078_v28, %v2013_v41  ;;  %v5163_v9 = vld [vmem:[#allocation7_spill] sm:$0xff] }
 0x150   : > { %v1568_v32 = vadd.f32 %v4530_v59, %v1532_v53  ;;  %v2503_v62 = vadd.f32 %v5160_v24, %v2406_v43  ;;  %v2307_v56 = vadd.f32 %v2275_v8, %v2209_v34  ;;  %v2205_v61 = vadd.f32 %v5161_v21, %v2108_v33  ;;  %v4543_v29 = vld [vmem:[#allocation3 + $0x109] sm:$0xff]  ;;  %v4581_v21 = vld [vmem:[#allocation3 + $0x112] sm:$0xff] }
 0x151   : > { %v2574_v22 = vsel %vm1603_vm4, %v2535_v55, 0  ;;  %v2271_v28 = vmul.f32 %v5146_v14, %v4383_v57  ;;  %v2302_v30 = vadd.f32 %v2270_v58, %v2204_v39  ;;  %v2367_v0 = vmul.f32 %v5157_v11, %v4385_v38  ;;  %5164 = vst [vmem:[#allocation18_spill] sm:$0xff] %v4543_v29  ;;  %v5165_v8 = vld [vmem:[#allocation19_spill] sm:$0xff] }
 0x152   : > { %2600 = vmatpush.bf16.xpose.msra.mxu1 %v2574_v22  ;;  %v1600_v41 = vmax.f32 %v1568_v32, 0.0  ;;  %v2502_v13 = vadd.f32 %v5162_v50, %v2405_v5  ;;  %v2206_v10 = vadd.f32 %v2174_v23, %v2109_v27  ;;  %v1735_v54 = vmul.f32 %v5163_v9, %v4525_v17  ;;  %v4549_v6 = vld [vmem:[#allocation3 + $0x110] sm:$0xff]  ;;  %5172 = vst [vmem:[#allocation10_spill] sm:$0xff] %v4581_v21 }
 0x153   : > { %v2403_v34 = vadd.f32 %v2371_v48, %v2306_v31  ;;  %v2207_v43 = vadd.f32 %v2175_v18, %v2110_v4  ;;  %v2272_v33 = vmul.f32 %v5146_v14, %v5165_v8  ;;  %v2273_v57 = vmul.f32 %v5146_v14, %v4326_v25  ;;  %5166 = vst [vmem:[#allocation21_spill] sm:$0xff] %v4549_v6  ;;  %v4551_v38 = vld [vmem:[#allocation3 + $0x111] sm:$0xff]  ;;  %v4605_v8 = vld [vmem:[#allocation3 + $0x128] sm:$0xff] }
 0x154   : > { %5167 = vst [vmem:[#allocation12_spill] sm:$0xff] %v4551_v38  ;;  %v2534_v27 = vpack.c.bf16 %v2503_v62, %v2502_v13  ;;  %v2404_v23 = vadd.f32 %v2372_v1, %v2307_v56  ;;  %v2468_v40 = vmul.f32 %v5168_v42, %v4422_v20  ;;  %v2469_v39 = vmul.f32 %v5168_v42, %v4433_v12  ;;  %v4569_v2 = vld [vmem:[#allocation3 + $0x10a] sm:$0xff] }
 0x155   : > { %1675 = vst.msk [vmem:[#allocation3 + $0x171] sm:$0xff] %vm1603_vm4, %v1600_v41  ;;  %v1494_v58 = vpop.f32.mrf.mxu3  ;;  %v2303_v53 = vadd.f32 %v2271_v28, %v2205_v61  ;;  %v2368_v55 = vmul.f32 %v5157_v11, %v5144_v47  ;;  %v2399_v25 = vadd.f32 %v2367_v0, %v2302_v30  ;;  %v1800_v5 = vmul.f32 %v5169_v52, %v4543_v29  ;;  %v4571_v48 = vld [vmem:[#allocation3 + $0xf0] sm:$0xff]  ;;  %v4597_v0 = vld [vmem:[#allocation3 + $0x120] sm:$0xff] }
 0x156   : > { %v1533_v18 = vmul.f32 %v4515_v51, %v1494_v58  ;;  %v2464_v31 = vmul.f32 %v5168_v42, %v5151_v15  ;;  %v1736_v20 = vmul.f32 %v5163_v9, %v4549_v6  ;;  %v1801_v12 = vmul.f32 %v5169_v52, %v4551_v38  ;;  %5170 = vst [vmem:[#allocation29_spill] sm:$0xff] %v4569_v2  ;;  %v2261_v6 = vld [vmem:[#allocation3 + $0x198] sm:$0xff] }
 0x157   : > { %5171 = vst [vmem:[#allocation28_spill] sm:$0xff] %v4571_v48  ;;  %v2304_v47 = vadd.f32 %v2272_v33, %v2206_v10  ;;  %v2305_v60 = vadd.f32 %v2273_v57, %v2207_v43  ;;  %v2369_v1 = vmul.f32 %v5157_v11, %v4307_v36  ;;  %v2370_v4 = vmul.f32 %v5157_v11, %v4330_v44  ;;  %v4589_v44 = vld [vmem:[#allocation3 + $0xf1] sm:$0xff] }
 0x158   : > { %v1569_v15 = vadd.f32 %v4530_v59, %v1533_v18  ;;  %v2571_v32 = vsel %vm1603_vm4, %v2534_v27, 0  ;;  %v2500_v22 = vadd.f32 %v2468_v40, %v2403_v34  ;;  %v2501_v24 = vadd.f32 %v2469_v39, %v2404_v23  ;;  %5174 = vst [vmem:[#allocation23_spill] sm:$0xff] %v4589_v44  ;;  %v4610_v33 = vld [vmem:[#allocation3 + $0x158] sm:$0xff]  ;;  %v4620_v23 = vld [vmem:[#allocation3 + $0x168] sm:$0xff] }
 0x159   : > { %v2400_v62 = vadd.f32 %v2368_v55, %v2303_v53  ;;  %v2465_v56 = vmul.f32 %v5168_v42, %v5155_v26  ;;  %v1897_v61 = vmul.f32 %v4067_v46, %v4569_v2  ;;  %v4587_v36 = vmul.f32 %v5163_v9, %v4571_v48  ;;  %5175 = vst [vmem:[#allocation15_spill] sm:$0xff] %v4597_v0  ;;  %v4599_v26 = vld [vmem:[#allocation3 + $0x121] sm:$0xff]  ;;  %v4622_v40 = vld [vmem:[#allocation3 + $0x169] sm:$0xff] }
 0x15a   : > { %2601 = vmatpush.bf16.xpose.msra.mxu1 %v2571_v32  ;;  %v1601_v28 = vmax.f32 %v1569_v15, 0.0  ;;  %v4595_v30 = vsel %vm1603_vm4, %v2530_v63, 0  ;;  %5176 = vst [vmem:[#allocation34_spill] sm:$0xff] %v4599_v26  ;;  %v1832_v41 = vadd.f32 %v1800_v5, %v1735_v54  ;;  %v1833_v50 = vadd.f32 %v1801_v12, %v1736_v20  ;;  %v4612_v54 = vld [vmem:[#allocation3 + $0x159] sm:$0xff] }
 0x15b   : > { %5173 = vst [vmem:[#allocation22_spill] sm:$0xff] %v4587_v36  ;;  %v2401_v13 = vadd.f32 %v2369_v1, %v2304_v47  ;;  %v2402_v10 = vadd.f32 %v2370_v4, %v2305_v60  ;;  %v2466_v34 = vmul.f32 %v5168_v42, %v4342_v7  ;;  %v2467_v43 = vmul.f32 %v5168_v42, %v4358_v35  ;;  %v4645_v1 = vld [vmem:[#allocation3 + $0x122] sm:$0xff]  ;;  %v4647_v4 = vld [vmem:[#allocation3 + $0xf9] sm:$0xff] }
 0x15c   : > { %1676 = vst.msk [vmem:[#allocation3 + $0x181] sm:$0xff] %vm1603_vm4, %v1601_v28  ;;  %v2533_v3 = vpack.c.bf16 %v2501_v24, %v2500_v22  ;;  %v2496_v63 = vadd.f32 %v2464_v31, %v2399_v25  ;;  %v1898_v57 = vmul.f32 %v4067_v46, %v4581_v21  ;;  %v4618_v7 = vmul.f32 %v5169_v52, %v4589_v44  ;;  %v4637_v31 = vld [vmem:[#allocation3 + $0xf8] sm:$0xff]  ;;  %v4639_v47 = vld [vmem:[#allocation3 + $0x16a] sm:$0xff] }
 0x15d   : > { %v1496_v35 = vpop.f32.mrf.mxu3  ;;  %v2497_v27 = vadd.f32 %v2465_v56, %v2400_v62  ;;  %v1737_v39 = vmul.f32 %v5163_v9, %v4597_v0  ;;  %v1802_v58 = vmul.f32 %v5169_v52, %v4599_v26  ;;  %v4628_v53 = vadd.f32 %v1897_v61, %v1832_v41  ;;  %5180 = vst [vmem:[#allocation13_spill] sm:$0xff] %v4637_v31  ;;  %v4655_v62 = vld [vmem:[#allocation3 + $0x12a] sm:$0xff]  ;;  %v4661_v41 = vld [vmem:[#allocation3 + $0x138] sm:$0xff] }
 0x15e   : > { %5178 = vst [vmem:[#allocation26_spill] sm:$0xff] %v4618_v7  ;;  %v1534_v55 = vmul.f32 %v4515_v51, %v1496_v35  ;;  %v1738_v25 = vmul.f32 %v5163_v9, %v4605_v8  ;;  %v1803_v5 = vmul.f32 %v5169_v52, %v4607_v45  ;;  %v4635_v18 = vadd.f32 %v1898_v57, %v1833_v50  ;;  %v4657_v61 = vld [vmem:[#allocation3 + $0x170] sm:$0xff] }
 0x15f   : > { %v2498_v20 = vadd.f32 %v2466_v34, %v2401_v13  ;;  %v2499_v12 = vadd.f32 %v2467_v43, %v2402_v10  ;;  %v1742_v60 = vmul.f32 %v5163_v9, %v4610_v33  ;;  %v1807_v51 = vmul.f32 %v5169_v52, %v4612_v54  ;;  %5181 = vst [vmem:[#allocation33_spill] sm:$0xff] %v4645_v1  ;;  %v4659_v28 = vld [vmem:[#allocation3 + $0x171] sm:$0xff]  ;;  %v4673_v43 = vld [vmem:[#allocation3 + $0x140] sm:$0xff] }
 0x160   : > { %5179 = vst [vmem:[#allocation30_spill] sm:$0xff] %v4635_v18  ;;  %v1570_v15 = vadd.f32 %v4530_v59, %v1534_v55  ;;  %v2568_v32 = vsel %vm1603_vm4, %v2533_v3, 0  ;;  %v1743_v22 = vmul.f32 %v5163_v9, %v4620_v23  ;;  %v1808_v24 = vmul.f32 %v5169_v52, %v4622_v40  ;;  %v4675_v3 = vld [vmem:[#allocation3 + $0x139] sm:$0xff] }
 0x161   : > { %5182 = vst [vmem:[#allocation24_spill] sm:$0xff] %v4647_v4  ;;  %v2531_v56 = vpack.c.bf16 %v2497_v27, %v2496_v63  ;;  %v1834_v50 = vadd.f32 %v1802_v58, %v1737_v39  ;;  %v4665_v59 = vmul.f32 %v4080_v49, %v4597_v0  ;;  %v4669_v13 = vmul.f32 %v5163_v9, %v4637_v31  ;;  %v4677_v63 = vld [vmem:[#allocation3 + $0x141] sm:$0xff]  ;;  %v4711_v0 = vld [vmem:[#allocation3 + $0x152] sm:$0xff] }
 0x162   : > { %5183 = vst [vmem:[#allocation11_spill] sm:$0xff] %v4655_v62  ;;  %2602 = vmatpush.bf16.xpose.msra.mxu1 %v2568_v32  ;;  %v1602_v10 = vmax.f32 %v1570_v15, 0.0  ;;  %v1905_v34 = vmul.f32 %v4067_v46, %v4639_v47  ;;  %v1899_v57 = vmul.f32 %v4067_v46, %v4645_v1  ;;  %v4683_v35 = vmul.f32 %v5169_v52, %v4647_v4  ;;  %v4687_v55 = vld [vmem:[#allocation3 + $0x15a] sm:$0xff]  ;;  %v4717_v21 = vld [vmem:[#allocation3 + $0x172] sm:$0xff] }
 0x163   : > { %5184 = vst [vmem:[#allocation35_spill] sm:$0xff] %v4659_v28  ;;  %v2532_v27 = vpack.c.bf16 %v2499_v12, %v2498_v20  ;;  %v4685_v39 = vld [vmem:[#allocation3 + $0x180] sm:$0xff]  ;;  %v1839_v58 = vadd.f32 %v1807_v51, %v1742_v60  ;;  %v1835_v15 = vadd.f32 %v1803_v5, %v1738_v25  ;;  %v1900_v32 = vmul.f32 %v4067_v46, %v4655_v62  ;;  %v4698_v12 = vld [vmem:[#allocation3 + $0x150] sm:$0xff] }
 0x164   : > { %5185 = vst [vmem:[#allocation17_spill] sm:$0xff] %v4661_v41  ;;  %v1744_v44 = vmul.f32 %v5163_v9, %v4657_v61  ;;  %v1809_v48 = vmul.f32 %v5169_v52, %v4659_v28  ;;  %v1840_v4 = vadd.f32 %v1808_v24, %v1743_v22  ;;  %v2002_v20 = vmul.f32 %v4080_v49, %v4685_v39  ;;  %v4700_v60 = vld [vmem:[#allocation3 + $0x151] sm:$0xff]  ;;  %v4719_v31 = vld [vmem:[#allocation3 + $0x181] sm:$0xff] }
 0x165   : > { %5186 = vst [vmem:[#allocation31_spill] sm:$0xff] %v4665_v59  ;;  %v1739_v25 = vmul.f32 %v5163_v9, %v4661_v41  ;;  %v1740_v5 = vmul.f32 %v5163_v9, %v4673_v43  ;;  %v1804_v51 = vmul.f32 %v5169_v52, %v4675_v3  ;;  %v2562_v22 = vsel %vm1603_vm4, %v2531_v56, 0  ;;  %v4725_v56 = vld [vmem:[#allocation3 + $0x142] sm:$0xff] }
 0x166   : > { %5187 = vst [vmem:[#allocation16_spill] sm:$0xff] %v4669_v13  ;;  %v1937_v24 = vadd.f32 %v1905_v34, %v1840_v4  ;;  %v1904_v2 = vmul.f32 %v4067_v46, %v4687_v55  ;;  %v2001_v29 = vmul.f32 %v4080_v49, %v4657_v61  ;;  %v1741_v38 = vmul.f32 %v5163_v9, %v4698_v12  ;;  %v2456_v59 = vld [vmem:[#allocation3 + $0x1a2] sm:$0xff] }
 0x167   : > { %5188 = vst [vmem:[#allocation19_spill] sm:$0xff] %v4683_v35  ;;  %v1806_v17 = vmul.f32 %v5169_v52, %v4700_v60  ;;  %v4727_v4 = vadd.f32 %v1899_v57, %v1834_v50  ;;  %v4729_v34 = vadd.f32 %v1900_v32, %v1835_v15  ;;  %v2565_v7 = vsel %vm1603_vm4, %v2532_v27, 0 }
 0x168   : > { %1677 = vst.msk [vmem:[#allocation3 + $0x189] sm:$0xff] %vm1603_vm4, %v1602_v10  ;;  %v1805_v10 = vmul.f32 %v5169_v52, %v4677_v63  ;;  %v1841_v36 = vadd.f32 %v1809_v48, %v1744_v44  ;;  %v2034_v16 = vadd.f32 %v2002_v20, %v1937_v24  ;;  %v1936_v62 = vadd.f32 %v1904_v2, %v1839_v58  ;;  %v4742_v44 = vld [vmem:[#allocation3 + $0x13a] sm:$0xff] }
 0x169   : > { %v1903_v1 = vmul.f32 %v4067_v46, %v4711_v0  ;;  %v1836_v9 = vadd.f32 %v1804_v51, %v1739_v25  ;;  %v4736_v52 = vmul.f32 %v4080_v49, %v4661_v41  ;;  %v1906_v50 = vmul.f32 %v4067_v46, %v4717_v21  ;;  %v2358_v24 = vld [vmem:[#allocation3 + $0x199] sm:$0xff] }
 0x16a   : > { %2603 = vmatpush.bf16.xpose.msra.mxu1 %v2565_v7  ;;  %v1837_v45 = vadd.f32 %v1805_v10, %v1740_v5  ;;  %v2099_v57 = vmul.f32 %v4087_v19, %v4719_v31  ;;  %v2033_v48 = vadd.f32 %v2001_v29, %v1936_v62  ;;  %v1902_v2 = vmul.f32 %v4067_v46, %v4725_v56  ;;  %v2262_v10 = vld [vmem:[#allocation3 + $0x1a0] sm:$0xff] }
 0x16b   : > { %v2294_v15 = vmul.f32 %v5146_v14, %v2261_v6  ;;  %v1838_v32 = vadd.f32 %v1806_v17, %v1741_v38  ;;  %v2000_v20 = vmul.f32 %v4080_v49, %v4620_v23  ;;  %v2098_v25 = vmul.f32 %v4087_v19, %v4659_v28 }
 0x16c   : > { %v1938_v5 = vadd.f32 %v1906_v50, %v1841_v36  ;;  %v2131_v62 = vadd.f32 %v2099_v57, %v2034_v16  ;;  %v1901_v17 = vmul.f32 %v4067_v46, %v4742_v44  ;;  %v1934_v6 = vadd.f32 %v1902_v2, %v1837_v45  ;;  %v2359_v57 = vld [vmem:[#allocation3 + $0x1a1] sm:$0xff] }
 0x16d   : > { %v1935_v35 = vadd.f32 %v1903_v1, %v1838_v32  ;;  %v1999_v38 = vmul.f32 %v4080_v49, %v4610_v33  ;;  %v2130_v18 = vadd.f32 %v2098_v25, %v2033_v48  ;;  %v2295_v16 = vmul.f32 %v5146_v14, %v2262_v10  ;;  %v2455_v46 = vld [vmem:[#allocation3 + $0x19a] sm:$0xff] }
 0x16e   : > { %v2391_v28 = vmul.f32 %v5157_v11, %v2358_v24  ;;  %v2195_v1 = vmul.f32 %v4109_v37, %v4717_v21  ;;  %v2097_v48 = vmul.f32 %v4087_v19, %v4622_v40  ;;  %v1998_v25 = vmul.f32 %v4080_v49, %v4698_v12 }
 0x16f   : > { %v1970_v7 = vld [vmem:[#allocation3 + $0x188] sm:$0xff]  ;;  %v2032_v26 = vadd.f32 %v2000_v20, %v1935_v35  ;;  %v1997_v35 = vmul.f32 %v4080_v49, %v4673_v43  ;;  %v2096_v10 = vmul.f32 %v4087_v19, %v4612_v54 }
 0x170   : > { %v2067_v27 = vld [vmem:[#allocation3 + $0x189] sm:$0xff]  ;;  %v2003_v29 = vmul.f32 %v4080_v49, %v1970_v7 }
 0x171   : > { %v4746_v58 = vld [vmem:[#allocation3 + $0x182] sm:$0xff]  ;;  %v2164_v41 = vld [vmem:[#allocation3 + $0x18a] sm:$0xff]  ;;  %v2100_v36 = vmul.f32 %v4087_v19, %v2067_v27 }
 0x172   : > { %v2196_v51 = vmul.f32 %v4109_v37, %v4746_v58  ;;  %v2035_v13 = vadd.f32 %v2003_v29, %v1938_v5  ;;  %v2197_v45 = vmul.f32 %v4109_v37, %v2164_v41  ;;  %v2293_v5 = vmul.f32 %v5146_v14, %v1970_v7  ;;  %2604 = vmatpush.bf16.xpose.msra.mxu1 %v2562_v22 }
 0x173   : > { %v2031_v29 = vadd.f32 %v1999_v38, %v1934_v6  ;;  %v2488_v7 = vmul.f32 %v5168_v42, %v2455_v46  ;;  %v2489_v22 = vmul.f32 %v5168_v42, %v2456_v59  ;;  %v2292_v38 = vmul.f32 %v5146_v14, %v4685_v39 }
 0x174   : > { %v2228_v50 = vadd.f32 %v2196_v51, %v2131_v62  ;;  %v2132_v32 = vadd.f32 %v2100_v36, %v2035_v13  ;;  %v2392_v13 = vmul.f32 %v5157_v11, %v2359_v57  ;;  %v2227_v62 = vadd.f32 %v2195_v1, %v2130_v18 }
 0x175   : > { %v2129_v51 = vadd.f32 %v2097_v48, %v2032_v26  ;;  %v2128_v57 = vadd.f32 %v2096_v10, %v2031_v29  ;;  %v1995_v18 = vmul.f32 %v4080_v49, %v4605_v8  ;;  %v2390_v26 = vmul.f32 %v5157_v11, %v2067_v27 }
 0x176   : > { %v2326_v2 = vadd.f32 %v2294_v15, %v2228_v50  ;;  %v2229_v20 = vadd.f32 %v2197_v45, %v2132_v32  ;;  %v2194_v15 = vmul.f32 %v4109_v37, %v4639_v47  ;;  %v2325_v36 = vadd.f32 %v2293_v5, %v2227_v62 }
 0x177   : > { %v1933_v50 = vadd.f32 %v1901_v17, %v1836_v9  ;;  %v2029_v32 = vadd.f32 %v1997_v35, %v4729_v34  ;;  %v2028_v59 = vadd.f32 %v4736_v52, %v4727_v4  ;;  %v2291_v9 = vmul.f32 %v5146_v14, %v4657_v61 }
 0x178   : > { %v2327_v24 = vadd.f32 %v2295_v16, %v2229_v20  ;;  %v2423_v6 = vadd.f32 %v2391_v28, %v2326_v2  ;;  %v2226_v1 = vadd.f32 %v2194_v15, %v2129_v51  ;;  %v2193_v28 = vmul.f32 %v4109_v37, %v4687_v55  ;;  %v5190_v51 = vld [vmem:[#allocation34_spill] sm:$0xff] }
 0x179   : > { %v2030_v16 = vadd.f32 %v1998_v25, %v1933_v50  ;;  %v2094_v39 = vmul.f32 %v4087_v19, %v4677_v63  ;;  %v2422_v2 = vadd.f32 %v2390_v26, %v2325_v36  ;;  %v2095_v27 = vmul.f32 %v4087_v19, %v4700_v60  ;;  %v4821_v50 = vld [vmem:[#allocation3 + $0xf2] sm:$0xff] }
 0x17a   : > { %v2424_v46 = vadd.f32 %v2392_v13, %v2327_v24  ;;  %v2520_v34 = vadd.f32 %v2488_v7, %v2423_v6  ;;  %v2324_v45 = vadd.f32 %v2292_v38, %v2226_v1  ;;  %2605 = vmatpush.bf16.xpose.msra.mxu1 %v4595_v30  ;;  %v2192_v52 = vmul.f32 %v4109_v37, %v4711_v0  ;;  %v5191_v6 = vld [vmem:[#allocation35_spill] sm:$0xff]  ;;  %v5193_v26 = vld [vmem:[#allocation16_spill] sm:$0xff] }
 0x17b   : > { %v2225_v4 = vadd.f32 %v2193_v28, %v2128_v57  ;;  %v2126_v5 = vadd.f32 %v2094_v39, %v2029_v32  ;;  %v2389_v61 = vmul.f32 %v5157_v11, %v4719_v31  ;;  %v2486_v25 = vmul.f32 %v5168_v42, %v4746_v58 }
 0x17c   : > { %v2521_v17 = vadd.f32 %v2489_v22, %v2424_v46  ;;  %v2487_v29 = vmul.f32 %v5168_v42, %v2164_v41  ;;  %v2127_v35 = vadd.f32 %v2095_v27, %v2030_v16  ;;  %v2290_v30 = vmul.f32 %v5146_v14, %v4620_v23  ;;  %v5189_v23 = vld [vmem:[#allocation31_spill] sm:$0xff]  ;;  %v5192_v46 = vld [vmem:[#allocation30_spill] sm:$0xff] }
 0x17d   : > { %v2191_v20 = vmul.f32 %v4109_v37, %v4725_v56  ;;  %v2289_v13 = vmul.f32 %v5146_v14, %v4610_v33  ;;  %v2421_v62 = vadd.f32 %v2389_v61, %v2324_v45  ;;  %v2323_v31 = vadd.f32 %v2291_v9, %v2225_v4  ;;  %v5194_v16 = vld [vmem:[#allocation19_spill] sm:$0xff]  ;;  %v4841_v61 = vld [vmem:[#allocation3 + $0xfa] sm:$0xff] }
 0x17e   : > { %v2543_v48 = vpack.c.bf16 %v2521_v17, %v2520_v34  ;;  %v2519_v7 = vadd.f32 %v2487_v29, %v2422_v2  ;;  %v2093_v58 = vmul.f32 %v4087_v19, %v4675_v3  ;;  %v2190_v41 = vmul.f32 %v4109_v37, %v4742_v44  ;;  %v5195_v17 = vld [vmem:[#allocation25_spill] sm:$0xff]  ;;  %v5196_v2 = vld [vmem:[#allocation32_spill] sm:$0xff] }
 0x17f   : > { %v2026_v22 = vadd.f32 %v5189_v23, %v4628_v53  ;;  %v2091_v10 = vmul.f32 %v4087_v19, %v5190_v51  ;;  %v2518_v24 = vadd.f32 %v2486_v25, %v2421_v62  ;;  %v2224_v33 = vadd.f32 %v2192_v52, %v2127_v35  ;;  %v5198_v35 = vld [vmem:[#allocation33_spill] sm:$0xff] }
 0x180   : > { %v2598_v15 = vsel %vm1603_vm4, %v2543_v48, 0  ;;  %v2388_v38 = vmul.f32 %v5157_v11, %v5191_v6  ;;  %v2223_v36 = vadd.f32 %v2191_v20, %v2126_v5  ;;  %v2125_v57 = vadd.f32 %v2093_v58, %v2028_v59  ;;  %v5197_v59 = vld [vmem:[#allocation9_spill] sm:$0xff]  ;;  %v5199_v20 = vld [vmem:[#allocation11_spill] sm:$0xff] }
 0x181   : > { %2614 = vmatpush.bf16.xpose.msra.mxu2 %v2598_v15  ;;  %v2288_v32 = vmul.f32 %v5146_v14, %v4698_v12  ;;  %v2027_v1 = vadd.f32 %v1995_v18, %v5192_v46  ;;  %v1831_v53 = vadd.f32 %v5194_v16, %v5193_v26  ;;  %v2542_v28 = vpack.c.bf16 %v2519_v7, %v2518_v24  ;;  %v4848_v7 = vld [vmem:[#allocation3 + $0xe0] sm:$0xff] }
 0x182   : > { %v2322_v9 = vadd.f32 %v2290_v30, %v2224_v33  ;;  %v2420_v39 = vadd.f32 %v2388_v38, %v2323_v31  ;;  %v2321_v34 = vadd.f32 %v2289_v13, %v2223_v36  ;;  %2606 = vmatpush.bf16.xpose.msra.mxu1 %v5195_v17  ;;  %v2222_v45 = vadd.f32 %v2190_v41, %v2125_v57  ;;  %v5200_v58 = vld [vmem:[#allocation21_spill] sm:$0xff]  ;;  %v5202_v38 = vld [vmem:[#allocation7_spill] sm:$0xff]  ;;  %v5203_v57 = vld [vmem:[#allocation8_spill] sm:$0xff] }
 0x183   : > { %v2092_v27 = vmul.f32 %v4087_v19, %v5196_v2  ;;  %v2123_v52 = vadd.f32 %v2091_v10, %v2026_v22  ;;  %v1895_v4 = vmul.f32 %v5197_v59, %v4821_v50  ;;  %v2387_v12 = vmul.f32 %v5157_v11, %v4622_v40  ;;  %v4863_v22 = vld [vmem:[%s5042_s5 + $0x8] ss:$0 sm:$0xff]  ;;  %v5201_v24 = vld [vmem:[#allocation17_spill] sm:$0xff]  ;;  %v5206_v17 = vld [vmem:[#allocation26_spill] sm:$0xff] }
 0x184   : > { %v2484_v18 = vmul.f32 %v5168_v42, %v4639_v47  ;;  %v2485_v5 = vmul.f32 %v5168_v42, %v4717_v21  ;;  %v2386_v48 = vmul.f32 %v5157_v11, %v4612_v54  ;;  %v2320_v25 = vadd.f32 %v2288_v32, %v2222_v45  ;;  %v4850_v42 = vld [vmem:[#allocation3 + $0xe1] sm:$0xff] }
 0x185   : > { %v2124_v29 = vadd.f32 %v2092_v27, %v2027_v1  ;;  %v2188_v30 = vmul.f32 %v4109_v37, %v5198_v35  ;;  %v2189_v13 = vmul.f32 %v4109_v37, %v5199_v20  ;;  %v2595_v40 = vsel %vm1603_vm4, %v2542_v28, 0  ;;  %v5204_v28 = vld [vmem:[#allocation27_spill] sm:$0xff] }
 0x186   : > { %v2419_v15 = vadd.f32 %v2387_v12, %v2322_v9  ;;  %v2517_v47 = vadd.f32 %v2485_v5, %v2420_v39  ;;  %v2418_v62 = vadd.f32 %v2386_v48, %v2321_v34  ;;  %v2385_v21 = vmul.f32 %v5157_v11, %v4700_v60  ;;  %v5205_v34 = vld [vmem:[#allocation22_spill] sm:$0xff]  ;;  %v5208_v5 = vld [vmem:[#allocation12_spill] sm:$0xff] }
 0x187   : > { %v2287_v54 = vmul.f32 %v5146_v14, %v4673_v43  ;;  %v1896_v31 = vmul.f32 %v5197_v59, %v4841_v61  ;;  %v1993_v41 = vmul.f32 %v4080_v49, %v5200_v58  ;;  %v2482_v10 = vmul.f32 %v4863_v22, %v4711_v0  ;;  %v4880_v12 = vld [vmem:[#allocation3 + $0xe2] sm:$0xff] }
 0x188   : > { %v2516_v23 = vadd.f32 %v2484_v18, %v2419_v15  ;;  %v2483_v60 = vmul.f32 %v4863_v22, %v4687_v55  ;;  %v2286_v43 = vmul.f32 %v5146_v14, %v5201_v24  ;;  %v2221_v33 = vadd.f32 %v2189_v13, %v2124_v29  ;;  %v4891_v15 = vld [vmem:[#allocation3 + $0xd8] sm:$0xff] }
 0x189   : > { %2615 = vmatpush.bf16.xpose.msra.mxu2 %v2595_v40  ;;  %v1928_v6 = vadd.f32 %v1896_v31, %v1831_v53  ;;  %v1732_v36 = vmul.f32 %v5202_v38, %v4848_v7  ;;  %v1797_v32 = vmul.f32 %v5203_v57, %v4850_v42  ;;  %v2417_v1 = vadd.f32 %v2385_v21, %v2320_v25  ;;  %v5207_v53 = vld [vmem:[#allocation20_spill] sm:$0xff]  ;;  %v5209_v21 = vld [vmem:[#allocation13_spill] sm:$0xff]  ;;  %v1697_v31 = vld [vmem:[#allocation3 + $0xc8] sm:$0xff] }
 0x18a   : > { %v2541_v46 = vpack.c.bf16 %v2517_v47, %v2516_v23  ;;  %v2515_v26 = vadd.f32 %v2483_v60, %v2418_v62  ;;  %v2220_v16 = vadd.f32 %v2188_v30, %v2123_v52  ;;  %2607 = vmatpush.bf16.xpose.msra.mxu1 %v5204_v28  ;;  %v2319_v0 = vadd.f32 %v2287_v54, %v2221_v33  ;;  %v4893_v47 = vld [vmem:[#allocation3 + $0xd9] sm:$0xff] }
 0x18b   : > { %v2025_v9 = vadd.f32 %v1993_v41, %v1928_v6  ;;  %v2514_v55 = vadd.f32 %v2482_v10, %v2417_v1  ;;  %v1830_v45 = vadd.f32 %v5206_v17, %v5205_v34  ;;  %v1992_v27 = vmul.f32 %v4080_v49, %v5207_v53  ;;  %v1762_v41 = vld [vmem:[#allocation3 + $0xc9] sm:$0xff]  ;;  %v4903_v24 = vld [vmem:[#allocation3 + $0xda] sm:$0xff] }
 0x18c   : > { %v2318_v39 = vadd.f32 %v2286_v43, %v2220_v16  ;;  %v2383_v18 = vmul.f32 %v5157_v11, %v4675_v3  ;;  %v2384_v52 = vmul.f32 %v5157_v11, %v4677_v63  ;;  %v2090_v48 = vmul.f32 %v4087_v19, %v5208_v5  ;;  %v5210_v10 = vld [vmem:[#allocation10_spill] sm:$0xff]  ;;  %v5213_v34 = vld [vmem:[#allocation15_spill] sm:$0xff] }
 0x18d   : > { %v1829_v25 = vadd.f32 %v1797_v32, %v1732_v36  ;;  %v2592_v29 = vsel %vm1603_vm4, %v2541_v46, 0  ;;  %v2540_v30 = vpack.c.bf16 %v2515_v26, %v2514_v55  ;;  %v2480_v13 = vmul.f32 %v4863_v22, %v4742_v44  ;;  %v5211_v32 = vld [vmem:[#allocation18_spill] sm:$0xff] }
 0x18e   : > { %v1927_v40 = vadd.f32 %v1895_v4, %v1830_v45  ;;  %v2416_v3 = vadd.f32 %v2384_v52, %v2319_v0  ;;  %v2122_v62 = vadd.f32 %v2090_v48, %v2025_v9  ;;  %v1894_v63 = vmul.f32 %v5197_v59, %v4880_v12  ;;  %v5215_v48 = vld [vmem:[#allocation24_spill] sm:$0xff] }
 0x18f   : > { %v1991_v54 = vmul.f32 %v4080_v49, %v5209_v21  ;;  %v2415_v23 = vadd.f32 %v2383_v18, %v2318_v39  ;;  %v2481_v44 = vmul.f32 %v4863_v22, %v4725_v56  ;;  %v2187_v60 = vmul.f32 %v4109_v37, %v5210_v10  ;;  %v5212_v56 = vld [vmem:[#allocation29_spill] sm:$0xff]  ;;  %v5214_v18 = vld [vmem:[#allocation28_spill] sm:$0xff] }
 0x190   : > { %v2024_v4 = vadd.f32 %v1992_v27, %v1927_v40  ;;  %v2285_v43 = vmul.f32 %v5146_v14, %v4605_v8  ;;  %v1731_v33 = vmul.f32 %v5202_v38, %v4891_v15  ;;  %v1796_v6 = vmul.f32 %v5203_v57, %v4893_v47 }
 0x191   : > { %2616 = vmatpush.bf16.xpose.msra.mxu2 %v2592_v29  ;;  %v1926_v36 = vadd.f32 %v1894_v63, %v1829_v25  ;;  %v2089_v46 = vmul.f32 %v4087_v19, %v5211_v32  ;;  %v2186_v1 = vmul.f32 %v4109_v37, %v5212_v56  ;;  %v1730_v26 = vmul.f32 %v5202_v38, %v1697_v31  ;;  %v1859_v29 = vld [vmem:[#allocation3 + $0xca] sm:$0xff] }
 0x192   : > { %v1795_v16 = vmul.f32 %v5203_v57, %v1762_v41  ;;  %v2513_v28 = vadd.f32 %v2481_v44, %v2416_v3  ;;  %v2219_v0 = vadd.f32 %v2187_v60, %v2122_v62  ;;  %v1893_v8 = vmul.f32 %v5197_v59, %v4903_v24  ;;  %v1696_v41 = vld [vmem:[#allocation3 + $0xc0] sm:$0xff]  ;;  %v4931_v44 = vld [vmem:[%s5043_s6] sm:$0xff] }
 0x193   : > { %v2023_v9 = vadd.f32 %v1991_v54, %v1926_v36  ;;  %v2512_v55 = vadd.f32 %v2480_v13, %v2415_v23  ;;  %v2121_v39 = vadd.f32 %v2089_v46, %v2024_v4  ;;  %v2284_v17 = vmul.f32 %v5146_v14, %v5213_v34  ;;  %v1761_v23 = vld [vmem:[#allocation3 + $0xc1] sm:$0xff]  ;;  %2764 = vmatmul.msk.bf16.vlgmr.msra.gmra.mxu1 %vm1603_vm4, %v4931_v44 }
 0x194   : > { %v2317_v45 = vadd.f32 %v2285_v43, %v2219_v0  ;;  %v1828_v27 = vadd.f32 %v1796_v6, %v1731_v33  ;;  %v1990_v52 = vmul.f32 %v4080_v49, %v5214_v18  ;;  %v2088_v25 = vmul.f32 %v4087_v19, %v5215_v48  ;;  %v1858_v46 = vld [vmem:[#allocation3 + $0xc2] sm:$0xff] }
 0x195   : > { %v2589_v40 = vsel %vm1603_vm4, %v2540_v30, 0  ;;  %v2218_v3 = vadd.f32 %v2186_v1, %v2121_v39  ;;  %v1827_v62 = vadd.f32 %v1795_v16, %v1730_v26  ;;  %v2539_v63 = vpack.c.bf16 %v2513_v28, %v2512_v55  ;;  %v5216_v28 = vld [vmem:[#allocation23_spill] sm:$0xff] }
 0x196   : > { %v2382_v13 = vmul.f32 %v5157_v11, %v5196_v2  ;;  %v1925_v54 = vadd.f32 %v1893_v8, %v1828_v27  ;;  %v2120_v31 = vadd.f32 %v2088_v25, %v2023_v9  ;;  %v2381_v30 = vmul.f32 %v5157_v11, %v5190_v51 }
 0x197   : > { %v2316_v4 = vadd.f32 %v2284_v17, %v2218_v3  ;;  %v1892_v60 = vmul.f32 %v5197_v59, %v1859_v29  ;;  %v1989_v43 = vmul.f32 %v4080_v49, %v4848_v7  ;;  %v2185_v6 = vmul.f32 %v4109_v37, %v4841_v61 }
 0x198   : > { %v2414_v33 = vadd.f32 %v2382_v13, %v2317_v45  ;;  %v2022_v2 = vadd.f32 %v1990_v52, %v1925_v54  ;;  %v2283_v36 = vmul.f32 %v5146_v14, %v5200_v58  ;;  %v2478_v51 = vmul.f32 %v4863_v22, %v5198_v35  ;;  %v2524_v52 = vld [vmem:[%s5044_s7] sm:$0xff] }
 0x199   : > { %2617 = vmatpush.bf16.xpose.msra.mxu2 %v2589_v40  ;;  %v1729_v1 = vmul.f32 %v5202_v38, %v1696_v41  ;;  %v1794_v26 = vmul.f32 %v5203_v57, %v1761_v23  ;;  %v1924_v7 = vadd.f32 %v1892_v60, %v1827_v62  ;;  %v2479_v16 = vmul.f32 %v4863_v22, %v5199_v20 }
 0x19a   : > { %v2087_v0 = vmul.f32 %v4087_v19, %v5216_v28  ;;  %v2184_v58 = vmul.f32 %v4109_v37, %v4821_v50  ;;  %v2217_v8 = vadd.f32 %v2185_v6, %v2120_v31  ;;  %v2586_v9 = vsel %vm1603_vm4, %v2539_v63, 0 }
 0x19b   : > { %v2413_v55 = vadd.f32 %v2381_v30, %v2316_v4  ;;  %v1891_v35 = vmul.f32 %v5197_v59, %v1858_v46  ;;  %v2021_v39 = vadd.f32 %v1989_v43, %v1924_v7  ;;  %v2511_v38 = vadd.f32 %v2479_v16, %v2414_v33  ;;  %v2526_v59 = vld [vmem:[%s5045_s8] sm:$0xff] }
 0x19c   : > { %v2119_v34 = vadd.f32 %v2087_v0, %v2022_v2  ;;  %v2282_v57 = vmul.f32 %v5146_v14, %v5207_v53  ;;  %v2315_v17 = vadd.f32 %v2283_v36, %v2217_v8  ;;  %v1826_v20 = vadd.f32 %v1794_v26, %v1729_v1 }
 0x19d   : > { %v1988_v45 = vmul.f32 %v4080_v49, %v4891_v15  ;;  %v2086_v27 = vmul.f32 %v4087_v19, %v4850_v42  ;;  %v2510_v25 = vadd.f32 %v2478_v51, %v2413_v55  ;;  %v2937_v53 = vmov 0  }
 0x19e   : > { %v2216_v29 = vadd.f32 %v2184_v58, %v2119_v34  ;;  %2862 = vset.pattern.permute.xlu0 %v2937_v53  ;;  %v2380_v40 = vmul.f32 %v5157_v11, %v5208_v5  ;;  %v1923_v49 = vadd.f32 %v1891_v35, %v1826_v20  ;;  %2863 = vset.pattern.permute.xlu1 %v2937_v53 }
 0x19f   : > { %v2118_v15 = vadd.f32 %v2086_v27, %v2021_v39  ;;  %2630 = vperm.xlu0 %2862, %v2524_v52   ;;  %v2538_v42 = vpack.c.bf16 %v2511_v38, %v2510_v25  ;;  %2644 = vperm.xlu1 %2863, %v2526_v59   ;;  %v2183_v13 = vmul.f32 %v4109_v37, %v4880_v12 }
 0x1a0   : > { %v2314_v3 = vadd.f32 %v2282_v57, %v2216_v29  ;;  %v2412_v62 = vadd.f32 %v2380_v40, %v2315_v17  ;;  %v2020_v63 = vadd.f32 %v1988_v45, %v1923_v49  ;;  %v2281_v54 = vmul.f32 %v5146_v14, %v5209_v21  ;;  %v2525_v21 = vld [vmem:[%s5044_s7 + $0x8] sm:$0xff] }
 0x1a1   : > { %2618 = vmatpush.bf16.xpose.msra.mxu2 %v2586_v9  ;;  %v2379_v31 = vmul.f32 %v5157_v11, %v5211_v32  ;;  %v2476_v5 = vmul.f32 %v4863_v22, %v5212_v56  ;;  %v2477_v41 = vmul.f32 %v4863_v22, %v5210_v10  ;;  %v2085_v23 = vmul.f32 %v4087_v19, %v4893_v47  ;;  %v2527_v19 = vld [vmem:[%s5045_s8 + $0x8] sm:$0xff] }
 0x1a2   : > { %v2182_v4 = vmul.f32 %v4109_v37, %v4903_v24  ;;  %v2215_v30 = vadd.f32 %v2183_v13, %v2118_v15  ;;  %v2583_v12 = vsel %vm1603_vm4, %v2538_v42, 0  ;;  %v2280_v56 = vmul.f32 %v5146_v14, %v5214_v18 }
 0x1a3   : > { %v2411_v60 = vadd.f32 %v2379_v31, %v2314_v3  ;;  %v2509_v32 = vadd.f32 %v2477_v41, %v2412_v62  ;;  %v2117_v43 = vadd.f32 %v2085_v23, %v2020_v63  ;;  %v2378_v24 = vmul.f32 %v5157_v11, %v5215_v48 }
 0x1a4   : > { %v2313_v10 = vadd.f32 %v2281_v54, %v2215_v30  ;;  %v2377_v14 = vmul.f32 %v5157_v11, %v5216_v28  ;;  %v2474_v18 = vmul.f32 %v4863_v22, %v4821_v50  ;;  %v2475_v36 = vmul.f32 %v4863_v22, %v4841_v61 }
 0x1a5   : > { %v2508_v37 = vadd.f32 %v2476_v5, %v2411_v60  ;;  %v2214_v47 = vadd.f32 %v2182_v4, %v2117_v43 }
 0x1a6   : > { %v2410_v6 = vadd.f32 %v2378_v24, %v2313_v10 }
 0x1a7   : > { %2635 = vperm.xlu0 %2862, %v2525_v21   ;;  %2649 = vperm.xlu1 %2863, %v2527_v19   ;;  %v2537_v33 = vpack.c.bf16 %v2509_v32, %v2508_v37  ;;  %v2312_v2 = vadd.f32 %v2280_v56, %v2214_v47 }
 0x1a8   : > { %v2507_v1 = vadd.f32 %v2475_v36, %v2410_v6 }
 0x1a9   : > { %2619 = vmatpush.bf16.xpose.msra.mxu2 %v2583_v12  ;;  %v2580_v46 = vsel %vm1603_vm4, %v2537_v33, 0  ;;  %v2409_v51 = vadd.f32 %v2377_v14, %v2312_v2 }
 0x1ab   : > { %v2506_v48 = vadd.f32 %v2474_v18, %v2409_v51 }
 0x1ad   : > { %v2536_v26 = vpack.c.bf16 %v2507_v1, %v2506_v48 }
 0x1af   : > { %v2577_v7 = vsel %vm1603_vm4, %v2536_v26, 0 }
 0x1b1   : > { %2620 = vmatpush.bf16.xpose.msra.mxu2 %v2580_v46 }
 0x1b9   : > { %2621 = vmatpush.bf16.xpose.msra.mxu2 %v2577_v7 }
 0x1c0   : > { %2765 = vmatmul.msk.bf16.vlgmr.msra.gmra.mxu2 %vm1603_vm4, %v4931_v44 }
 0x210   : > { %v2609_v50 = vpop.f32.mrf.mxu1 }
 0x211   : > { %v2631_v11 = vpop.permute.xlu0 %2630  ;;  %v2645_v61 = vpop.permute.xlu1 %2644 }
 0x212   : > { %v2638_v16 = vmul.f32 %v2631_v11, %v2609_v50 }
 0x214   : > { %v2652_v22 = vadd.f32 %v2645_v61, %v2638_v16 }
 0x216   : > { %2656 = vst [vmem:[%s325_s24] sm:$0xff] %v2652_v22 }
 0x218   : > { %v2611_v0 = vpop.f32.mrf.mxu1 }
 0x219   : > { %v2636_v28 = vpop.permute.xlu0 %2635  ;;  %v2650_v8 = vpop.permute.xlu1 %2649 }
 0x21a   : > { %v2640_v58 = vmul.f32 %v2636_v28, %v2611_v0 }
 0x21c   : > { %v2654_v9 = vadd.f32 %v2650_v8, %v2640_v58 }
 0x21e   : > { %2658 = vst [vmem:[%s325_s24 + $0x10] sm:$0xff] %v2654_v9 }
 0x243   : > { %v2623_v55 = vpop.f32.mrf.mxu2 }
 0x244   : > { %v2639_v35 = vmul.f32 %v2631_v11, %v2623_v55 }
 0x246   : > { %v2653_v44 = vadd.f32 %v2645_v61, %v2639_v35 }
 0x248   : > { %2657 = vst [vmem:[%s325_s24 + $0x8] sm:$0xff] %v2653_v44 }
 0x24b   : > { %v2625_v39 = vpop.f32.mrf.mxu2 }
 0x24c   : > { %v2641_v38 = vmul.f32 %v2636_v28, %v2625_v39 }
 0x24e   : > { %v2655_v34 = vadd.f32 %v2650_v8, %v2641_v38 }
 0x250   : > { %2659 = vst [vmem:[%s325_s24 + $0x18] sm:$0xff] %v2655_v34 }
 0x251   : > { %2899 = shalt.err (!%p2896_p3)
}
 0x252   : > { %s2938_s22 = smov 256   ;;  %s2939_s24 = smov 16  }
 0x253   : > { %2819 = dma.vmem_to_hbm [thread:$0]  (%p3028_p5), %s2674_s29, 512, %s2676_s14, %s2661_s16, %s2938_s22, %s2938_s22, %s2939_s24  }
 0x254 PF: > { %p2825_p4 = scmp.ge.s32.totalorder %s2934_s12, 2  ;;  %s2690_s28 = sand.u32 1, %s2922_s30  }
 0x255   : > { %s2691_s13 = scalar_lea.sflag [#allocation5], %s2690_s28 }
 0x256   : > { %p2822_p7 = pnand %p2825_p4, %p3032_p6 }
 0x258   : > { %p2823_p8 = pneg %p2822_p7 }
 0x25a   : > { %2917 = dma.done.wait (%p2823_p8), %s2691_s13, 512  }
 0x25b   : > { %2919 = vsyncadd (%p2823_p8), %s2691_s13, 4294966784  ;;  %p19_p9 = scmp.ge.s32.totalorder %s3015_s15, 4   ;;  %s5217_s30 = smov %s2926_s10 }
 0x25c   : > { %s5218_s10 = smov %s2930_s11  ;;  %s5219_s11 = smov %s3026_s18 }
 0x25d   : > { %s5220_s12 = smov %s3015_s15  ;;  %21 = sbr.rel (!%p19_p9) target bundleno = 3 (0x3), region = 96 }
 0x262   :  { %2697 = vsyncpa [#allocation5], 1 }
 0x263   :  { %2699 = vsyncpa [#allocation5 + $0x1], 1 }

</bundles_post_ra>
